<compile_context>
chip_gen: v7x
topology: tpu7x:2x2x1
jax: 0.10.0
libtpu: 0.0.40
codegen_flags: <defaults>
</compile_context>

<pallas_src>
from functools import partial

import numpy as np
import jax
import jax.numpy as jnp
from jax.experimental import pallas as pl
from jax.experimental.pallas import tpu as pltpu


# -----------------------------------------------------------------------------
# Problem sizes (small, consistent with the module's forward)
# -----------------------------------------------------------------------------
B, C, H, W = 2, 4, 16, 16
S = H * W                     # 256 spatial positions -> lane axis
BS = B * S                    # 512 (batch folded onto lanes)
CPAD = 8                      # channels zero-padded to a full sublane group
HID = 32                      # hidden width of the synthetic denoiser
STEPS = 8                     # diffusion steps

S_NOISE, S_CHURN, S_TMIN, S_TMAX = 1.003, 5.0, 0.3, 2.0


def detect_nsplit():
    # 2-way lane split only pays off on 2-TensorCore chips (v7x); on 1-TC
    # v5e/v6e it just doubles grid invocations and halves matmul N.
    try:
        kind = jax.devices()[0].device_kind.lower()
    except Exception:
        return 1
    nsplit = 2 if ("v7" in kind or "7x" in kind) else 1
    if BS % nsplit != 0 or (BS // nsplit) % 128 != 0:
        nsplit = 1
    return nsplit


# -----------------------------------------------------------------------------
# Fused Pallas kernel: grid = (NSPLIT,) "parallel"; all Heun steps in-kernel
# -----------------------------------------------------------------------------
def heun_sampler_kernel(x0_ref, y_ref, z_ref,
                        w1x_ref, w1y_ref, b1_ref, wt_ref, w2_ref, b2_ref,
                        x_ref, *, step_scalars):
    # ---- step-invariant work, done once per lane chunk -----------------
    y = y_ref[...]                                                # (CPAD, LANE)
    # Conditioning contraction hoisted out of the step loop: W1y @ y + b1.
    h_y = (jnp.dot(w1y_ref[...], y, preferred_element_type=jnp.float32)
           + b1_ref[...])                                         # (HID, LANE)
    wt_b = jnp.broadcast_to(wt_ref[...], h_y.shape)               # hoisted bcast
    w1x = w1x_ref[...]                                            # (HID, CPAD)
    w2 = w2_ref[...]                                              # (CPAD, HID)
    b2 = b2_ref[...]                                              # (CPAD, 1)

    def denoiser(xx, cin, cskip, cout, cnoise):
        h = (jnp.dot(w1x, cin * xx, preferred_element_type=jnp.float32)
             + h_y + cnoise * wt_b)                               # (HID, LANE)
        h = jnp.maximum(h, 0.0)
        f = jnp.dot(w2, h, preferred_element_type=jnp.float32) + b2
        return cskip * xx + cout * f                              # (CPAD, LANE)

    # ---- fully-unrolled Heun step loop; x carried in registers ---------
    x = x0_ref[...]
    n = len(step_scalars)
    for i, sc in enumerate(step_scalars):                         # compile-time
        (nz, dt, inv_th, inv_tn,
         cin_h, cskip_h, cout_h, cnoise_h,
         cin_n, cskip_n, cout_n, cnoise_n) = sc

        x_hat = x + nz * z_ref[i]                                 # churned state
        # Euler predictor.
        d1 = (x_hat - denoiser(x_hat, cin_h, cskip_h, cout_h, cnoise_h)) * inv_th
        x_euler = x_hat + dt * d1
        if i < n - 1:
            # 2nd-order (Heun) corrector; skipped at compile time on last step.
            d2 = (x_euler - denoiser(x_euler, cin_n, cskip_n, cout_n, cnoise_n)) * inv_tn
            x = x_hat + dt * 0.5 * (d1 + d2)
        else:
            x = x_euler

    x_ref[...] = x


def make_sampler(step_scalars, nsplit):
    lane = BS // nsplit
    kernel = partial(heun_sampler_kernel, step_scalars=step_scalars)
    full = lambda shape: pl.BlockSpec(shape, lambda p: (0,) * len(shape))
    act = pl.BlockSpec((CPAD, lane), lambda p: (0, p))
    return jax.jit(pl.pallas_call(
        kernel,
        out_shape=jax.ShapeDtypeStruct((CPAD, BS), jnp.float32),
        grid=(nsplit,),
        in_specs=[
            act,                                                   # x0
            act,                                                   # y
            pl.BlockSpec((STEPS, CPAD, lane), lambda p: (0, 0, p)),  # z (all steps resident)
            full((HID, CPAD)),                                     # W1x
            full((HID, CPAD)),                                     # W1y
            full((HID, 1)),                                        # b1
            full((HID, 1)),                                        # wt
            full((CPAD, HID)),                                     # W2
            full((CPAD, 1)),                                       # b2
        ],
        out_specs=pl.BlockSpec((CPAD, lane), lambda p: (0, p)),
        compiler_params=pltpu.CompilerParams(
            dimension_semantics=("parallel",)),
    ))


# -----------------------------------------------------------------------------
# Host-side: static sigma schedule, per-step compile-time scalars, layout
# -----------------------------------------------------------------------------
def karras_sigmas(steps, sigma_min=0.02, sigma_max=3.0, rho=7.0):
    i = np.arange(steps, dtype=np.float64)
    s = (sigma_max ** (1.0 / rho)
         + i / (steps - 1) * (sigma_min ** (1.0 / rho) - sigma_max ** (1.0 / rho))) ** rho
    return np.concatenate([s, [0.0]])                       # length steps+1


def edm_precond(sig):
    return (1.0 / np.sqrt(sig * sig + 1.0),                 # c_in
            1.0 / (sig * sig + 1.0),                        # c_skip
            sig / np.sqrt(sig * sig + 1.0),                 # c_out
            0.25 * np.log(sig) if sig > 0 else 0.0)         # c_noise (guarded)


def build_step_scalars(timesteps, steps):
    out = []
    for t, tn in zip(timesteps[:-1], timesteps[1:]):
        gamma = min(S_CHURN / steps, np.sqrt(2.0) - 1.0) if (S_TMIN <= t <= S_TMAX) else 0.0
        t_hat = t + gamma * t
        nz = S_NOISE * np.sqrt(max(t_hat * t_hat - t * t, 0.0))
        dt = tn - t_hat
        cin_h, cskip_h, cout_h, cnoise_h = edm_precond(t_hat)
        cin_n, cskip_n, cout_n, cnoise_n = edm_precond(tn)
        inv_tn = 1.0 / tn if tn > 0 else 0.0                 # unused on last step
        out.append(tuple(np.float32(v) for v in (
            nz, dt, 1.0 / t_hat, inv_tn,
            cin_h, cskip_h, cout_h, cnoise_h,
            cin_n, cskip_n, cout_n, cnoise_n)))
    return tuple(out)


def nchw_to_lane(x):
    # (B, C, H, W) -> (CPAD, B*S), channels zero-padded to CPAD, lanes = b*S + s
    x = jnp.asarray(x, jnp.float32).reshape(B, C, S).transpose(1, 0, 2).reshape(C, BS)
    return jnp.pad(x, ((0, CPAD - C), (0, 0)))


def lane_to_nchw(x):
    return x[:C].reshape(C, B, S).transpose(1, 0, 2).reshape(B, C, H, W)


def init_denoiser_params(key):
    k1, k2, k3 = jax.random.split(key, 3)
    return {
        "w1x": jax.random.normal(k1, (HID, C), jnp.float32) / np.sqrt(C),
        "w1y": jax.random.normal(k2, (HID, C), jnp.float32) / np.sqrt(C),
        "b1":  jnp.zeros((HID, 1), jnp.float32),
        "wt":  jnp.linspace(-1.0, 1.0, HID, dtype=jnp.float32).reshape(HID, 1),
        "w2":  jax.random.normal(k3, (C, HID), jnp.float32) / np.sqrt(HID),
        "b2":  jnp.zeros((C, 1), jnp.float32),
    }


def pad_params(p):
    pad_cols = lambda w: jnp.pad(w, ((0, 0), (0, CPAD - C)))          # (HID, CPAD)
    w2 = jnp.pad(p["w2"], ((0, CPAD - C), (0, 0)))                    # (CPAD, HID)
    b2 = jnp.pad(p["b2"], ((0, CPAD - C), (0, 0)))                    # (CPAD, 1)
    return pad_cols(p["w1x"]), pad_cols(p["w1y"]), p["b1"], p["wt"], w2, b2


def heun_sample(y_nchw, params, key, steps=STEPS):
    timesteps = karras_sigmas(steps)
    step_scalars = build_step_scalars(timesteps, steps)

    k0, kz = jax.random.split(key)
    x0_nchw = jnp.float32(timesteps[0]) * jax.random.normal(k0, (B, C, H, W), jnp.float32)
    z_nchw = jax.random.normal(kz, (steps, B, C, H, W), jnp.float32)

    x0 = nchw_to_lane(x0_nchw)
    y_lane = nchw_to_lane(y_nchw)
    z = z_nchw.reshape(steps, B, C, S).transpose(0, 2, 1, 3).reshape(steps, C, BS)
    z = jnp.pad(z, ((0, 0), (0, CPAD - C), (0, 0)))

    w1x, w1y, b1, wt, w2, b2 = pad_params(params)
    sampler = make_sampler(step_scalars, detect_nsplit())
    out = sampler(x0, y_lane, z, w1x, w1y, b1, wt, w2, b2)
    return lane_to_nchw(out), (x0_nchw, z_nchw, step_scalars)


# -----------------------------------------------------------------------------
# Pure-JAX reference (unfused, NCHW-native) for correctness checking
# -----------------------------------------------------------------------------
def reference_sample(y_nchw, params, x0_nchw, z_nchw, step_scalars):
    hp = jax.lax.Precision.HIGHEST
    y = jnp.asarray(y_nchw, jnp.float32).reshape(B, C, S)
    x = jnp.asarray(x0_nchw, jnp.float32).reshape(B, C, S)

    def denoiser(xx, cin, cskip, cout, cnoise):
        h = (jnp.einsum('hc,bcs->bhs', params["w1x"], cin * xx, precision=hp)
             + jnp.einsum('hc,bcs->bhs', params["w1y"], y, precision=hp)
             + params["b1"][None] + params["wt"][None] * cnoise)
        h = jnp.maximum(h, 0.0)
        f = jnp.einsum('ch,bhs->bcs', params["w2"], h, precision=hp) + params["b2"][None]
        return cskip * xx + cout * f

    n = len(step_scalars)
    for i, sc in enumerate(step_scalars):
        (nz, dt, inv_th, inv_tn,
         cin_h, cskip_h, cout_h, cnoise_h,
         cin_n, cskip_n, cout_n, cnoise_n) = sc
        z = z_nchw[i].reshape(B, C, S)
        x_hat = x + nz * z
        d = (x_hat - denoiser(x_hat, cin_h, cskip_h, cout_h, cnoise_h)) * inv_th
        x = x_hat + dt * d
        if i < n - 1:
            d2 = (x - denoiser(x, cin_n, cskip_n, cout_n, cnoise_n)) * inv_tn
            x = x_hat + dt * 0.5 * (d + d2)
    return x.reshape(B, C, H, W)


if __name__ == "__main__":
    key = jax.random.PRNGKey(0)
    k_y, k_p, k_s = jax.random.split(key, 3)

    y_nchw = jax.random.normal(k_y, (B, C, H, W), jnp.float32)   # NCHW conditioning
    params = init_denoiser_params(k_p)

    out, (x0_nchw, z_nchw, step_scalars) = heun_sample(y_nchw, params, k_s)
    out = jax.block_until_ready(out)

    assert out.shape == (B, C, H, W)
    assert bool(jnp.all(jnp.isfinite(out)))

    ref = reference_sample(y_nchw, params, x0_nchw, z_nchw, step_scalars)
    np.testing.assert_allclose(np.asarray(out), np.asarray(ref), rtol=5e-3, atol=5e-3)

    print("KERNEL_OK")
</pallas_src>

<mosaic_0001>
module attributes {stable_mosaic.version = 11 : i64} {
  func.func @heun_sampler_kernel(%arg0: i32, %arg1: memref<8x512xf32, #tpu.memory_space<vmem>>, %arg2: memref<8x512xf32, #tpu.memory_space<vmem>>, %arg3: memref<8x8x512xf32, #tpu.memory_space<vmem>>, %arg4: memref<32x8xf32, #tpu.memory_space<vmem>>, %arg5: memref<32x8xf32, #tpu.memory_space<vmem>>, %arg6: memref<32x1xf32, #tpu.memory_space<vmem>>, %arg7: memref<32x1xf32, #tpu.memory_space<vmem>>, %arg8: memref<8x32xf32, #tpu.memory_space<vmem>>, %arg9: memref<8x1xf32, #tpu.memory_space<vmem>>, %arg10: memref<8x512xf32, #tpu.memory_space<vmem>>) attributes {dimension_semantics = [#tpu.dimension_semantics<parallel>], iteration_bounds = array<i64: 1>, scalar_prefetch = 0 : i64, scratch_operands = 0 : i64, tpu.core_type = #tpu.core_type<tc>, window_params = [{transform_indices = @transform_0, window_bounds = array<i64: 8, 512>}, {transform_indices = @transform_1, window_bounds = array<i64: 8, 512>}, {transform_indices = @transform_2, window_bounds = array<i64: 8, 8, 512>}, {pipeline_mode = #tpu.pipeline_mode<synchronous>, transform_indices = @transform_3, window_bounds = array<i64: 32, 8>}, {pipeline_mode = #tpu.pipeline_mode<synchronous>, transform_indices = @transform_4, window_bounds = array<i64: 32, 8>}, {pipeline_mode = #tpu.pipeline_mode<synchronous>, transform_indices = @transform_5, window_bounds = array<i64: 32, 1>}, {pipeline_mode = #tpu.pipeline_mode<synchronous>, transform_indices = @transform_6, window_bounds = array<i64: 32, 1>}, {pipeline_mode = #tpu.pipeline_mode<synchronous>, transform_indices = @transform_7, window_bounds = array<i64: 8, 32>}, {pipeline_mode = #tpu.pipeline_mode<synchronous>, transform_indices = @transform_8, window_bounds = array<i64: 8, 1>}, {transform_indices = @transform_9, window_bounds = array<i64: 8, 512>}]} {
    %c0 = arith.constant 0 : index
    %c0_0 = arith.constant 0 : index
    %0 = vector.load %arg2[%c0, %c0_0] : memref<8x512xf32, #tpu.memory_space<vmem>>, vector<8x512xf32>
    %c0_1 = arith.constant 0 : index
    %c0_2 = arith.constant 0 : index
    %1 = vector.load %arg5[%c0_1, %c0_2] : memref<32x8xf32, #tpu.memory_space<vmem>>, vector<32x8xf32>
    %cst = arith.constant dense<0.000000e+00> : vector<32x512xf32>
    %2 = tpu.matmul %1, %0, %cst {dimension_numbers = #tpu.dot_dimension_numbers<[1], [0], [0], [1], [0, 0, 1, 1], [], []>} : vector<32x8xf32>, vector<8x512xf32>, vector<32x512xf32> -> vector<32x512xf32>
    %c0_3 = arith.constant 0 : index
    %c0_4 = arith.constant 0 : index
    %3 = vector.load %arg6[%c0_3, %c0_4] : memref<32x1xf32, #tpu.memory_space<vmem>>, vector<32x1xf32>
    %4 = vector.broadcast %3 : vector<32x1xf32> to vector<32x512xf32>
    %5 = arith.addf %2, %4 : vector<32x512xf32>
    %c0_5 = arith.constant 0 : index
    %c0_6 = arith.constant 0 : index
    %6 = vector.load %arg7[%c0_5, %c0_6] : memref<32x1xf32, #tpu.memory_space<vmem>>, vector<32x1xf32>
    %7 = vector.shape_cast %6 : vector<32x1xf32> to vector<32x1xf32>
    %8 = vector.broadcast %7 : vector<32x1xf32> to vector<32x512xf32>
    %c0_7 = arith.constant 0 : index
    %c0_8 = arith.constant 0 : index
    %9 = vector.load %arg4[%c0_7, %c0_8] : memref<32x8xf32, #tpu.memory_space<vmem>>, vector<32x8xf32>
    %c0_9 = arith.constant 0 : index
    %c0_10 = arith.constant 0 : index
    %10 = vector.load %arg8[%c0_9, %c0_10] : memref<8x32xf32, #tpu.memory_space<vmem>>, vector<8x32xf32>
    %c0_11 = arith.constant 0 : index
    %c0_12 = arith.constant 0 : index
    %11 = vector.load %arg9[%c0_11, %c0_12] : memref<8x1xf32, #tpu.memory_space<vmem>>, vector<8x1xf32>
    %c0_13 = arith.constant 0 : index
    %c0_14 = arith.constant 0 : index
    %12 = vector.load %arg1[%c0_13, %c0_14] : memref<8x512xf32, #tpu.memory_space<vmem>>, vector<8x512xf32>
    %c0_15 = arith.constant 0 : index
    %c0_16 = arith.constant 0 : index
    %c0_17 = arith.constant 0 : index
    %13 = vector.load %arg3[%c0_15, %c0_16, %c0_17] : memref<8x8x512xf32, #tpu.memory_space<vmem>>, vector<1x8x512xf32>
    %14 = vector.shape_cast %13 : vector<1x8x512xf32> to vector<8x512xf32>
    %cst_18 = arith.constant 0.000000e+00 : f32
    %15 = vector.broadcast %cst_18 : f32 to vector<8x512xf32>
    %16 = arith.mulf %15, %14 : vector<8x512xf32>
    %17 = arith.addf %12, %16 : vector<8x512xf32>
    %cst_19 = arith.constant 0.316227764 : f32
    %18 = vector.broadcast %cst_19 : f32 to vector<8x512xf32>
    %19 = arith.mulf %18, %17 : vector<8x512xf32>
    %cst_20 = arith.constant dense<0.000000e+00> : vector<32x512xf32>
    %20 = tpu.matmul %9, %19, %cst_20 {dimension_numbers = #tpu.dot_dimension_numbers<[1], [0], [0], [1], [0, 0, 1, 1], [], []>} : vector<32x8xf32>, vector<8x512xf32>, vector<32x512xf32> -> vector<32x512xf32>
    %21 = arith.addf %20, %5 : vector<32x512xf32>
    %cst_21 = arith.constant 0.274653077 : f32
    %22 = vector.broadcast %cst_21 : f32 to vector<32x512xf32>
    %23 = arith.mulf %22, %8 : vector<32x512xf32>
    %24 = arith.addf %21, %23 : vector<32x512xf32>
    %cst_22 = arith.constant 0.000000e+00 : f32
    %25 = vector.broadcast %cst_22 : f32 to vector<32x512xf32>
    %26 = arith.maximumf %24, %25 : vector<32x512xf32>
    %cst_23 = arith.constant dense<0.000000e+00> : vector<8x512xf32>
    %27 = tpu.matmul %10, %26, %cst_23 {dimension_numbers = #tpu.dot_dimension_numbers<[1], [0], [0], [1], [0, 0, 1, 1], [], []>} : vector<8x32xf32>, vector<32x512xf32>, vector<8x512xf32> -> vector<8x512xf32>
    %28 = vector.broadcast %11 : vector<8x1xf32> to vector<8x512xf32>
    %29 = arith.addf %27, %28 : vector<8x512xf32>
    %cst_24 = arith.constant 1.000000e-01 : f32
    %30 = vector.broadcast %cst_24 : f32 to vector<8x512xf32>
    %31 = arith.mulf %30, %17 : vector<8x512xf32>
    %cst_25 = arith.constant 0.948683321 : f32
    %32 = vector.broadcast %cst_25 : f32 to vector<8x512xf32>
    %33 = arith.mulf %32, %29 : vector<8x512xf32>
    %34 = arith.addf %31, %33 : vector<8x512xf32>
    %35 = arith.subf %17, %34 : vector<8x512xf32>
    %cst_26 = arith.constant 0.333333343 : f32
    %36 = vector.broadcast %cst_26 : f32 to vector<8x512xf32>
    %37 = arith.mulf %35, %36 : vector<8x512xf32>
    %cst_27 = arith.constant -1.23564911 : f32
    %38 = vector.broadcast %cst_27 : f32 to vector<8x512xf32>
    %39 = arith.mulf %38, %37 : vector<8x512xf32>
    %40 = arith.addf %17, %39 : vector<8x512xf32>
    %cst_28 = arith.constant 0.493087649 : f32
    %41 = vector.broadcast %cst_28 : f32 to vector<8x512xf32>
    %42 = arith.mulf %41, %40 : vector<8x512xf32>
    %cst_29 = arith.constant dense<0.000000e+00> : vector<32x512xf32>
    %43 = tpu.matmul %9, %42, %cst_29 {dimension_numbers = #tpu.dot_dimension_numbers<[1], [0], [0], [1], [0, 0, 1, 1], [], []>} : vector<32x8xf32>, vector<8x512xf32>, vector<32x512xf32> -> vector<32x512xf32>
    %44 = arith.addf %43, %5 : vector<32x512xf32>
    %cst_30 = arith.constant 0.14194572 : f32
    %45 = vector.broadcast %cst_30 : f32 to vector<32x512xf32>
    %46 = arith.mulf %45, %8 : vector<32x512xf32>
    %47 = arith.addf %44, %46 : vector<32x512xf32>
    %cst_31 = arith.constant 0.000000e+00 : f32
    %48 = vector.broadcast %cst_31 : f32 to vector<32x512xf32>
    %49 = arith.maximumf %47, %48 : vector<32x512xf32>
    %cst_32 = arith.constant dense<0.000000e+00> : vector<8x512xf32>
    %50 = tpu.matmul %10, %49, %cst_32 {dimension_numbers = #tpu.dot_dimension_numbers<[1], [0], [0], [1], [0, 0, 1, 1], [], []>} : vector<8x32xf32>, vector<32x512xf32>, vector<8x512xf32> -> vector<8x512xf32>
    %51 = vector.broadcast %11 : vector<8x1xf32> to vector<8x512xf32>
    %52 = arith.addf %50, %51 : vector<8x512xf32>
    %cst_33 = arith.constant 0.243135422 : f32
    %53 = vector.broadcast %cst_33 : f32 to vector<8x512xf32>
    %54 = arith.mulf %53, %40 : vector<8x512xf32>
    %cst_34 = arith.constant 0.86997962 : f32
    %55 = vector.broadcast %cst_34 : f32 to vector<8x512xf32>
    %56 = arith.mulf %55, %52 : vector<8x512xf32>
    %57 = arith.addf %54, %56 : vector<8x512xf32>
    %58 = arith.subf %40, %57 : vector<8x512xf32>
    %cst_35 = arith.constant 0.566780686 : f32
    %59 = vector.broadcast %cst_35 : f32 to vector<8x512xf32>
    %60 = arith.mulf %58, %59 : vector<8x512xf32>
    %61 = arith.addf %37, %60 : vector<8x512xf32>
    %cst_36 = arith.constant -0.617824554 : f32
    %62 = vector.broadcast %cst_36 : f32 to vector<8x512xf32>
    %63 = arith.mulf %62, %61 : vector<8x512xf32>
    %64 = arith.addf %17, %63 : vector<8x512xf32>
    %c1 = arith.constant 1 : index
    %c0_37 = arith.constant 0 : index
    %c0_38 = arith.constant 0 : index
    %65 = vector.load %arg3[%c1, %c0_37, %c0_38] : memref<8x8x512xf32, #tpu.memory_space<vmem>>, vector<1x8x512xf32>
    %66 = vector.shape_cast %65 : vector<1x8x512xf32> to vector<8x512xf32>
    %cst_39 = arith.constant 1.76964402 : f32
    %67 = vector.broadcast %cst_39 : f32 to vector<8x512xf32>
    %68 = arith.mulf %67, %66 : vector<8x512xf32>
    %69 = arith.addf %64, %68 : vector<8x512xf32>
    %cst_40 = arith.constant 0.37201032 : f32
    %70 = vector.broadcast %cst_40 : f32 to vector<8x512xf32>
    %71 = arith.mulf %70, %69 : vector<8x512xf32>
    %cst_41 = arith.constant dense<0.000000e+00> : vector<32x512xf32>
    %72 = tpu.matmul %9, %71, %cst_41 {dimension_numbers = #tpu.dot_dimension_numbers<[1], [0], [0], [1], [0, 0, 1, 1], [], []>} : vector<32x8xf32>, vector<8x512xf32>, vector<32x512xf32> -> vector<32x512xf32>
    %73 = arith.addf %72, %5 : vector<32x512xf32>
    %cst_42 = arith.constant 0.228589118 : f32
    %74 = vector.broadcast %cst_42 : f32 to vector<32x512xf32>
    %75 = arith.mulf %74, %8 : vector<32x512xf32>
    %76 = arith.addf %73, %75 : vector<32x512xf32>
    %cst_43 = arith.constant 0.000000e+00 : f32
    %77 = vector.broadcast %cst_43 : f32 to vector<32x512xf32>
    %78 = arith.maximumf %76, %77 : vector<32x512xf32>
    %cst_44 = arith.constant dense<0.000000e+00> : vector<8x512xf32>
    %79 = tpu.matmul %10, %78, %cst_44 {dimension_numbers = #tpu.dot_dimension_numbers<[1], [0], [0], [1], [0, 0, 1, 1], [], []>} : vector<8x32xf32>, vector<32x512xf32>, vector<8x512xf32> -> vector<8x512xf32>
    %80 = vector.broadcast %11 : vector<8x1xf32> to vector<8x512xf32>
    %81 = arith.addf %79, %80 : vector<8x512xf32>
    %cst_45 = arith.constant 0.138391674 : f32
    %82 = vector.broadcast %cst_45 : f32 to vector<8x512xf32>
    %83 = arith.mulf %82, %69 : vector<8x512xf32>
    %cst_46 = arith.constant 0.928228617 : f32
    %84 = vector.broadcast %cst_46 : f32 to vector<8x512xf32>
    %85 = arith.mulf %84, %81 : vector<8x512xf32>
    %86 = arith.addf %83, %85 : vector<8x512xf32>
    %87 = arith.subf %69, %86 : vector<8x512xf32>
    %cst_47 = arith.constant 0.400774449 : f32
    %88 = vector.broadcast %cst_47 : f32 to vector<8x512xf32>
    %89 = arith.mulf %87, %88 : vector<8x512xf32>
    %cst_48 = arith.constant -1.50177538 : f32
    %90 = vector.broadcast %cst_48 : f32 to vector<8x512xf32>
    %91 = arith.mulf %90, %89 : vector<8x512xf32>
    %92 = arith.addf %69, %91 : vector<8x512xf32>
    %cst_49 = arith.constant 0.70944637 : f32
    %93 = vector.broadcast %cst_49 : f32 to vector<8x512xf32>
    %94 = arith.mulf %93, %92 : vector<8x512xf32>
    %cst_50 = arith.constant dense<0.000000e+00> : vector<32x512xf32>
    %95 = tpu.matmul %9, %94, %cst_50 {dimension_numbers = #tpu.dot_dimension_numbers<[1], [0], [0], [1], [0, 0, 1, 1], [], []>} : vector<32x8xf32>, vector<8x512xf32>, vector<32x512xf32> -> vector<32x512xf32>
    %96 = arith.addf %95, %5 : vector<32x512xf32>
    %cst_51 = arith.constant -0.00165708433 : f32
    %97 = vector.broadcast %cst_51 : f32 to vector<32x512xf32>
    %98 = arith.mulf %97, %8 : vector<32x512xf32>
    %99 = arith.addf %96, %98 : vector<32x512xf32>
    %cst_52 = arith.constant 0.000000e+00 : f32
    %100 = vector.broadcast %cst_52 : f32 to vector<32x512xf32>
    %101 = arith.maximumf %99, %100 : vector<32x512xf32>
    %cst_53 = arith.constant dense<0.000000e+00> : vector<8x512xf32>
    %102 = tpu.matmul %10, %101, %cst_53 {dimension_numbers = #tpu.dot_dimension_numbers<[1], [0], [0], [1], [0, 0, 1, 1], [], []>} : vector<8x32xf32>, vector<32x512xf32>, vector<8x512xf32> -> vector<8x512xf32>
    %103 = vector.broadcast %11 : vector<8x1xf32> to vector<8x512xf32>
    %104 = arith.addf %102, %103 : vector<8x512xf32>
    %cst_54 = arith.constant 0.503314137 : f32
    %105 = vector.broadcast %cst_54 : f32 to vector<8x512xf32>
    %106 = arith.mulf %105, %92 : vector<8x512xf32>
    %cst_55 = arith.constant 0.704759418 : f32
    %107 = vector.broadcast %cst_55 : f32 to vector<8x512xf32>
    %108 = arith.mulf %107, %104 : vector<8x512xf32>
    %109 = arith.addf %106, %108 : vector<8x512xf32>
    %110 = arith.subf %92, %109 : vector<8x512xf32>
    %cst_56 = arith.constant 1.00665033 : f32
    %111 = vector.broadcast %cst_56 : f32 to vector<8x512xf32>
    %112 = arith.mulf %110, %111 : vector<8x512xf32>
    %113 = arith.addf %89, %112 : vector<8x512xf32>
    %cst_57 = arith.constant -0.750887691 : f32
    %114 = vector.broadcast %cst_57 : f32 to vector<8x512xf32>
    %115 = arith.mulf %114, %113 : vector<8x512xf32>
    %116 = arith.addf %69, %115 : vector<8x512xf32>
    %c2 = arith.constant 2 : index
    %c0_58 = arith.constant 0 : index
    %c0_59 = arith.constant 0 : index
    %117 = vector.load %arg3[%c2, %c0_58, %c0_59] : memref<8x8x512xf32, #tpu.memory_space<vmem>>, vector<1x8x512xf32>
    %118 = vector.shape_cast %117 : vector<1x8x512xf32> to vector<8x512xf32>
    %cst_60 = arith.constant 0.996373772 : f32
    %119 = vector.broadcast %cst_60 : f32 to vector<8x512xf32>
    %120 = arith.mulf %119, %118 : vector<8x512xf32>
    %121 = arith.addf %116, %120 : vector<8x512xf32>
    %cst_61 = arith.constant 0.579901516 : f32
    %122 = vector.broadcast %cst_61 : f32 to vector<8x512xf32>
    %123 = arith.mulf %122, %121 : vector<8x512xf32>
    %cst_62 = arith.constant dense<0.000000e+00> : vector<32x512xf32>
    %124 = tpu.matmul %9, %123, %cst_62 {dimension_numbers = #tpu.dot_dimension_numbers<[1], [0], [0], [1], [0, 0, 1, 1], [], []>} : vector<32x8xf32>, vector<8x512xf32>, vector<32x512xf32> -> vector<32x512xf32>
    %125 = arith.addf %124, %5 : vector<32x512xf32>
    %cst_63 = arith.constant 0.0849863142 : f32
    %126 = vector.broadcast %cst_63 : f32 to vector<32x512xf32>
    %127 = arith.mulf %126, %8 : vector<32x512xf32>
    %128 = arith.addf %125, %127 : vector<32x512xf32>
    %cst_64 = arith.constant 0.000000e+00 : f32
    %129 = vector.broadcast %cst_64 : f32 to vector<32x512xf32>
    %130 = arith.maximumf %128, %129 : vector<32x512xf32>
    %cst_65 = arith.constant dense<0.000000e+00> : vector<8x512xf32>
    %131 = tpu.matmul %10, %130, %cst_65 {dimension_numbers = #tpu.dot_dimension_numbers<[1], [0], [0], [1], [0, 0, 1, 1], [], []>} : vector<8x32xf32>, vector<32x512xf32>, vector<8x512xf32> -> vector<8x512xf32>
    %132 = vector.broadcast %11 : vector<8x1xf32> to vector<8x512xf32>
    %133 = arith.addf %131, %132 : vector<8x512xf32>
    %cst_66 = arith.constant 0.33628574 : f32
    %134 = vector.broadcast %cst_66 : f32 to vector<8x512xf32>
    %135 = arith.mulf %134, %121 : vector<8x512xf32>
    %cst_67 = arith.constant 0.814686596 : f32
    %136 = vector.broadcast %cst_67 : f32 to vector<8x512xf32>
    %137 = arith.mulf %136, %133 : vector<8x512xf32>
    %138 = arith.addf %135, %137 : vector<8x512xf32>
    %139 = arith.subf %121, %138 : vector<8x512xf32>
    %cst_68 = arith.constant 0.711809278 : f32
    %140 = vector.broadcast %cst_68 : f32 to vector<8x512xf32>
    %141 = arith.mulf %139, %140 : vector<8x512xf32>
    %cst_69 = arith.constant -0.8735677 : f32
    %142 = vector.broadcast %cst_69 : f32 to vector<8x512xf32>
    %143 = arith.mulf %142, %141 : vector<8x512xf32>
    %144 = arith.addf %121, %143 : vector<8x512xf32>
    %cst_70 = arith.constant 0.883096337 : f32
    %145 = vector.broadcast %cst_70 : f32 to vector<8x512xf32>
    %146 = arith.mulf %145, %144 : vector<8x512xf32>
    %cst_71 = arith.constant dense<0.000000e+00> : vector<32x512xf32>
    %147 = tpu.matmul %9, %146, %cst_71 {dimension_numbers = #tpu.dot_dimension_numbers<[1], [0], [0], [1], [0, 0, 1, 1], [], []>} : vector<32x8xf32>, vector<8x512xf32>, vector<32x512xf32> -> vector<32x512xf32>
    %148 = arith.addf %147, %5 : vector<32x512xf32>
    %cst_72 = arith.constant -0.158105716 : f32
    %149 = vector.broadcast %cst_72 : f32 to vector<32x512xf32>
    %150 = arith.mulf %149, %8 : vector<32x512xf32>
    %151 = arith.addf %148, %150 : vector<32x512xf32>
    %cst_73 = arith.constant 0.000000e+00 : f32
    %152 = vector.broadcast %cst_73 : f32 to vector<32x512xf32>
    %153 = arith.maximumf %151, %152 : vector<32x512xf32>
    %cst_74 = arith.constant dense<0.000000e+00> : vector<8x512xf32>
    %154 = tpu.matmul %10, %153, %cst_74 {dimension_numbers = #tpu.dot_dimension_numbers<[1], [0], [0], [1], [0, 0, 1, 1], [], []>} : vector<8x32xf32>, vector<32x512xf32>, vector<8x512xf32> -> vector<8x512xf32>
    %155 = vector.broadcast %11 : vector<8x1xf32> to vector<8x512xf32>
    %156 = arith.addf %154, %155 : vector<8x512xf32>
    %cst_75 = arith.constant 0.779859125 : f32
    %157 = vector.broadcast %cst_75 : f32 to vector<8x512xf32>
    %158 = arith.mulf %157, %144 : vector<8x512xf32>
    %cst_76 = arith.constant 0.4691917 : f32
    %159 = vector.broadcast %cst_76 : f32 to vector<8x512xf32>
    %160 = arith.mulf %159, %156 : vector<8x512xf32>
    %161 = arith.addf %158, %160 : vector<8x512xf32>
    %162 = arith.subf %144, %161 : vector<8x512xf32>
    %cst_77 = arith.constant 1.88216531 : f32
    %163 = vector.broadcast %cst_77 : f32 to vector<8x512xf32>
    %164 = arith.mulf %162, %163 : vector<8x512xf32>
    %165 = arith.addf %141, %164 : vector<8x512xf32>
    %cst_78 = arith.constant -0.43678385 : f32
    %166 = vector.broadcast %cst_78 : f32 to vector<8x512xf32>
    %167 = arith.mulf %166, %165 : vector<8x512xf32>
    %168 = arith.addf %121, %167 : vector<8x512xf32>
    %c3 = arith.constant 3 : index
    %c0_79 = arith.constant 0 : index
    %c0_80 = arith.constant 0 : index
    %169 = vector.load %arg3[%c3, %c0_79, %c0_80] : memref<8x8x512xf32, #tpu.memory_space<vmem>>, vector<1x8x512xf32>
    %170 = vector.shape_cast %169 : vector<1x8x512xf32> to vector<8x512xf32>
    %cst_81 = arith.constant 0.532896876 : f32
    %171 = vector.broadcast %cst_81 : f32 to vector<8x512xf32>
    %172 = arith.mulf %171, %170 : vector<8x512xf32>
    %173 = arith.addf %168, %172 : vector<8x512xf32>
    %cst_82 = arith.constant 0.799471735 : f32
    %174 = vector.broadcast %cst_82 : f32 to vector<8x512xf32>
    %175 = arith.mulf %174, %173 : vector<8x512xf32>
    %cst_83 = arith.constant dense<0.000000e+00> : vector<32x512xf32>
    %176 = tpu.matmul %9, %175, %cst_83 {dimension_numbers = #tpu.dot_dimension_numbers<[1], [0], [0], [1], [0, 0, 1, 1], [], []>} : vector<32x8xf32>, vector<8x512xf32>, vector<32x512xf32> -> vector<32x512xf32>
    %177 = arith.addf %176, %5 : vector<32x512xf32>
    %cst_84 = arith.constant -0.0714623183 : f32
    %178 = vector.broadcast %cst_84 : f32 to vector<32x512xf32>
    %179 = arith.mulf %178, %8 : vector<32x512xf32>
    %180 = arith.addf %177, %179 : vector<32x512xf32>
    %cst_85 = arith.constant 0.000000e+00 : f32
    %181 = vector.broadcast %cst_85 : f32 to vector<32x512xf32>
    %182 = arith.maximumf %180, %181 : vector<32x512xf32>
    %cst_86 = arith.constant dense<0.000000e+00> : vector<8x512xf32>
    %183 = tpu.matmul %10, %182, %cst_86 {dimension_numbers = #tpu.dot_dimension_numbers<[1], [0], [0], [1], [0, 0, 1, 1], [], []>} : vector<8x32xf32>, vector<32x512xf32>, vector<8x512xf32> -> vector<8x512xf32>
    %184 = vector.broadcast %11 : vector<8x1xf32> to vector<8x512xf32>
    %185 = arith.addf %183, %184 : vector<8x512xf32>
    %cst_87 = arith.constant 0.63915503 : f32
    %186 = vector.broadcast %cst_87 : f32 to vector<8x512xf32>
    %187 = arith.mulf %186, %173 : vector<8x512xf32>
    %cst_88 = arith.constant 0.600703716 : f32
    %188 = vector.broadcast %cst_88 : f32 to vector<8x512xf32>
    %189 = arith.mulf %188, %185 : vector<8x512xf32>
    %190 = arith.addf %187, %189 : vector<8x512xf32>
    %191 = arith.subf %173, %190 : vector<8x512xf32>
    %cst_89 = arith.constant 1.33089185 : f32
    %192 = vector.broadcast %cst_89 : f32 to vector<8x512xf32>
    %193 = arith.mulf %191, %192 : vector<8x512xf32>
    %cst_90 = arith.constant -0.484161705 : f32
    %194 = vector.broadcast %cst_90 : f32 to vector<8x512xf32>
    %195 = arith.mulf %194, %193 : vector<8x512xf32>
    %196 = arith.addf %173, %195 : vector<8x512xf32>
    %cst_91 = arith.constant 0.966103136 : f32
    %197 = vector.broadcast %cst_91 : f32 to vector<8x512xf32>
    %198 = arith.mulf %197, %196 : vector<8x512xf32>
    %cst_92 = arith.constant dense<0.000000e+00> : vector<32x512xf32>
    %199 = tpu.matmul %9, %198, %cst_92 {dimension_numbers = #tpu.dot_dimension_numbers<[1], [0], [0], [1], [0, 0, 1, 1], [], []>} : vector<32x8xf32>, vector<8x512xf32>, vector<32x512xf32> -> vector<32x512xf32>
    %200 = arith.addf %199, %5 : vector<32x512xf32>
    %cst_93 = arith.constant -0.329926193 : f32
    %201 = vector.broadcast %cst_93 : f32 to vector<32x512xf32>
    %202 = arith.mulf %201, %8 : vector<32x512xf32>
    %203 = arith.addf %200, %202 : vector<32x512xf32>
    %cst_94 = arith.constant 0.000000e+00 : f32
    %204 = vector.broadcast %cst_94 : f32 to vector<32x512xf32>
    %205 = arith.maximumf %203, %204 : vector<32x512xf32>
    %cst_95 = arith.constant dense<0.000000e+00> : vector<8x512xf32>
    %206 = tpu.matmul %10, %205, %cst_95 {dimension_numbers = #tpu.dot_dimension_numbers<[1], [0], [0], [1], [0, 0, 1, 1], [], []>} : vector<8x32xf32>, vector<32x512xf32>, vector<8x512xf32> -> vector<8x512xf32>
    %207 = vector.broadcast %11 : vector<8x1xf32> to vector<8x512xf32>
    %208 = arith.addf %206, %207 : vector<8x512xf32>
    %cst_96 = arith.constant 0.933355271 : f32
    %209 = vector.broadcast %cst_96 : f32 to vector<8x512xf32>
    %210 = arith.mulf %209, %196 : vector<8x512xf32>
    %cst_97 = arith.constant 0.258156449 : f32
    %211 = vector.broadcast %cst_97 : f32 to vector<8x512xf32>
    %212 = arith.mulf %211, %208 : vector<8x512xf32>
    %213 = arith.addf %210, %212 : vector<8x512xf32>
    %214 = arith.subf %196, %213 : vector<8x512xf32>
    %cst_98 = arith.constant 3.74231648 : f32
    %215 = vector.broadcast %cst_98 : f32 to vector<8x512xf32>
    %216 = arith.mulf %214, %215 : vector<8x512xf32>
    %217 = arith.addf %193, %216 : vector<8x512xf32>
    %cst_99 = arith.constant -0.242080852 : f32
    %218 = vector.broadcast %cst_99 : f32 to vector<8x512xf32>
    %219 = arith.mulf %218, %217 : vector<8x512xf32>
    %220 = arith.addf %173, %219 : vector<8x512xf32>
    %c4 = arith.constant 4 : index
    %c0_100 = arith.constant 0 : index
    %c0_101 = arith.constant 0 : index
    %221 = vector.load %arg3[%c4, %c0_100, %c0_101] : memref<8x8x512xf32, #tpu.memory_space<vmem>>, vector<1x8x512xf32>
    %222 = vector.shape_cast %221 : vector<1x8x512xf32> to vector<8x512xf32>
    %cst_102 = arith.constant 0.000000e+00 : f32
    %223 = vector.broadcast %cst_102 : f32 to vector<8x512xf32>
    %224 = arith.mulf %223, %222 : vector<8x512xf32>
    %225 = arith.addf %220, %224 : vector<8x512xf32>
    %cst_103 = arith.constant 0.966103136 : f32
    %226 = vector.broadcast %cst_103 : f32 to vector<8x512xf32>
    %227 = arith.mulf %226, %225 : vector<8x512xf32>
    %cst_104 = arith.constant dense<0.000000e+00> : vector<32x512xf32>
    %228 = tpu.matmul %9, %227, %cst_104 {dimension_numbers = #tpu.dot_dimension_numbers<[1], [0], [0], [1], [0, 0, 1, 1], [], []>} : vector<32x8xf32>, vector<8x512xf32>, vector<32x512xf32> -> vector<32x512xf32>
    %229 = arith.addf %228, %5 : vector<32x512xf32>
    %cst_105 = arith.constant -0.329926193 : f32
    %230 = vector.broadcast %cst_105 : f32 to vector<32x512xf32>
    %231 = arith.mulf %230, %8 : vector<32x512xf32>
    %232 = arith.addf %229, %231 : vector<32x512xf32>
    %cst_106 = arith.constant 0.000000e+00 : f32
    %233 = vector.broadcast %cst_106 : f32 to vector<32x512xf32>
    %234 = arith.maximumf %232, %233 : vector<32x512xf32>
    %cst_107 = arith.constant dense<0.000000e+00> : vector<8x512xf32>
    %235 = tpu.matmul %10, %234, %cst_107 {dimension_numbers = #tpu.dot_dimension_numbers<[1], [0], [0], [1], [0, 0, 1, 1], [], []>} : vector<8x32xf32>, vector<32x512xf32>, vector<8x512xf32> -> vector<8x512xf32>
    %236 = vector.broadcast %11 : vector<8x1xf32> to vector<8x512xf32>
    %237 = arith.addf %235, %236 : vector<8x512xf32>
    %cst_108 = arith.constant 0.933355271 : f32
    %238 = vector.broadcast %cst_108 : f32 to vector<8x512xf32>
    %239 = arith.mulf %238, %225 : vector<8x512xf32>
    %cst_109 = arith.constant 0.258156449 : f32
    %240 = vector.broadcast %cst_109 : f32 to vector<8x512xf32>
    %241 = arith.mulf %240, %237 : vector<8x512xf32>
    %242 = arith.addf %239, %241 : vector<8x512xf32>
    %243 = arith.subf %225, %242 : vector<8x512xf32>
    %cst_110 = arith.constant 3.74231648 : f32
    %244 = vector.broadcast %cst_110 : f32 to vector<8x512xf32>
    %245 = arith.mulf %243, %244 : vector<8x512xf32>
    %cst_111 = arith.constant -0.142519459 : f32
    %246 = vector.broadcast %cst_111 : f32 to vector<8x512xf32>
    %247 = arith.mulf %246, %245 : vector<8x512xf32>
    %248 = arith.addf %225, %247 : vector<8x512xf32>
    %cst_112 = arith.constant 0.992315113 : f32
    %249 = vector.broadcast %cst_112 : f32 to vector<8x512xf32>
    %250 = arith.mulf %249, %248 : vector<8x512xf32>
    %cst_113 = arith.constant dense<0.000000e+00> : vector<32x512xf32>
    %251 = tpu.matmul %9, %250, %cst_113 {dimension_numbers = #tpu.dot_dimension_numbers<[1], [0], [0], [1], [0, 0, 1, 1], [], []>} : vector<32x8xf32>, vector<8x512xf32>, vector<32x512xf32> -> vector<32x512xf32>
    %252 = arith.addf %251, %5 : vector<32x512xf32>
    %cst_114 = arith.constant -0.520471692 : f32
    %253 = vector.broadcast %cst_114 : f32 to vector<32x512xf32>
    %254 = arith.mulf %253, %8 : vector<32x512xf32>
    %255 = arith.addf %252, %254 : vector<32x512xf32>
    %cst_115 = arith.constant 0.000000e+00 : f32
    %256 = vector.broadcast %cst_115 : f32 to vector<32x512xf32>
    %257 = arith.maximumf %255, %256 : vector<32x512xf32>
    %cst_116 = arith.constant dense<0.000000e+00> : vector<8x512xf32>
    %258 = tpu.matmul %10, %257, %cst_116 {dimension_numbers = #tpu.dot_dimension_numbers<[1], [0], [0], [1], [0, 0, 1, 1], [], []>} : vector<8x32xf32>, vector<32x512xf32>, vector<8x512xf32> -> vector<8x512xf32>
    %259 = vector.broadcast %11 : vector<8x1xf32> to vector<8x512xf32>
    %260 = arith.addf %258, %259 : vector<8x512xf32>
    %cst_117 = arith.constant 0.984689295 : f32
    %261 = vector.broadcast %cst_117 : f32 to vector<8x512xf32>
    %262 = arith.mulf %261, %248 : vector<8x512xf32>
    %cst_118 = arith.constant 0.123736441 : f32
    %263 = vector.broadcast %cst_118 : f32 to vector<8x512xf32>
    %264 = arith.mulf %263, %260 : vector<8x512xf32>
    %265 = arith.addf %262, %264 : vector<8x512xf32>
    %266 = arith.subf %248, %265 : vector<8x512xf32>
    %cst_119 = arith.constant 8.01958656 : f32
    %267 = vector.broadcast %cst_119 : f32 to vector<8x512xf32>
    %268 = arith.mulf %266, %267 : vector<8x512xf32>
    %269 = arith.addf %245, %268 : vector<8x512xf32>
    %cst_120 = arith.constant -0.0712597296 : f32
    %270 = vector.broadcast %cst_120 : f32 to vector<8x512xf32>
    %271 = arith.mulf %270, %269 : vector<8x512xf32>
    %272 = arith.addf %225, %271 : vector<8x512xf32>
    %c5 = arith.constant 5 : index
    %c0_121 = arith.constant 0 : index
    %c0_122 = arith.constant 0 : index
    %273 = vector.load %arg3[%c5, %c0_121, %c0_122] : memref<8x8x512xf32, #tpu.memory_space<vmem>>, vector<1x8x512xf32>
    %274 = vector.shape_cast %273 : vector<1x8x512xf32> to vector<8x512xf32>
    %cst_123 = arith.constant 0.000000e+00 : f32
    %275 = vector.broadcast %cst_123 : f32 to vector<8x512xf32>
    %276 = arith.mulf %275, %274 : vector<8x512xf32>
    %277 = arith.addf %272, %276 : vector<8x512xf32>
    %cst_124 = arith.constant 0.992315113 : f32
    %278 = vector.broadcast %cst_124 : f32 to vector<8x512xf32>
    %279 = arith.mulf %278, %277 : vector<8x512xf32>
    %cst_125 = arith.constant dense<0.000000e+00> : vector<32x512xf32>
    %280 = tpu.matmul %9, %279, %cst_125 {dimension_numbers = #tpu.dot_dimension_numbers<[1], [0], [0], [1], [0, 0, 1, 1], [], []>} : vector<32x8xf32>, vector<8x512xf32>, vector<32x512xf32> -> vector<32x512xf32>
    %281 = arith.addf %280, %5 : vector<32x512xf32>
    %cst_126 = arith.constant -0.520471692 : f32
    %282 = vector.broadcast %cst_126 : f32 to vector<32x512xf32>
    %283 = arith.mulf %282, %8 : vector<32x512xf32>
    %284 = arith.addf %281, %283 : vector<32x512xf32>
    %cst_127 = arith.constant 0.000000e+00 : f32
    %285 = vector.broadcast %cst_127 : f32 to vector<32x512xf32>
    %286 = arith.maximumf %284, %285 : vector<32x512xf32>
    %cst_128 = arith.constant dense<0.000000e+00> : vector<8x512xf32>
    %287 = tpu.matmul %10, %286, %cst_128 {dimension_numbers = #tpu.dot_dimension_numbers<[1], [0], [0], [1], [0, 0, 1, 1], [], []>} : vector<8x32xf32>, vector<32x512xf32>, vector<8x512xf32> -> vector<8x512xf32>
    %288 = vector.broadcast %11 : vector<8x1xf32> to vector<8x512xf32>
    %289 = arith.addf %287, %288 : vector<8x512xf32>
    %cst_129 = arith.constant 0.984689295 : f32
    %290 = vector.broadcast %cst_129 : f32 to vector<8x512xf32>
    %291 = arith.mulf %290, %277 : vector<8x512xf32>
    %cst_130 = arith.constant 0.123736441 : f32
    %292 = vector.broadcast %cst_130 : f32 to vector<8x512xf32>
    %293 = arith.mulf %292, %289 : vector<8x512xf32>
    %294 = arith.addf %291, %293 : vector<8x512xf32>
    %295 = arith.subf %277, %294 : vector<8x512xf32>
    %cst_131 = arith.constant 8.01958656 : f32
    %296 = vector.broadcast %cst_131 : f32 to vector<8x512xf32>
    %297 = arith.mulf %295, %296 : vector<8x512xf32>
    %cst_132 = arith.constant -0.0716867819 : f32
    %298 = vector.broadcast %cst_132 : f32 to vector<8x512xf32>
    %299 = arith.mulf %298, %297 : vector<8x512xf32>
    %300 = arith.addf %277, %299 : vector<8x512xf32>
    %cst_133 = arith.constant 0.998598039 : f32
    %301 = vector.broadcast %cst_133 : f32 to vector<8x512xf32>
    %302 = arith.mulf %301, %300 : vector<8x512xf32>
    %cst_134 = arith.constant dense<0.000000e+00> : vector<32x512xf32>
    %303 = tpu.matmul %9, %302, %cst_134 {dimension_numbers = #tpu.dot_dimension_numbers<[1], [0], [0], [1], [0, 0, 1, 1], [], []>} : vector<32x8xf32>, vector<8x512xf32>, vector<32x512xf32> -> vector<32x512xf32>
    %304 = arith.addf %303, %5 : vector<32x512xf32>
    %cst_135 = arith.constant -0.734328448 : f32
    %305 = vector.broadcast %cst_135 : f32 to vector<32x512xf32>
    %306 = arith.mulf %305, %8 : vector<32x512xf32>
    %307 = arith.addf %304, %306 : vector<32x512xf32>
    %cst_136 = arith.constant 0.000000e+00 : f32
    %308 = vector.broadcast %cst_136 : f32 to vector<32x512xf32>
    %309 = arith.maximumf %307, %308 : vector<32x512xf32>
    %cst_137 = arith.constant dense<0.000000e+00> : vector<8x512xf32>
    %310 = tpu.matmul %10, %309, %cst_137 {dimension_numbers = #tpu.dot_dimension_numbers<[1], [0], [0], [1], [0, 0, 1, 1], [], []>} : vector<8x32xf32>, vector<32x512xf32>, vector<8x512xf32> -> vector<8x512xf32>
    %311 = vector.broadcast %11 : vector<8x1xf32> to vector<8x512xf32>
    %312 = arith.addf %310, %311 : vector<8x512xf32>
    %cst_138 = arith.constant 0.997198045 : f32
    %313 = vector.broadcast %cst_138 : f32 to vector<8x512xf32>
    %314 = arith.mulf %313, %300 : vector<8x512xf32>
    %cst_139 = arith.constant 0.052933611 : f32
    %315 = vector.broadcast %cst_139 : f32 to vector<8x512xf32>
    %316 = arith.mulf %315, %312 : vector<8x512xf32>
    %317 = arith.addf %314, %316 : vector<8x512xf32>
    %318 = arith.subf %300, %317 : vector<8x512xf32>
    %cst_140 = arith.constant 18.8651028 : f32
    %319 = vector.broadcast %cst_140 : f32 to vector<8x512xf32>
    %320 = arith.mulf %318, %319 : vector<8x512xf32>
    %321 = arith.addf %297, %320 : vector<8x512xf32>
    %cst_141 = arith.constant -0.035843391 : f32
    %322 = vector.broadcast %cst_141 : f32 to vector<8x512xf32>
    %323 = arith.mulf %322, %321 : vector<8x512xf32>
    %324 = arith.addf %277, %323 : vector<8x512xf32>
    %c6 = arith.constant 6 : index
    %c0_142 = arith.constant 0 : index
    %c0_143 = arith.constant 0 : index
    %325 = vector.load %arg3[%c6, %c0_142, %c0_143] : memref<8x8x512xf32, #tpu.memory_space<vmem>>, vector<1x8x512xf32>
    %326 = vector.shape_cast %325 : vector<1x8x512xf32> to vector<8x512xf32>
    %cst_144 = arith.constant 0.000000e+00 : f32
    %327 = vector.broadcast %cst_144 : f32 to vector<8x512xf32>
    %328 = arith.mulf %327, %326 : vector<8x512xf32>
    %329 = arith.addf %324, %328 : vector<8x512xf32>
    %cst_145 = arith.constant 0.998598039 : f32
    %330 = vector.broadcast %cst_145 : f32 to vector<8x512xf32>
    %331 = arith.mulf %330, %329 : vector<8x512xf32>
    %cst_146 = arith.constant dense<0.000000e+00> : vector<32x512xf32>
    %332 = tpu.matmul %9, %331, %cst_146 {dimension_numbers = #tpu.dot_dimension_numbers<[1], [0], [0], [1], [0, 0, 1, 1], [], []>} : vector<32x8xf32>, vector<8x512xf32>, vector<32x512xf32> -> vector<32x512xf32>
    %333 = arith.addf %332, %5 : vector<32x512xf32>
    %cst_147 = arith.constant -0.734328448 : f32
    %334 = vector.broadcast %cst_147 : f32 to vector<32x512xf32>
    %335 = arith.mulf %334, %8 : vector<32x512xf32>
    %336 = arith.addf %333, %335 : vector<32x512xf32>
    %cst_148 = arith.constant 0.000000e+00 : f32
    %337 = vector.broadcast %cst_148 : f32 to vector<32x512xf32>
    %338 = arith.maximumf %336, %337 : vector<32x512xf32>
    %cst_149 = arith.constant dense<0.000000e+00> : vector<8x512xf32>
    %339 = tpu.matmul %10, %338, %cst_149 {dimension_numbers = #tpu.dot_dimension_numbers<[1], [0], [0], [1], [0, 0, 1, 1], [], []>} : vector<8x32xf32>, vector<32x512xf32>, vector<8x512xf32> -> vector<8x512xf32>
    %340 = vector.broadcast %11 : vector<8x1xf32> to vector<8x512xf32>
    %341 = arith.addf %339, %340 : vector<8x512xf32>
    %cst_150 = arith.constant 0.997198045 : f32
    %342 = vector.broadcast %cst_150 : f32 to vector<8x512xf32>
    %343 = arith.mulf %342, %329 : vector<8x512xf32>
    %cst_151 = arith.constant 0.052933611 : f32
    %344 = vector.broadcast %cst_151 : f32 to vector<8x512xf32>
    %345 = arith.mulf %344, %341 : vector<8x512xf32>
    %346 = arith.addf %343, %345 : vector<8x512xf32>
    %347 = arith.subf %329, %346 : vector<8x512xf32>
    %cst_152 = arith.constant 18.8651028 : f32
    %348 = vector.broadcast %cst_152 : f32 to vector<8x512xf32>
    %349 = arith.mulf %347, %348 : vector<8x512xf32>
    %cst_153 = arith.constant -0.0330079272 : f32
    %350 = vector.broadcast %cst_153 : f32 to vector<8x512xf32>
    %351 = arith.mulf %350, %349 : vector<8x512xf32>
    %352 = arith.addf %329, %351 : vector<8x512xf32>
    %cst_154 = arith.constant 0.999800086 : f32
    %353 = vector.broadcast %cst_154 : f32 to vector<8x512xf32>
    %354 = arith.mulf %353, %352 : vector<8x512xf32>
    %cst_155 = arith.constant dense<0.000000e+00> : vector<32x512xf32>
    %355 = tpu.matmul %9, %354, %cst_155 {dimension_numbers = #tpu.dot_dimension_numbers<[1], [0], [0], [1], [0, 0, 1, 1], [], []>} : vector<32x8xf32>, vector<8x512xf32>, vector<32x512xf32> -> vector<32x512xf32>
    %356 = arith.addf %355, %5 : vector<32x512xf32>
    %cst_156 = arith.constant -0.978005766 : f32
    %357 = vector.broadcast %cst_156 : f32 to vector<32x512xf32>
    %358 = arith.mulf %357, %8 : vector<32x512xf32>
    %359 = arith.addf %356, %358 : vector<32x512xf32>
    %cst_157 = arith.constant 0.000000e+00 : f32
    %360 = vector.broadcast %cst_157 : f32 to vector<32x512xf32>
    %361 = arith.maximumf %359, %360 : vector<32x512xf32>
    %cst_158 = arith.constant dense<0.000000e+00> : vector<8x512xf32>
    %362 = tpu.matmul %10, %361, %cst_158 {dimension_numbers = #tpu.dot_dimension_numbers<[1], [0], [0], [1], [0, 0, 1, 1], [], []>} : vector<8x32xf32>, vector<32x512xf32>, vector<8x512xf32> -> vector<8x512xf32>
    %363 = vector.broadcast %11 : vector<8x1xf32> to vector<8x512xf32>
    %364 = arith.addf %362, %363 : vector<8x512xf32>
    %cst_159 = arith.constant 0.999600172 : f32
    %365 = vector.broadcast %cst_159 : f32 to vector<8x512xf32>
    %366 = arith.mulf %365, %352 : vector<8x512xf32>
    %cst_160 = arith.constant 1.999600e-02 : f32
    %367 = vector.broadcast %cst_160 : f32 to vector<8x512xf32>
    %368 = arith.mulf %367, %364 : vector<8x512xf32>
    %369 = arith.addf %366, %368 : vector<8x512xf32>
    %370 = arith.subf %352, %369 : vector<8x512xf32>
    %cst_161 = arith.constant 5.000000e+01 : f32
    %371 = vector.broadcast %cst_161 : f32 to vector<8x512xf32>
    %372 = arith.mulf %370, %371 : vector<8x512xf32>
    %373 = arith.addf %349, %372 : vector<8x512xf32>
    %cst_162 = arith.constant -0.0165039636 : f32
    %374 = vector.broadcast %cst_162 : f32 to vector<8x512xf32>
    %375 = arith.mulf %374, %373 : vector<8x512xf32>
    %376 = arith.addf %329, %375 : vector<8x512xf32>
    %c7 = arith.constant 7 : index
    %c0_163 = arith.constant 0 : index
    %c0_164 = arith.constant 0 : index
    %377 = vector.load %arg3[%c7, %c0_163, %c0_164] : memref<8x8x512xf32, #tpu.memory_space<vmem>>, vector<1x8x512xf32>
    %378 = vector.shape_cast %377 : vector<1x8x512xf32> to vector<8x512xf32>
    %cst_165 = arith.constant 0.000000e+00 : f32
    %379 = vector.broadcast %cst_165 : f32 to vector<8x512xf32>
    %380 = arith.mulf %379, %378 : vector<8x512xf32>
    %381 = arith.addf %376, %380 : vector<8x512xf32>
    %cst_166 = arith.constant 0.999800086 : f32
    %382 = vector.broadcast %cst_166 : f32 to vector<8x512xf32>
    %383 = arith.mulf %382, %381 : vector<8x512xf32>
    %cst_167 = arith.constant dense<0.000000e+00> : vector<32x512xf32>
    %384 = tpu.matmul %9, %383, %cst_167 {dimension_numbers = #tpu.dot_dimension_numbers<[1], [0], [0], [1], [0, 0, 1, 1], [], []>} : vector<32x8xf32>, vector<8x512xf32>, vector<32x512xf32> -> vector<32x512xf32>
    %385 = arith.addf %384, %5 : vector<32x512xf32>
    %cst_168 = arith.constant -0.978005766 : f32
    %386 = vector.broadcast %cst_168 : f32 to vector<32x512xf32>
    %387 = arith.mulf %386, %8 : vector<32x512xf32>
    %388 = arith.addf %385, %387 : vector<32x512xf32>
    %cst_169 = arith.constant 0.000000e+00 : f32
    %389 = vector.broadcast %cst_169 : f32 to vector<32x512xf32>
    %390 = arith.maximumf %388, %389 : vector<32x512xf32>
    %cst_170 = arith.constant dense<0.000000e+00> : vector<8x512xf32>
    %391 = tpu.matmul %10, %390, %cst_170 {dimension_numbers = #tpu.dot_dimension_numbers<[1], [0], [0], [1], [0, 0, 1, 1], [], []>} : vector<8x32xf32>, vector<32x512xf32>, vector<8x512xf32> -> vector<8x512xf32>
    %392 = vector.broadcast %11 : vector<8x1xf32> to vector<8x512xf32>
    %393 = arith.addf %391, %392 : vector<8x512xf32>
    %cst_171 = arith.constant 0.999600172 : f32
    %394 = vector.broadcast %cst_171 : f32 to vector<8x512xf32>
    %395 = arith.mulf %394, %381 : vector<8x512xf32>
    %cst_172 = arith.constant 1.999600e-02 : f32
    %396 = vector.broadcast %cst_172 : f32 to vector<8x512xf32>
    %397 = arith.mulf %396, %393 : vector<8x512xf32>
    %398 = arith.addf %395, %397 : vector<8x512xf32>
    %399 = arith.subf %381, %398 : vector<8x512xf32>
    %cst_173 = arith.constant 5.000000e+01 : f32
    %400 = vector.broadcast %cst_173 : f32 to vector<8x512xf32>
    %401 = arith.mulf %399, %400 : vector<8x512xf32>
    %cst_174 = arith.constant -2.000000e-02 : f32
    %402 = vector.broadcast %cst_174 : f32 to vector<8x512xf32>
    %403 = arith.mulf %402, %401 : vector<8x512xf32>
    %404 = arith.addf %381, %403 : vector<8x512xf32>
    %c0_175 = arith.constant 0 : index
    %c0_176 = arith.constant 0 : index
    %405 = vector.load %arg10[%c0_175, %c0_176] : memref<8x512xf32, #tpu.memory_space<vmem>>, vector<8x512xf32>
    tpu.vector_store %arg10[%c0_175, %c0_176], %404 {strides = array<i32>} : memref<8x512xf32, #tpu.memory_space<vmem>>, vector<8x512xf32>,
    return
  }
  func.func @transform_0(%arg0: i32) -> (i32, i32) {
    %c0_i32 = arith.constant 0 : i32
    %c0_i32_0 = arith.constant 0 : i32
    return %c0_i32, %arg0 : i32, i32
  }
  func.func @transform_1(%arg0: i32) -> (i32, i32) {
    %c0_i32 = arith.constant 0 : i32
    %c0_i32_0 = arith.constant 0 : i32
    return %c0_i32, %arg0 : i32, i32
  }
  func.func @transform_2(%arg0: i32) -> (i32, i32, i32) {
    %c0_i32 = arith.constant 0 : i32
    %c0_i32_0 = arith.constant 0 : i32
    %c0_i32_1 = arith.constant 0 : i32
    return %c0_i32, %c0_i32_0, %arg0 : i32, i32, i32
  }
  func.func @transform_3(%arg0: i32) -> (i32, i32) {
    %c0_i32 = arith.constant 0 : i32
    %c0_i32_0 = arith.constant 0 : i32
    %c0_i32_1 = arith.constant 0 : i32
    return %c0_i32, %c0_i32_0 : i32, i32
  }
  func.func @transform_4(%arg0: i32) -> (i32, i32) {
    %c0_i32 = arith.constant 0 : i32
    %c0_i32_0 = arith.constant 0 : i32
    %c0_i32_1 = arith.constant 0 : i32
    return %c0_i32, %c0_i32_0 : i32, i32
  }
  func.func @transform_5(%arg0: i32) -> (i32, i32) {
    %c0_i32 = arith.constant 0 : i32
    %c0_i32_0 = arith.constant 0 : i32
    %c0_i32_1 = arith.constant 0 : i32
    return %c0_i32, %c0_i32_0 : i32, i32
  }
  func.func @transform_6(%arg0: i32) -> (i32, i32) {
    %c0_i32 = arith.constant 0 : i32
    %c0_i32_0 = arith.constant 0 : i32
    %c0_i32_1 = arith.constant 0 : i32
    return %c0_i32, %c0_i32_0 : i32, i32
  }
  func.func @transform_7(%arg0: i32) -> (i32, i32) {
    %c0_i32 = arith.constant 0 : i32
    %c0_i32_0 = arith.constant 0 : i32
    %c0_i32_1 = arith.constant 0 : i32
    return %c0_i32, %c0_i32_0 : i32, i32
  }
  func.func @transform_8(%arg0: i32) -> (i32, i32) {
    %c0_i32 = arith.constant 0 : i32
    %c0_i32_0 = arith.constant 0 : i32
    %c0_i32_1 = arith.constant 0 : i32
    return %c0_i32, %c0_i32_0 : i32, i32
  }
  func.func @transform_9(%arg0: i32) -> (i32, i32) {
    %c0_i32 = arith.constant 0 : i32
    %c0_i32_0 = arith.constant 0 : i32
    return %c0_i32, %arg0 : i32, i32
  }
}

</mosaic_0001>

<bundles_post_ra>
// kernel: tpu_custom_call.1
= control target key start
LH: loop header
LB: loop body
LE: loop exit
PB: predicated region body
PF: predicated region fallthrough
CT: control target
= control target key end

     0   :  { %14 = vsyncpa [#allocation3], 0  ;;  %s8496_s0 = inlined_call_operand.vmem [shape: f32[8,512], index: 0, kind: input, shape index: {}]   ;;  %s8497_s1 = inlined_call_operand.vmem [shape: f32[8,512], index: 1, kind: input, shape index: {}]   ;;  %s8498_s2 = inlined_call_operand.hbm [shape: f32[8,8,512], index: 2, kind: input, shape index: {}]   ;;  %s8499_s3 = inlined_call_operand.vmem [shape: f32[32,8], index: 3, kind: input, shape index: {}]   ;;  %s8500_s4 = inlined_call_operand.vmem [shape: f32[32,8], index: 4, kind: input, shape index: {}]   ;;  %s8501_s5 = inlined_call_operand.vmem [shape: f32[32,1], index: 5, kind: input, shape index: {}]   ;;  %s8502_s6 = inlined_call_operand.vmem [shape: f32[32,1], index: 6, kind: input, shape index: {}]   ;;  %s8503_s7 = inlined_call_operand.vmem [shape: f32[8,32], index: 7, kind: input, shape index: {}]   ;;  %s8504_s8 = inlined_call_operand.vmem [shape: f32[8,1], index: 8, kind: input, shape index: {}]   ;;  %s8505_s9 = inlined_call_operand.hbm [shape: f32[8,512], index: 9, kind: output, shape index: {}]  }
   0x1   :  { %15 = vsyncpa [#allocation4], 0  ;;  %s6748_s30 = smov [#allocation2]   ;;  %s6700_s13 = scalar_lea.hbm %s8498_s2, 4096 }
   0x2   :  { %s25_s10 = sshll.u32 %s6748_s30, 4  ;;  %p6701_p0 = scmp.ne.s32.totalorder %s8498_s2, %s6700_s13  ;;  %s26_s10 = int_to_ptr.vmem [resolvable:$true] %s25_s10 }
   0x3   :  { %p6704_p1 = scmp.lt.u32.totalorder %s6700_s13, %s8498_s2 }
   0x5   :  { %p6706_p2 = pnand %p6704_p1, %p6701_p0 }
   0x7   :  { %6709 = shalt.err (!%p6706_p2)
}
   0x8   :  { %s6710_s18 = scalar_lea.vmem %s26_s10, 4096  ;;  %p6715_p4 = scmp.lt.s32.totalorder %s26_s10, %s26_s10 }
   0x9   :  { %p6711_p3 = scmp.ne.s32.totalorder %s26_s10, %s6710_s18  ;;  %p6716_p5 = scmp.lt.s32.totalorder %s6710_s18, %s6710_s18 }
   0xb   :  { %p6717_p6 = por %p6716_p5, %p6715_p4 }
   0xd   :  { %p6718_p7 = pnand %p6717_p6, %p6711_p3 }
   0xf   :  { %6721 = shalt.err (!%p6718_p7)
}
  0x10   :  { %s6749_s19 = smov 512   ;;  %s6750_s20 = smov 32  }
  0x11   :  { %31 = dma.hbm_to_vmem [thread:$0]  %s8498_s2, 4096, %s26_s10, [#allocation3], %s6749_s19, %s6749_s19, %s6750_s20  }
  0x12   :  { %6744 = dma.done.wait [#allocation3], 4096  }
  0x13   :  { %6745 = vsyncadd [#allocation3], 4294963200  ;;  %v8506_v0 = vmov 0.0   ;;  %v6752_v1 = vmov 0   ;;  %v48_v2 = vld [vmem:[%s8497_s1 + $0x8] sm:$0xff]  ;;  %v50_v3 = vld [vmem:[%s8497_s1 + $0x18] sm:$0xff] }
  0x14   :  { %156 = vmatprep.mubr.f32.mxu0 %v8506_v0  ;;  %245 = vmatprep.mubr.f32.mxu1 %v8506_v0  ;;  %v47_v4 = vld [vmem:[%s8497_s1] sm:$0xff]  ;;  %vm79_vm0 = vcmask 64512   ;;  %v49_v5 = vld [vmem:[%s8497_s1 + $0x10] sm:$0xff]  ;;  %v301_v7 = vld [vmem:[%s8496_s0 + $0x8] sm:$0xff]  ;;  %vm551_vm1 = vcmask 261120  }
  0x15   :  { %6683 = vset.pattern.permute.xlu0 %v6752_v1  ;;  %6684 = vset.pattern.permute.xlu1 %v6752_v1  ;;  %v51_v6 = vld [vmem:[%s8500_s4] sm:$0xff]  ;;  %v305_v8 = vld [vmem:[#allocation2 + $0x8] sm:$0xff]  ;;  %v303_v9 = vld [vmem:[%s8496_s0 + $0x18] sm:$0xff] }
  0x16   :  { %92 = vmatprep.subr.mxu0 %v48_v2  ;;  %181 = vmatprep.subr.mxu1 %v50_v3  ;;  %v309_v10 = vmul.f32 0.0, %v305_v8  ;;  %v307_v11 = vld [vmem:[#allocation2 + $0x18] sm:$0xff]  ;;  %v300_v12 = vld [vmem:[%s8496_s0] sm:$0xff]  ;;  %v52_v14 = vld [vmem:[%s8500_s4 + $0x8] sm:$0xff] }
  0x17   :  { %93 = vmatpush1.msra.mxu0 %v47_v4  ;;  %182 = vmatpush1.msra.mxu1 %v49_v5  ;;  %v304_v13 = vld [vmem:[#allocation2] sm:$0xff]  ;;  %v311_v15 = vmul.f32 0.0, %v307_v11  ;;  %v302_v17 = vld [vmem:[%s8496_s0 + $0x10] sm:$0xff]  ;;  %v56_v30 = vld [vmem:[%s8501_s5 + $0x8] sm:$0xff] }
  0x18   :  { %6279 = vmatmul.mubr.msk.f32.vlgmr.msra.gmra.mrb[0].mxu0 %vm79_vm0, %v51_v6  ;;  %6283 = vmatmul.mubr.msk.f32.vlgmr.msra.gmra.mrb[0].mxu1 %vm79_vm0, %v51_v6  ;;  %v308_v16 = vmul.f32 0.0, %v304_v13  ;;  %v306_v18 = vld [vmem:[#allocation2 + $0x10] sm:$0xff]  ;;  %v6852_v19 = vadd.f32 %v309_v10, %v301_v7  ;;  %v55_v23 = vld [vmem:[%s8501_s5] sm:$0xff]  ;;  %v54_v32 = vld [vmem:[%s8500_s4 + $0x18] sm:$0xff] }
  0x19   :  { %162 = vmatprep.mubr.f32.mxu0 %v8506_v0  ;;  %251 = vmatprep.mubr.f32.mxu1 %v8506_v0  ;;  %v310_v20 = vmul.f32 0.0, %v306_v18  ;;  %v6854_v21 = vadd.f32 %v311_v15, %v303_v9  ;;  %v53_v28 = vld [vmem:[%s8500_s4 + $0x10] sm:$0xff]  ;;  %v270_v31 = vld [vmem:[%s8502_s6] sm:$0xff]  ;;  %v271_v34 = vld [vmem:[%s8502_s6 + $0x8] sm:$0xff] }
  0x1a   :  { %v6856_v22 = vadd.f32 %v308_v16, %v300_v12  ;;  %v317_v24 = vmul.f32 0.31622776, %v6852_v19  ;;  %61 = vperm.xlu0 %6683, %v55_v23   ;;  %276 = vperm.xlu1 %6684, %v270_v31   ;;  %v57_v33 = vld [vmem:[%s8501_s5 + $0x10] sm:$0xff]  ;;  %v6899_v35 = vld [vmem:[%s8499_s3] sm:$0xff]  ;;  %v58_v37 = vld [vmem:[%s8501_s5 + $0x18] sm:$0xff] }
  0x1b   :  { %v6864_v25 = vadd.f32 %v310_v20, %v302_v17  ;;  %v319_v26 = vmul.f32 0.31622776, %v6854_v21  ;;  %v272_v36 = vld [vmem:[%s8502_s6 + $0x10] sm:$0xff]  ;;  %v6916_v38 = vld [vmem:[%s8499_s3 + $0x8] sm:$0xff]  ;;  %v299_v39 = vld [vmem:[%s8504_s8] sm:$0xff] }
  0x1c   :  { %6280 = vmatmul.mubr.msk.f32.gmra.mrb[2].mxu0 %vm79_vm0, %v52_v14  ;;  %6284 = vmatmul.mubr.msk.f32.gmra.mrb[2].mxu1 %vm79_vm0, %v52_v14  ;;  %v316_v27 = vmul.f32 0.31622776, %v6856_v22  ;;  %v273_v40 = vld [vmem:[%s8502_s6 + $0x18] sm:$0xff]  ;;  %v6933_v41 = vld [vmem:[%s8499_s3 + $0x10] sm:$0xff] }
  0x1d   :  { %168 = vmatprep.mubr.f32.mxu0 %v8506_v0  ;;  %257 = vmatprep.mubr.f32.mxu1 %v8506_v0  ;;  %v318_v29 = vmul.f32 0.31622776, %v6864_v25  ;;  %v6944_v42 = vld [vmem:[%s8499_s3 + $0x18] sm:$0xff] }
  0x1e   :  { %332 = vmatprep.subr.mxu0 %v317_v24  ;;  %421 = vmatprep.subr.mxu1 %v319_v26 }
  0x1f   :  { %333 = vmatpush1.msra.mxu0 %v316_v27  ;;  %422 = vmatpush1.msra.mxu1 %v318_v29 }
  0x20   :  { %6281 = vmatmul.mubr.msk.f32.gmra.mrb[4].mxu0 %vm79_vm0, %v53_v28  ;;  %6285 = vmatmul.mubr.msk.f32.gmra.mrb[4].mxu1 %vm79_vm0, %v53_v28 }
  0x21   :  { %174 = vmatprep.mubr.f32.mxu0 %v8506_v0  ;;  %263 = vmatprep.mubr.f32.mxu1 %v8506_v0 }
  0x22   :  { %66 = vperm.xlu0 %6683, %v56_v30   ;;  %281 = vperm.xlu1 %6684, %v271_v34  }
  0x24   :  { %6282 = vmatmul.mubr.msk.f32.gmra.mrb[6].mxu0 %vm79_vm0, %v54_v32  ;;  %6286 = vmatmul.mubr.msk.f32.gmra.mrb[6].mxu1 %vm79_vm0, %v54_v32 }
  0x25   :  { %396 = vmatprep.mubr.f32.mxu0 %v8506_v0  ;;  %485 = vmatprep.mubr.f32.mxu1 %v8506_v0 }
  0x26   :  { %71 = vperm.xlu0 %6683, %v57_v33   ;;  %76 = vperm.xlu1 %6684, %v58_v37  }
  0x28   :  { %6287 = vmatmul.mubr.msk.f32.vlgmr.msra.gmra.mrb[8].mxu0 %vm79_vm0, %v6899_v35  ;;  %6291 = vmatmul.mubr.msk.f32.vlgmr.msra.gmra.mrb[8].mxu1 %vm79_vm0, %v6899_v35 }
  0x29   :  { %402 = vmatprep.mubr.f32.mxu0 %v8506_v0  ;;  %491 = vmatprep.mubr.f32.mxu1 %v8506_v0 }
  0x2a   :  { %286 = vperm.xlu0 %6683, %v272_v36   ;;  %291 = vperm.xlu1 %6684, %v273_v40  }
  0x2c   :  { %6288 = vmatmul.mubr.msk.f32.gmra.mrb[10].mxu0 %vm79_vm0, %v6916_v38  ;;  %6292 = vmatmul.mubr.msk.f32.gmra.mrb[10].mxu1 %vm79_vm0, %v6916_v38 }
  0x2d   :  { %408 = vmatprep.mubr.f32.mxu0 %v8506_v0  ;;  %497 = vmatprep.mubr.f32.mxu1 %v8506_v0 }
  0x2e   :  { %548 = vperm.xlu0 %6683, %v299_v39  }
  0x30   :  { %6289 = vmatmul.mubr.msk.f32.gmra.mrb[12].mxu0 %vm79_vm0, %v6933_v41  ;;  %6293 = vmatmul.mubr.msk.f32.gmra.mrb[12].mxu1 %vm79_vm0, %v6933_v41 }
  0x31   :  { %414 = vmatprep.mubr.f32.mxu0 %v8506_v0  ;;  %503 = vmatprep.mubr.f32.mxu1 %v8506_v0 }
  0x34   :  { %6290 = vmatmul.mubr.msk.f32.gmra.mrb[14].mxu0 %vm79_vm0, %v6944_v42  ;;  %6294 = vmatmul.mubr.msk.f32.gmra.mrb[14].mxu1 %vm79_vm0, %v6944_v42 }
  0x35   :  { %619 = vmatprep.mubr.f32.mxu0 %v8506_v0  ;;  %690 = vmatprep.mubr.f32.mxu1 %v8506_v0 }
  0x99   :  { %v62_v43 = vpop.permute.xlu0 %61  ;;  %v6953_v44 = vpop.permute.xlu1 %276 }
  0x9a   :  { %8528 = vst [vmem:[#allocation8_spill] sm:$0xff] %v6953_v44  ;;  %v510_v7 = vmul.f32 0.27465308, %v6953_v44 }
  0xa1   :  { %v67_v49 = vpop.permute.xlu0 %66  ;;  %v6955_v50 = vpop.permute.xlu1 %281 }
  0xa2   :  { %8529 = vst [vmem:[#allocation9_spill] sm:$0xff] %v6955_v50  ;;  %v511_v16 = vmul.f32 0.27465308, %v6955_v50 }
  0xa5   :  { %v72_v55 = vpop.permute.xlu0 %71  ;;  %v6957_v60 = vpop.permute.xlu1 %76 }
  0xa9   :  { %v6967_v3 = vpop.permute.xlu0 %286  ;;  %v6974_v8 = vpop.permute.xlu1 %291 }
  0xaa   :  { %8530 = vst [vmem:[#allocation10_spill] sm:$0xff] %v6967_v3  ;;  %v512_v17 = vmul.f32 0.27465308, %v6967_v3  ;;  %v6989_v24 = vmul.f32 0.27465308, %v6974_v8 }
  0xeb   :  { %v158_v45 = vpop.f32.mrb[0].mxu0  ;;  %v247_v46 = vpop.f32.mrb[0].mxu1 }
  0xec   :  { %v160_v47 = vpop.f32.mrb[1].mxu0  ;;  %v249_v48 = vpop.f32.mrb[1].mxu1  ;;  %v6965_v2 = vadd.f32 %v158_v45, %v62_v43  ;;  %v6969_v4 = vadd.f32 %v247_v46, %v62_v43 }
  0xed   :  { %v6971_v5 = vadd.f32 %v160_v47, %v62_v43  ;;  %v6976_v9 = vadd.f32 %v249_v48, %v62_v43 }
  0xef   :  { %v164_v51 = vpop.f32.mrb[2].mxu0  ;;  %v253_v52 = vpop.f32.mrb[2].mxu1 }
  0xf0   :  { %v166_v53 = vpop.f32.mrb[3].mxu0  ;;  %v255_v54 = vpop.f32.mrb[3].mxu1  ;;  %v6983_v18 = vadd.f32 %v164_v51, %v67_v49  ;;  %v6985_v20 = vadd.f32 %v253_v52, %v67_v49 }
  0xf1   :  { %v6991_v26 = vadd.f32 %v166_v53, %v67_v49  ;;  %v6993_v27 = vadd.f32 %v255_v54, %v67_v49 }
  0xf3   :  { %v170_v56 = vpop.f32.mrb[4].mxu0  ;;  %v259_v57 = vpop.f32.mrb[4].mxu1  ;;  %8531 = vst [vmem:[#allocation11_spill] sm:$0xff] %v6991_v26 }
  0xf4   :  { %v172_v58 = vpop.f32.mrb[5].mxu0  ;;  %v261_v59 = vpop.f32.mrb[5].mxu1  ;;  %v6995_v31 = vadd.f32 %v170_v56, %v72_v55  ;;  %v6997_v32 = vadd.f32 %v259_v57, %v72_v55 }
  0xf5   :  { %v7000_v39 = vadd.f32 %v172_v58, %v72_v55  ;;  %v7002_v40 = vadd.f32 %v261_v59, %v72_v55 }
  0xf6   :  { %8532 = vst [vmem:[#allocation12_spill] sm:$0xff] %v6995_v31  ;;  %8533 = vst [vmem:[#allocation13_spill] sm:$0xff] %v6997_v32 }
  0xf7   :  { %v176_v61 = vpop.f32.mrb[6].mxu0  ;;  %v6959_v62 = vpop.f32.mrb[6].mxu1 }
  0xf8   :  { %v6961_v63 = vpop.f32.mrb[7].mxu0  ;;  %v6963_v1 = vpop.f32.mrb[7].mxu1  ;;  %v7007_v47 = vadd.f32 %v176_v61, %v6957_v60 }
  0xfb   :  { %v398_v6 = vpop.f32.mrb[8].mxu0  ;;  %v487_v11 = vpop.f32.mrb[8].mxu1 }
  0xfc   :  { %v399_v10 = vadd.f32 %v398_v6, %v6965_v2  ;;  %v400_v12 = vpop.f32.mrb[9].mxu0  ;;  %v488_v13 = vadd.f32 %v487_v11, %v6969_v4  ;;  %v489_v15 = vpop.f32.mrb[9].mxu1 }
  0xfd   :  { %v401_v14 = vadd.f32 %v400_v12, %v6971_v5  ;;  %v490_v23 = vadd.f32 %v489_v15, %v6976_v9 }
  0xfe   :  { %v514_v28 = vadd.f32 %v510_v7, %v399_v10  ;;  %v516_v29 = vadd.f32 %v510_v7, %v488_v13 }
  0xff   :  { %v404_v30 = vpop.f32.mrb[10].mxu0  ;;  %v515_v33 = vadd.f32 %v510_v7, %v401_v14  ;;  %v493_v36 = vpop.f32.mrb[10].mxu1  ;;  %v517_v48 = vadd.f32 %v510_v7, %v490_v23 }
 0x100   :  { %v405_v34 = vadd.f32 %v404_v30, %v6983_v18  ;;  %v406_v37 = vpop.f32.mrb[11].mxu0  ;;  %v494_v43 = vadd.f32 %v493_v36, %v6985_v20  ;;  %v495_v46 = vpop.f32.mrb[11].mxu1  ;;  %v530_v52 = vmax.f32 %v514_v28, 0.0  ;;  %v532_v53 = vmax.f32 %v516_v29, 0.0 }
 0x101   :  { %v407_v45 = vadd.f32 %v406_v37, %v6991_v26  ;;  %v496_v51 = vadd.f32 %v495_v46, %v6993_v27  ;;  %v531_v58 = vmax.f32 %v515_v33, 0.0  ;;  %v533_v15 = vmax.f32 %v517_v48, 0.0 }
 0x102   :  { %v518_v49 = vadd.f32 %v511_v16, %v405_v34  ;;  %v520_v54 = vadd.f32 %v511_v16, %v494_v43  ;;  %v7016_v30 = vadd.f32 %v6959_v62, %v6957_v60  ;;  %v7024_v37 = vadd.f32 %v6963_v1, %v6957_v60 }
 0x103   :  { %v519_v56 = vadd.f32 %v511_v16, %v407_v45  ;;  %v410_v57 = vpop.f32.mrb[12].mxu0  ;;  %v521_v59 = vadd.f32 %v511_v16, %v496_v51  ;;  %v499_v10 = vpop.f32.mrb[12].mxu1  ;;  %v7020_v16 = vadd.f32 %v6961_v63, %v6957_v60 }
 0x104   :  { %v534_v55 = vmax.f32 %v518_v49, 0.0  ;;  %v411_v6 = vadd.f32 %v410_v57, %v6995_v31  ;;  %v412_v11 = vpop.f32.mrb[13].mxu0  ;;  %v536_v12 = vmax.f32 %v520_v54, 0.0  ;;  %v500_v61 = vadd.f32 %v499_v10, %v6997_v32  ;;  %v501_v14 = vpop.f32.mrb[13].mxu1 }
 0x105   :  { %v535_v13 = vmax.f32 %v519_v56, 0.0  ;;  %v413_v7 = vadd.f32 %v412_v11, %v7000_v39  ;;  %v537_v28 = vmax.f32 %v521_v59, 0.0  ;;  %v502_v29 = vadd.f32 %v501_v14, %v7002_v40 }
 0x106   :  { %v6439_v23 = vpack.c.bf16 %v534_v55, %v530_v52  ;;  %v6447_v33 = vpack.c.bf16 %v536_v12, %v532_v53  ;;  %v522_v43 = vadd.f32 %v512_v17, %v411_v6  ;;  %v524_v51 = vadd.f32 %v512_v17, %v500_v61 }
 0x107   :  { %v416_v34 = vpop.f32.mrb[14].mxu0  ;;  %v6437_v36 = vpack.c.bf16 %v535_v13, %v531_v58  ;;  %v505_v46 = vpop.f32.mrb[14].mxu1  ;;  %v6445_v49 = vpack.c.bf16 %v537_v28, %v533_v15  ;;  %v523_v62 = vadd.f32 %v512_v17, %v413_v7  ;;  %v525_v53 = vadd.f32 %v512_v17, %v502_v29 }
 0x108   :  { %v417_v45 = vadd.f32 %v416_v34, %v7007_v47  ;;  %v418_v48 = vpop.f32.mrb[15].mxu0  ;;  %v506_v52 = vadd.f32 %v505_v46, %v7016_v30  ;;  %v507_v54 = vpop.f32.mrb[15].mxu1  ;;  %v538_v58 = vmax.f32 %v522_v43, 0.0  ;;  %v540_v6 = vmax.f32 %v524_v51, 0.0 }
 0x109   :  { %v419_v63 = vadd.f32 %v418_v48, %v7020_v16  ;;  %6438 = vmatprep.subr.bf16.mxu0 %v6437_v36  ;;  %v508_v60 = vadd.f32 %v507_v54, %v7024_v37  ;;  %6446 = vmatprep.subr.bf16.mxu1 %v6445_v49  ;;  %v539_v10 = vmax.f32 %v523_v62, 0.0  ;;  %v541_v17 = vmax.f32 %v525_v53, 0.0 }
 0x10a   :  { %v526_v56 = vadd.f32 %v6989_v24, %v417_v45  ;;  %6440 = vmatpush1.bf16.msra.mxu0 %v6439_v23  ;;  %v528_v1 = vadd.f32 %v6989_v24, %v506_v52  ;;  %6448 = vmatpush1.bf16.msra.mxu1 %v6447_v33  ;;  %v7037_v23 = vld [vmem:[%s8503_s7] sm:$0xff]  ;;  %v697_v33 = vmul.f32 0.1, %v6856_v22  ;;  %v699_v45 = vmul.f32 0.1, %v6864_v25 }
 0x10b   :  { %v527_v57 = vadd.f32 %v6989_v24, %v419_v63  ;;  %v529_v59 = vadd.f32 %v6989_v24, %v508_v60  ;;  %v7045_v24 = vpop.permute.xlu0 %548  ;;  %v698_v48 = vmul.f32 0.1, %v6852_v19  ;;  %v700_v52 = vmul.f32 0.1, %v6854_v21 }
 0x10c   :  { %v542_v55 = vmax.f32 %v526_v56, 0.0  ;;  %v544_v11 = vmax.f32 %v528_v1, 0.0 }
 0x10d   :  { %v543_v12 = vmax.f32 %v527_v57, 0.0  ;;  %v545_v61 = vmax.f32 %v529_v59, 0.0 }
 0x10e   :  { %v6443_v13 = vpack.c.bf16 %v542_v55, %v538_v58  ;;  %v6451_v7 = vpack.c.bf16 %v544_v11, %v540_v6 }
 0x10f   :  { %v6441_v14 = vpack.c.bf16 %v543_v12, %v539_v10  ;;  %v6449_v15 = vpack.c.bf16 %v545_v61, %v541_v17 }
 0x111   :  { %6442 = vmatprep.subr.bf16.mxu0 %v6441_v14  ;;  %6450 = vmatprep.subr.bf16.mxu1 %v6449_v15 }
 0x112   :  { %6444 = vmatpush1.bf16.msra.mxu0 %v6443_v13  ;;  %6452 = vmatpush1.bf16.msra.mxu1 %v6451_v7 }
 0x115   :  { %6295 = vmatmul.mubr.msk.f32.vlgmr.msra.gmra.mrb[16].mxu0 %vm551_vm1, %v7037_v23  ;;  %6296 = vmatmul.mubr.msk.f32.vlgmr.msra.gmra.mrb[16].mxu1 %vm551_vm1, %v7037_v23 }
 0x116   :  { %793 = vmatprep.mubr.f32.mxu0 %v8506_v0  ;;  %882 = vmatprep.mubr.f32.mxu1 %v8506_v0 }
 0x1e8   :  { %v621_v28 = vpop.f32.mrb[16].mxu0  ;;  %v692_v34 = vpop.f32.mrb[16].mxu1 }
 0x1e9   :  { %v622_v29 = vadd.f32 %v621_v28, %v7045_v24  ;;  %v623_v36 = vpop.f32.mrb[17].mxu0  ;;  %v693_v43 = vadd.f32 %v692_v34, %v7045_v24  ;;  %v694_v49 = vpop.f32.mrb[17].mxu1 }
 0x1ea   :  { %v624_v46 = vadd.f32 %v623_v36, %v7045_v24  ;;  %v695_v62 = vadd.f32 %v694_v49, %v7045_v24  ;;  %v907_v49 = vmul.f32 0.14194572, %v6953_v44 }
 0x1eb   :  { %v701_v51 = vmul.f32 0.9486833, %v622_v29  ;;  %v703_v63 = vmul.f32 0.9486833, %v693_v43 }
 0x1ec   :  { %v702_v54 = vmul.f32 0.9486833, %v624_v46  ;;  %v704_v56 = vmul.f32 0.9486833, %v695_v62 }
 0x1ed   :  { %v705_v53 = vadd.f32 %v701_v51, %v697_v33  ;;  %v707_v60 = vadd.f32 %v703_v63, %v699_v45 }
 0x1ee   :  { %v706_v1 = vadd.f32 %v702_v54, %v698_v48  ;;  %v708_v58 = vadd.f32 %v704_v56, %v700_v52 }
 0x1ef   :  { %v709_v57 = vsub.f32 %v6856_v22, %v705_v53  ;;  %v711_v55 = vsub.f32 %v6864_v25, %v707_v60 }
 0x1f0   :  { %v710_v59 = vsub.f32 %v6852_v19, %v706_v1  ;;  %v712_v10 = vsub.f32 %v6854_v21, %v708_v58 }
 0x1f1   :  { %v7058_v6 = vmul.f32 0.33333334, %v709_v57  ;;  %v7061_v11 = vmul.f32 0.33333334, %v711_v55 }
 0x1f2   :  { %v7063_v12 = vmul.f32 0.33333334, %v710_v59  ;;  %v7066_v13 = vmul.f32 0.33333334, %v712_v10  ;;  %v908_v59 = vmul.f32 0.14194572, %v6955_v50 }
 0x1f3   :  { %v717_v17 = vmul.f32 -1.2356491, %v7058_v6  ;;  %v719_v61 = vmul.f32 -1.2356491, %v7061_v11 }
 0x1f4   :  { %v718_v7 = vmul.f32 -1.2356491, %v7063_v12  ;;  %v720_v15 = vmul.f32 -1.2356491, %v7066_v13 }
 0x1f5   :  { %v7071_v14 = vadd.f32 %v717_v17, %v6856_v22  ;;  %v7075_v28 = vadd.f32 %v719_v61, %v6864_v25 }
 0x1f6   :  { %v7078_v29 = vadd.f32 %v718_v7, %v6852_v19  ;;  %v7081_v33 = vadd.f32 %v720_v15, %v6854_v21 }
 0x1f7   :  { %v725_v43 = vmul.f32 0.49308765, %v7071_v14  ;;  %v727_v45 = vmul.f32 0.49308765, %v7075_v28 }
 0x1f8   :  { %v726_v34 = vmul.f32 0.49308765, %v7078_v29  ;;  %v728_v36 = vmul.f32 0.49308765, %v7081_v33 }
 0x1fa   :  { %729 = vmatprep.subr.mxu0 %v726_v34  ;;  %818 = vmatprep.subr.mxu1 %v728_v36 }
 0x1fb   :  { %730 = vmatpush1.msra.mxu0 %v725_v43  ;;  %819 = vmatpush1.msra.mxu1 %v727_v45  ;;  %v909_v45 = vmul.f32 0.14194572, %v6967_v3 }
 0x1fc   :  { %6297 = vmatmul.mubr.msk.f32.vlgmr.msra.gmra.mrb[18].mxu0 %vm79_vm0, %v6899_v35  ;;  %6301 = vmatmul.mubr.msk.f32.vlgmr.msra.gmra.mrb[18].mxu1 %vm79_vm0, %v6899_v35 }
 0x1fd   :  { %799 = vmatprep.mubr.f32.mxu0 %v8506_v0  ;;  %888 = vmatprep.mubr.f32.mxu1 %v8506_v0 }
 0x200   :  { %6298 = vmatmul.mubr.msk.f32.gmra.mrb[20].mxu0 %vm79_vm0, %v6916_v38  ;;  %6302 = vmatmul.mubr.msk.f32.gmra.mrb[20].mxu1 %vm79_vm0, %v6916_v38 }
 0x201   :  { %805 = vmatprep.mubr.f32.mxu0 %v8506_v0  ;;  %894 = vmatprep.mubr.f32.mxu1 %v8506_v0 }
 0x204   :  { %6299 = vmatmul.mubr.msk.f32.gmra.mrb[22].mxu0 %vm79_vm0, %v6933_v41  ;;  %6303 = vmatmul.mubr.msk.f32.gmra.mrb[22].mxu1 %vm79_vm0, %v6933_v41 }
 0x205   :  { %811 = vmatprep.mubr.f32.mxu0 %v8506_v0  ;;  %900 = vmatprep.mubr.f32.mxu1 %v8506_v0 }
 0x208   :  { %6300 = vmatmul.mubr.msk.f32.gmra.mrb[24].mxu0 %vm79_vm0, %v6944_v42  ;;  %6304 = vmatmul.mubr.msk.f32.gmra.mrb[24].mxu1 %vm79_vm0, %v6944_v42 }
 0x209   :  { %1007 = vmatprep.mubr.f32.mxu0 %v8506_v0  ;;  %1078 = vmatprep.mubr.f32.mxu1 %v8506_v0 }
 0x2cf   :  { %v795_v46 = vpop.f32.mrb[18].mxu0  ;;  %v884_v51 = vpop.f32.mrb[18].mxu1 }
 0x2d0   :  { %v796_v48 = vadd.f32 %v795_v46, %v6965_v2  ;;  %v797_v62 = vpop.f32.mrb[19].mxu0  ;;  %v885_v52 = vadd.f32 %v884_v51, %v6969_v4  ;;  %v886_v54 = vpop.f32.mrb[19].mxu1 }
 0x2d1   :  { %v798_v63 = vadd.f32 %v797_v62, %v6971_v5  ;;  %v887_v56 = vadd.f32 %v886_v54, %v6976_v9 }
 0x2d2   :  { %v911_v53 = vadd.f32 %v907_v49, %v796_v48  ;;  %v913_v60 = vadd.f32 %v907_v49, %v885_v52 }
 0x2d3   :  { %v912_v1 = vadd.f32 %v907_v49, %v798_v63  ;;  %v801_v57 = vpop.f32.mrb[20].mxu0  ;;  %v914_v58 = vadd.f32 %v907_v49, %v887_v56  ;;  %v890_v10 = vpop.f32.mrb[20].mxu1 }
 0x2d4   :  { %v802_v55 = vadd.f32 %v801_v57, %v6983_v18  ;;  %v803_v17 = vpop.f32.mrb[21].mxu0  ;;  %v891_v61 = vadd.f32 %v890_v10, %v6985_v20  ;;  %v892_v15 = vpop.f32.mrb[21].mxu1  ;;  %v927_v34 = vmax.f32 %v911_v53, 0.0  ;;  %v929_v46 = vmax.f32 %v913_v60, 0.0 }
 0x2d5   :  { %v804_v7 = vadd.f32 %v803_v17, %v6991_v26  ;;  %v893_v43 = vadd.f32 %v892_v15, %v6993_v27  ;;  %v928_v48 = vmax.f32 %v912_v1, 0.0  ;;  %v930_v52 = vmax.f32 %v914_v58, 0.0 }
 0x2d6   :  { %v915_v36 = vadd.f32 %v908_v59, %v802_v55  ;;  %v917_v49 = vadd.f32 %v908_v59, %v891_v61 }
 0x2d7   :  { %v916_v51 = vadd.f32 %v908_v59, %v804_v7  ;;  %v807_v62 = vpop.f32.mrb[22].mxu0  ;;  %v918_v54 = vadd.f32 %v908_v59, %v893_v43  ;;  %v896_v57 = vpop.f32.mrb[22].mxu1 }
 0x2d8   :  { %v931_v63 = vmax.f32 %v915_v36, 0.0  ;;  %v808_v56 = vadd.f32 %v807_v62, %v6995_v31  ;;  %v809_v10 = vpop.f32.mrb[23].mxu0  ;;  %v933_v17 = vmax.f32 %v917_v49, 0.0  ;;  %v897_v53 = vadd.f32 %v896_v57, %v6997_v32  ;;  %v898_v15 = vpop.f32.mrb[23].mxu1 }
 0x2d9   :  { %v932_v0 = vmax.f32 %v916_v51, 0.0  ;;  %v810_v55 = vadd.f32 %v809_v10, %v7000_v39  ;;  %v934_v60 = vmax.f32 %v918_v54, 0.0  ;;  %v899_v61 = vadd.f32 %v898_v15, %v7002_v40 }
 0x2da   :  { %v6455_v3 = vpack.c.bf16 %v931_v63, %v927_v34  ;;  %v919_v1 = vadd.f32 %v909_v45, %v808_v56  ;;  %v6463_v7 = vpack.c.bf16 %v933_v17, %v929_v46  ;;  %v921_v58 = vadd.f32 %v909_v45, %v897_v53 }
 0x2db   :  { %v920_v36 = vadd.f32 %v909_v45, %v810_v55  ;;  %v813_v59 = vpop.f32.mrb[24].mxu0  ;;  %v6453_v43 = vpack.c.bf16 %v932_v0, %v928_v48  ;;  %v922_v62 = vadd.f32 %v909_v45, %v899_v61  ;;  %v910_v49 = vmul.f32 0.14194572, %v6974_v8  ;;  %v902_v51 = vpop.f32.mrb[24].mxu1 }
 0x2dc   :  { %v814_v31 = vadd.f32 %v813_v59, %v7007_v47  ;;  %v815_v57 = vpop.f32.mrb[25].mxu0  ;;  %v6461_v32 = vpack.c.bf16 %v934_v60, %v930_v52  ;;  %v903_v10 = vadd.f32 %v902_v51, %v7016_v30  ;;  %v904_v63 = vpop.f32.mrb[25].mxu1  ;;  %v935_v48 = vmax.f32 %v919_v1, 0.0 }
 0x2dd   :  { %v816_v34 = vadd.f32 %v815_v57, %v7020_v16  ;;  %6454 = vmatprep.subr.bf16.mxu0 %v6453_v43  ;;  %v905_v46 = vadd.f32 %v904_v63, %v7024_v37  ;;  %v937_v53 = vmax.f32 %v921_v58, 0.0  ;;  %v936_v55 = vmax.f32 %v920_v36, 0.0 }
 0x2de   :  { %v923_v54 = vadd.f32 %v910_v49, %v814_v31  ;;  %6462 = vmatprep.subr.bf16.mxu1 %v6461_v32  ;;  %6456 = vmatpush1.bf16.msra.mxu0 %v6455_v3  ;;  %v925_v0 = vadd.f32 %v910_v49, %v903_v10  ;;  %v938_v60 = vmax.f32 %v922_v62, 0.0  ;;  %v8534_v3 = vmov 0.0  }
 0x2df   :  { %v924_v45 = vadd.f32 %v910_v49, %v816_v34  ;;  %6464 = vmatpush1.bf16.msra.mxu1 %v6463_v7  ;;  %v926_v17 = vadd.f32 %v910_v49, %v905_v46  ;;  %v1085_v57 = vmul.f32 0.24313542, %v7071_v14  ;;  %v1087_v34 = vmul.f32 0.24313542, %v7075_v28 }
 0x2e0   :  { %v939_v56 = vmax.f32 %v923_v54, 0.0  ;;  %v941_v52 = vmax.f32 %v925_v0, 0.0  ;;  %v1086_v46 = vmul.f32 0.24313542, %v7078_v29 }
 0x2e1   :  { %v940_v15 = vmax.f32 %v924_v45, 0.0  ;;  %v942_v59 = vmax.f32 %v926_v17, 0.0 }
 0x2e2   :  { %v6459_v61 = vpack.c.bf16 %v939_v56, %v935_v48  ;;  %v6467_v51 = vpack.c.bf16 %v941_v52, %v937_v53  ;;  %v1088_v48 = vmul.f32 0.24313542, %v7081_v33 }
 0x2e3   :  { %v6457_v43 = vpack.c.bf16 %v940_v15, %v936_v55  ;;  %v6465_v31 = vpack.c.bf16 %v942_v59, %v938_v60 }
 0x2e5   :  { %6458 = vmatprep.subr.bf16.mxu0 %v6457_v43  ;;  %6466 = vmatprep.subr.bf16.mxu1 %v6465_v31  ;;  %v1120_v31 = vld [vmem:[#allocation2 + $0x30] sm:$0xff] }
 0x2e6   :  { %6460 = vmatpush1.bf16.msra.mxu0 %v6459_v61  ;;  %6468 = vmatpush1.bf16.msra.mxu1 %v6467_v51  ;;  %v1118_v51 = vld [vmem:[#allocation2 + $0x20] sm:$0xff] }
 0x2e9   :  { %6305 = vmatmul.mubr.msk.f32.vlgmr.msra.gmra.mrb[26].mxu0 %vm551_vm1, %v7037_v23  ;;  %6306 = vmatmul.mubr.msk.f32.vlgmr.msra.gmra.mrb[26].mxu1 %vm551_vm1, %v7037_v23 }
 0x2ea   :  { %1198 = vmatprep.mubr.f32.mxu0 %v8534_v3  ;;  %1287 = vmatprep.mubr.f32.mxu1 %v8534_v3 }
 0x3bc   :  { %v1009_v32 = vpop.f32.mrb[26].mxu0  ;;  %v1080_v7 = vpop.f32.mrb[26].mxu1 }
 0x3bd   :  { %v1010_v1 = vadd.f32 %v1009_v32, %v7045_v24  ;;  %v1011_v58 = vpop.f32.mrb[27].mxu0  ;;  %v1081_v36 = vadd.f32 %v1080_v7, %v7045_v24  ;;  %v1082_v49 = vpop.f32.mrb[27].mxu1  ;;  %v1119_v7 = vld [vmem:[#allocation2 + $0x28] sm:$0xff] }
 0x3be   :  { %v1012_v62 = vadd.f32 %v1011_v58, %v7045_v24  ;;  %v1083_v63 = vadd.f32 %v1082_v49, %v7045_v24 }
 0x3bf   :  { %v1089_v10 = vmul.f32 0.8699796, %v1010_v1  ;;  %v1091_v54 = vmul.f32 0.8699796, %v1081_v36 }
 0x3c0   :  { %v1090_v0 = vmul.f32 0.8699796, %v1012_v62  ;;  %v1092_v56 = vmul.f32 0.8699796, %v1083_v63  ;;  %v1121_v62 = vld [vmem:[#allocation2 + $0x38] sm:$0xff] }
 0x3c1   :  { %v1093_v45 = vadd.f32 %v1089_v10, %v1085_v57  ;;  %v1095_v17 = vadd.f32 %v1091_v54, %v1087_v34  ;;  %v1124_v57 = vmul.f32 1.769644, %v1120_v31  ;;  %v1123_v34 = vmul.f32 1.769644, %v1119_v7 }
 0x3c2   :  { %v1094_v53 = vadd.f32 %v1090_v0, %v1086_v46  ;;  %v1096_v52 = vadd.f32 %v1092_v56, %v1088_v48  ;;  %v1125_v46 = vmul.f32 1.769644, %v1121_v62 }
 0x3c3   :  { %v1097_v55 = vsub.f32 %v7071_v14, %v1093_v45  ;;  %v1099_v15 = vsub.f32 %v7075_v28, %v1095_v17  ;;  %v1122_v28 = vmul.f32 1.769644, %v1118_v51 }
 0x3c4   :  { %v1098_v60 = vsub.f32 %v7078_v29, %v1094_v53  ;;  %v1100_v59 = vsub.f32 %v7081_v33, %v1096_v52 }
 0x3c5   :  { %v1101_v61 = vmul.f32 0.5667807, %v1097_v55  ;;  %v1103_v43 = vmul.f32 0.5667807, %v1099_v15 }
 0x3c6   :  { %v1102_v32 = vmul.f32 0.5667807, %v1098_v60  ;;  %v1104_v58 = vmul.f32 0.5667807, %v1100_v59 }
 0x3c7   :  { %v1105_v1 = vadd.f32 %v1101_v61, %v7058_v6  ;;  %v1107_v36 = vadd.f32 %v1103_v43, %v7061_v11 }
 0x3c8   :  { %v1106_v14 = vadd.f32 %v1102_v32, %v7063_v12  ;;  %v1108_v29 = vadd.f32 %v1104_v58, %v7066_v13 }
 0x3c9   :  { %v1109_v49 = vmul.f32 -0.61782455, %v1105_v1  ;;  %v1111_v10 = vmul.f32 -0.61782455, %v1107_v36  ;;  %v1313_v1 = vmul.f32 0.22858912, %v6955_v50 }
 0x3ca   :  { %v1110_v33 = vmul.f32 -0.61782455, %v1106_v14  ;;  %v1112_v54 = vmul.f32 -0.61782455, %v1108_v29  ;;  %v8535_v29 = vld [vmem:[#allocation10_spill] sm:$0xff] }
 0x3cb   :  { %v1113_v63 = vadd.f32 %v1109_v49, %v6856_v22  ;;  %v1115_v6 = vadd.f32 %v1111_v10, %v6864_v25  ;;  %v1314_v10 = vmul.f32 0.22858912, %v8535_v29 }
 0x3cc   :  { %v1114_v0 = vadd.f32 %v1110_v33, %v6852_v19  ;;  %v1116_v12 = vadd.f32 %v1112_v54, %v6854_v21 }
 0x3cd   :  { %v7156_v11 = vadd.f32 %v1122_v28, %v1113_v63  ;;  %v7159_v45 = vadd.f32 %v1124_v57, %v1115_v6 }
 0x3ce   :  { %v7161_v48 = vadd.f32 %v1123_v34, %v1114_v0  ;;  %v7163_v13 = vadd.f32 %v1125_v46, %v1116_v12 }
 0x3cf   :  { %v1130_v17 = vmul.f32 0.37201032, %v7156_v11  ;;  %v1132_v25 = vmul.f32 0.37201032, %v7159_v45 }
 0x3d0   :  { %v1131_v56 = vmul.f32 0.37201032, %v7161_v48  ;;  %v1133_v22 = vmul.f32 0.37201032, %v7163_v13 }
 0x3d2   :  { %1134 = vmatprep.subr.mxu0 %v1131_v56  ;;  %1223 = vmatprep.subr.mxu1 %v1133_v22  ;;  %v8536_v56 = vld [vmem:[#allocation12_spill] sm:$0xff] }
 0x3d3   :  { %1135 = vmatpush1.msra.mxu0 %v1130_v17  ;;  %1224 = vmatpush1.msra.mxu1 %v1132_v25 }
 0x3d4   :  { %6307 = vmatmul.mubr.msk.f32.vlgmr.msra.gmra.mrb[28].mxu0 %vm79_vm0, %v6899_v35  ;;  %6311 = vmatmul.mubr.msk.f32.vlgmr.msra.gmra.mrb[28].mxu1 %vm79_vm0, %v6899_v35  ;;  %v1312_v35 = vmul.f32 0.22858912, %v6953_v44 }
 0x3d5   :  { %1204 = vmatprep.mubr.f32.mxu0 %v8534_v3  ;;  %1293 = vmatprep.mubr.f32.mxu1 %v8534_v3 }
 0x3d8   :  { %6308 = vmatmul.mubr.msk.f32.gmra.mrb[30].mxu0 %vm79_vm0, %v6916_v38  ;;  %6312 = vmatmul.mubr.msk.f32.gmra.mrb[30].mxu1 %vm79_vm0, %v6916_v38 }
 0x3d9   :  { %1210 = vmatprep.mubr.f32.mxu0 %v8534_v3  ;;  %1299 = vmatprep.mubr.f32.mxu1 %v8534_v3 }
 0x3dc   :  { %6309 = vmatmul.mubr.msk.f32.gmra.mrb[32].mxu0 %vm79_vm0, %v6933_v41  ;;  %6313 = vmatmul.mubr.msk.f32.gmra.mrb[32].mxu1 %vm79_vm0, %v6933_v41 }
 0x3dd   :  { %1216 = vmatprep.mubr.f32.mxu0 %v8534_v3  ;;  %1305 = vmatprep.mubr.f32.mxu1 %v8534_v3 }
 0x3e0   :  { %6310 = vmatmul.mubr.msk.f32.gmra.mrb[34].mxu0 %vm79_vm0, %v6944_v42  ;;  %6314 = vmatmul.mubr.msk.f32.gmra.mrb[34].mxu1 %vm79_vm0, %v6944_v42 }
 0x3e1   :  { %1412 = vmatprep.mubr.f32.mxu0 %v8534_v3  ;;  %1483 = vmatprep.mubr.f32.mxu1 %v8534_v3 }
 0x4a7   :  { %v1200_v19 = vpop.f32.mrb[28].mxu0  ;;  %v1289_v38 = vpop.f32.mrb[28].mxu1 }
 0x4a8   :  { %v1201_v21 = vadd.f32 %v1200_v19, %v6965_v2  ;;  %v1202_v53 = vpop.f32.mrb[29].mxu0  ;;  %v1290_v55 = vadd.f32 %v1289_v38, %v6969_v4  ;;  %v1291_v15 = vpop.f32.mrb[29].mxu1 }
 0x4a9   :  { %v1203_v52 = vadd.f32 %v1202_v53, %v6971_v5  ;;  %v1292_v61 = vadd.f32 %v1291_v15, %v6976_v9 }
 0x4aa   :  { %v1316_v60 = vadd.f32 %v1312_v35, %v1201_v21  ;;  %v1318_v59 = vadd.f32 %v1312_v35, %v1290_v55 }
 0x4ab   :  { %v1317_v51 = vadd.f32 %v1312_v35, %v1203_v52  ;;  %v1206_v43 = vpop.f32.mrb[30].mxu0  ;;  %v1319_v31 = vadd.f32 %v1312_v35, %v1292_v61  ;;  %v1295_v7 = vpop.f32.mrb[30].mxu1  ;;  %v8537_v35 = vld [vmem:[#allocation13_spill] sm:$0xff] }
 0x4ac   :  { %v1207_v32 = vadd.f32 %v1206_v43, %v6983_v18  ;;  %v1208_v58 = vpop.f32.mrb[31].mxu0  ;;  %v1296_v36 = vadd.f32 %v1295_v7, %v6985_v20  ;;  %v1297_v62 = vpop.f32.mrb[31].mxu1  ;;  %v1332_v49 = vmax.f32 %v1316_v60, 0.0  ;;  %v1334_v33 = vmax.f32 %v1318_v59, 0.0 }
 0x4ad   :  { %v1209_v14 = vadd.f32 %v1208_v58, %v6991_v26  ;;  %v1298_v57 = vadd.f32 %v1297_v62, %v6993_v27  ;;  %v1333_v34 = vmax.f32 %v1317_v51, 0.0  ;;  %v1335_v6 = vmax.f32 %v1319_v31, 0.0 }
 0x4ae   :  { %v1320_v28 = vadd.f32 %v1313_v1, %v1207_v32  ;;  %v1322_v63 = vadd.f32 %v1313_v1, %v1296_v36  ;;  %v1315_v58 = vmul.f32 0.22858912, %v6974_v8 }
 0x4af   :  { %v1321_v54 = vadd.f32 %v1313_v1, %v1209_v14  ;;  %v1212_v46 = vpop.f32.mrb[32].mxu0  ;;  %v1323_v12 = vadd.f32 %v1313_v1, %v1298_v57  ;;  %v1301_v17 = vpop.f32.mrb[32].mxu1 }
 0x4b0   :  { %v1336_v0 = vmax.f32 %v1320_v28, 0.0  ;;  %v1213_v22 = vadd.f32 %v1212_v46, %v8536_v56  ;;  %v1214_v25 = vpop.f32.mrb[33].mxu0  ;;  %v1338_v19 = vmax.f32 %v1322_v63, 0.0  ;;  %v1302_v38 = vadd.f32 %v1301_v17, %v8537_v35  ;;  %v1303_v55 = vpop.f32.mrb[33].mxu1 }
 0x4b1   :  { %v1337_v21 = vmax.f32 %v1321_v54, 0.0  ;;  %v1215_v53 = vadd.f32 %v1214_v25, %v7000_v39  ;;  %v1339_v15 = vmax.f32 %v1323_v12, 0.0  ;;  %v1304_v61 = vadd.f32 %v1303_v55, %v7002_v40 }
 0x4b2   :  { %v6471_v52 = vpack.c.bf16 %v1336_v0, %v1332_v49  ;;  %v1324_v60 = vadd.f32 %v1314_v10, %v1213_v22  ;;  %v6479_v59 = vpack.c.bf16 %v1338_v19, %v1334_v33  ;;  %v1326_v51 = vadd.f32 %v1314_v10, %v1302_v38 }
 0x4b3   :  { %v1325_v43 = vadd.f32 %v1314_v10, %v1215_v53  ;;  %v1218_v31 = vpop.f32.mrb[34].mxu0  ;;  %v6469_v32 = vpack.c.bf16 %v1337_v21, %v1333_v34  ;;  %v1327_v1 = vadd.f32 %v1314_v10, %v1304_v61  ;;  %v1307_v36 = vpop.f32.mrb[34].mxu1  ;;  %v6477_v62 = vpack.c.bf16 %v1339_v15, %v1335_v6 }
 0x4b4   :  { %v1219_v7 = vadd.f32 %v1218_v31, %v7007_v47  ;;  %v1220_v14 = vpop.f32.mrb[35].mxu0  ;;  %v1308_v28 = vadd.f32 %v1307_v36, %v7016_v30  ;;  %v1309_v57 = vpop.f32.mrb[35].mxu1  ;;  %v1340_v54 = vmax.f32 %v1324_v60, 0.0  ;;  %v1342_v12 = vmax.f32 %v1326_v51, 0.0 }
 0x4b5   :  { %v1221_v49 = vadd.f32 %v1220_v14, %v7020_v16  ;;  %6470 = vmatprep.subr.bf16.mxu0 %v6469_v32  ;;  %v1310_v33 = vadd.f32 %v1309_v57, %v7024_v37  ;;  %6478 = vmatprep.subr.bf16.mxu1 %v6477_v62  ;;  %v1341_v22 = vmax.f32 %v1325_v43, 0.0  ;;  %v1343_v25 = vmax.f32 %v1327_v1, 0.0 }
 0x4b6   :  { %v1328_v63 = vadd.f32 %v1315_v58, %v1219_v7  ;;  %6472 = vmatpush1.bf16.msra.mxu0 %v6471_v52  ;;  %v1330_v34 = vadd.f32 %v1315_v58, %v1308_v28  ;;  %6480 = vmatpush1.bf16.msra.mxu1 %v6479_v59  ;;  %v1490_v31 = vmul.f32 0.13839167, %v7156_v11  ;;  %v1492_v1 = vmul.f32 0.13839167, %v7159_v45 }
 0x4b7   :  { %v1329_v10 = vadd.f32 %v1315_v58, %v1221_v49  ;;  %v1331_v0 = vadd.f32 %v1315_v58, %v1310_v33  ;;  %v1491_v36 = vmul.f32 0.13839167, %v7161_v48  ;;  %v1493_v28 = vmul.f32 0.13839167, %v7163_v13 }
 0x4b8   :  { %v1344_v46 = vmax.f32 %v1328_v63, 0.0  ;;  %v1346_v6 = vmax.f32 %v1330_v34, 0.0 }
 0x4b9   :  { %v1345_v17 = vmax.f32 %v1329_v10, 0.0  ;;  %v1347_v21 = vmax.f32 %v1331_v0, 0.0 }
 0x4ba   :  { %v6475_v19 = vpack.c.bf16 %v1344_v46, %v1340_v54  ;;  %v6483_v38 = vpack.c.bf16 %v1346_v6, %v1342_v12 }
 0x4bb   :  { %v6473_v53 = vpack.c.bf16 %v1345_v17, %v1341_v22  ;;  %v6481_v55 = vpack.c.bf16 %v1347_v21, %v1343_v25 }
 0x4bd   :  { %6474 = vmatprep.subr.bf16.mxu0 %v6473_v53  ;;  %6482 = vmatprep.subr.bf16.mxu1 %v6481_v55 }
 0x4be   :  { %6476 = vmatpush1.bf16.msra.mxu0 %v6475_v19  ;;  %6484 = vmatpush1.bf16.msra.mxu1 %v6483_v38 }
 0x4c1   :  { %6315 = vmatmul.mubr.msk.f32.vlgmr.msra.gmra.mrb[36].mxu0 %vm551_vm1, %v7037_v23  ;;  %6316 = vmatmul.mubr.msk.f32.vlgmr.msra.gmra.mrb[36].mxu1 %vm551_vm1, %v7037_v23 }
 0x4c2   :  { %1586 = vmatprep.mubr.f32.mxu0 %v8534_v3  ;;  %1675 = vmatprep.mubr.f32.mxu1 %v8534_v3 }
 0x594   :  { %v1414_v52 = vpop.f32.mrb[36].mxu0  ;;  %v1485_v60 = vpop.f32.mrb[36].mxu1 }
 0x595   :  { %v1415_v15 = vadd.f32 %v1414_v52, %v7045_v24  ;;  %v1416_v61 = vpop.f32.mrb[37].mxu0  ;;  %v1486_v59 = vadd.f32 %v1485_v60, %v7045_v24  ;;  %v1487_v43 = vpop.f32.mrb[37].mxu1 }
 0x596   :  { %v1417_v51 = vadd.f32 %v1416_v61, %v7045_v24  ;;  %v1488_v7 = vadd.f32 %v1487_v43, %v7045_v24  ;;  %v7273_v43 = vld [vmem:[%s8499_s3 + $0x8] sm:$0xff] }
 0x597   :  { %v1494_v32 = vmul.f32 0.9282286, %v1415_v15  ;;  %v1496_v58 = vmul.f32 0.9282286, %v1486_v59 }
 0x598   :  { %v1495_v14 = vmul.f32 0.9282286, %v1417_v51  ;;  %v1497_v49 = vmul.f32 0.9282286, %v1488_v7  ;;  %v7262_v51 = vld [vmem:[%s8499_s3] sm:$0xff] }
 0x599   :  { %v1498_v62 = vadd.f32 %v1494_v32, %v1490_v31  ;;  %v1500_v57 = vadd.f32 %v1496_v58, %v1492_v1  ;;  %v1700_v1 = vmul.f32 -0.0016570843, %v6953_v44 }
 0x59a   :  { %v1499_v63 = vadd.f32 %v1495_v14, %v1491_v36  ;;  %v1501_v34 = vadd.f32 %v1497_v49, %v1493_v28 }
 0x59b   :  { %v1502_v33 = vsub.f32 %v7156_v11, %v1498_v62  ;;  %v1504_v10 = vsub.f32 %v7159_v45, %v1500_v57 }
 0x59c   :  { %v1503_v54 = vsub.f32 %v7161_v48, %v1499_v63  ;;  %v1505_v0 = vsub.f32 %v7163_v13, %v1501_v34  ;;  %v1701_v34 = vmul.f32 -0.0016570843, %v6955_v50 }
 0x59d   :  { %v7230_v46 = vmul.f32 0.40077445, %v1502_v33  ;;  %v7233_v12 = vmul.f32 0.40077445, %v1504_v10 }
 0x59e   :  { %v7235_v22 = vmul.f32 0.40077445, %v1503_v54  ;;  %v7238_v17 = vmul.f32 0.40077445, %v1505_v0 }
 0x59f   :  { %v1510_v6 = vmul.f32 -1.5017754, %v7230_v46  ;;  %v1512_v25 = vmul.f32 -1.5017754, %v7233_v12 }
 0x5a0   :  { %v1511_v19 = vmul.f32 -1.5017754, %v7235_v22  ;;  %v1513_v38 = vmul.f32 -1.5017754, %v7238_v17 }
 0x5a1   :  { %v7243_v21 = vadd.f32 %v1510_v6, %v7156_v11  ;;  %v7247_v53 = vadd.f32 %v1512_v25, %v7159_v45 }
 0x5a2   :  { %v7250_v55 = vadd.f32 %v1511_v19, %v7161_v48  ;;  %v7253_v52 = vadd.f32 %v1513_v38, %v7163_v13 }
 0x5a3   :  { %v1518_v61 = vmul.f32 0.7094464, %v7243_v21  ;;  %v1520_v59 = vmul.f32 0.7094464, %v7247_v53 }
 0x5a4   :  { %v1519_v15 = vmul.f32 0.7094464, %v7250_v55  ;;  %v1521_v60 = vmul.f32 0.7094464, %v7253_v52 }
 0x5a6   :  { %1522 = vmatprep.subr.mxu0 %v1519_v15  ;;  %1611 = vmatprep.subr.mxu1 %v1521_v60  ;;  %v1702_v60 = vmul.f32 -0.0016570843, %v8535_v29 }
 0x5a7   :  { %1523 = vmatpush1.msra.mxu0 %v1518_v61  ;;  %1612 = vmatpush1.msra.mxu1 %v1520_v59 }
 0x5a8   :  { %6317 = vmatmul.mubr.msk.f32.vlgmr.msra.gmra.mrb[38].mxu0 %vm79_vm0, %v7262_v51  ;;  %6321 = vmatmul.mubr.msk.f32.vlgmr.msra.gmra.mrb[38].mxu1 %vm79_vm0, %v7262_v51 }
 0x5a9   :  { %1592 = vmatprep.mubr.f32.mxu0 %v8534_v3  ;;  %1681 = vmatprep.mubr.f32.mxu1 %v8534_v3 }
 0x5ac   :  { %6318 = vmatmul.mubr.msk.f32.gmra.mrb[40].mxu0 %vm79_vm0, %v7273_v43  ;;  %6322 = vmatmul.mubr.msk.f32.gmra.mrb[40].mxu1 %vm79_vm0, %v7273_v43 }
 0x5ad   :  { %1598 = vmatprep.mubr.f32.mxu0 %v8534_v3  ;;  %1687 = vmatprep.mubr.f32.mxu1 %v8534_v3 }
 0x5b0   :  { %6319 = vmatmul.mubr.msk.f32.gmra.mrb[42].mxu0 %vm79_vm0, %v6933_v41  ;;  %6323 = vmatmul.mubr.msk.f32.gmra.mrb[42].mxu1 %vm79_vm0, %v6933_v41 }
 0x5b1   :  { %1604 = vmatprep.mubr.f32.mxu0 %v8534_v3  ;;  %1693 = vmatprep.mubr.f32.mxu1 %v8534_v3 }
 0x5b4   :  { %6320 = vmatmul.mubr.msk.f32.gmra.mrb[44].mxu0 %vm79_vm0, %v6944_v42  ;;  %6324 = vmatmul.mubr.msk.f32.gmra.mrb[44].mxu1 %vm79_vm0, %v6944_v42 }
 0x5b5   :  { %1800 = vmatprep.mubr.f32.mxu0 %v8534_v3  ;;  %1871 = vmatprep.mubr.f32.mxu1 %v8534_v3 }
 0x67b   :  { %v1588_v31 = vpop.f32.mrb[38].mxu0  ;;  %v1677_v41 = vpop.f32.mrb[38].mxu1 }
 0x67c   :  { %v1589_v32 = vadd.f32 %v1588_v31, %v6965_v2  ;;  %v1590_v7 = vpop.f32.mrb[39].mxu0  ;;  %v1678_v58 = vadd.f32 %v1677_v41, %v6969_v4  ;;  %v1679_v14 = vpop.f32.mrb[39].mxu1 }
 0x67d   :  { %v1591_v36 = vadd.f32 %v1590_v7, %v6971_v5  ;;  %v1680_v28 = vadd.f32 %v1679_v14, %v6976_v9 }
 0x67e   :  { %v1704_v62 = vadd.f32 %v1700_v1, %v1589_v32  ;;  %v1706_v42 = vadd.f32 %v1700_v1, %v1678_v58 }
 0x67f   :  { %v1705_v49 = vadd.f32 %v1700_v1, %v1591_v36  ;;  %v1594_v57 = vpop.f32.mrb[40].mxu0  ;;  %v1707_v63 = vadd.f32 %v1700_v1, %v1680_v28  ;;  %v1683_v10 = vpop.f32.mrb[40].mxu1 }
 0x680   :  { %v1595_v33 = vadd.f32 %v1594_v57, %v6983_v18  ;;  %v1596_v54 = vpop.f32.mrb[41].mxu0  ;;  %v1684_v0 = vadd.f32 %v1683_v10, %v6985_v20  ;;  %v1685_v25 = vpop.f32.mrb[41].mxu1  ;;  %v1720_v19 = vmax.f32 %v1704_v62, 0.0  ;;  %v1722_v61 = vmax.f32 %v1706_v42, 0.0 }
 0x681   :  { %v1597_v6 = vadd.f32 %v1596_v54, %v6991_v26  ;;  %v1686_v15 = vadd.f32 %v1685_v25, %v6993_v27  ;;  %v1721_v59 = vmax.f32 %v1705_v49, 0.0  ;;  %v1723_v41 = vmax.f32 %v1707_v63, 0.0 }
 0x682   :  { %v1708_v38 = vadd.f32 %v1701_v34, %v1595_v33  ;;  %v1710_v31 = vadd.f32 %v1701_v34, %v1684_v0 }
 0x683   :  { %v1709_v32 = vadd.f32 %v1701_v34, %v1597_v6  ;;  %v1600_v1 = vpop.f32.mrb[42].mxu0  ;;  %v1711_v58 = vadd.f32 %v1701_v34, %v1686_v15  ;;  %v1689_v14 = vpop.f32.mrb[42].mxu1 }
 0x684   :  { %v1724_v7 = vmax.f32 %v1708_v38, 0.0  ;;  %v1601_v36 = vadd.f32 %v1600_v1, %v8536_v56  ;;  %v1602_v28 = vpop.f32.mrb[43].mxu0  ;;  %v1726_v57 = vmax.f32 %v1710_v31, 0.0  ;;  %v1690_v62 = vadd.f32 %v1689_v14, %v8537_v35  ;;  %v1691_v54 = vpop.f32.mrb[43].mxu1 }
 0x685   :  { %v1725_v10 = vmax.f32 %v1709_v32, 0.0  ;;  %v1603_v33 = vadd.f32 %v1602_v28, %v7000_v39  ;;  %v1727_v42 = vmax.f32 %v1711_v58, 0.0  ;;  %v1692_v0 = vadd.f32 %v1691_v54, %v7002_v40 }
 0x686   :  { %v6487_v25 = vpack.c.bf16 %v1724_v7, %v1720_v19  ;;  %v1712_v49 = vadd.f32 %v1702_v60, %v1601_v36  ;;  %v6495_v6 = vpack.c.bf16 %v1726_v57, %v1722_v61  ;;  %v1714_v63 = vadd.f32 %v1702_v60, %v1690_v62 }
 0x687   :  { %v1713_v38 = vadd.f32 %v1702_v60, %v1603_v33  ;;  %v1606_v34 = vpop.f32.mrb[44].mxu0  ;;  %v6485_v15 = vpack.c.bf16 %v1725_v10, %v1721_v59  ;;  %v1715_v1 = vadd.f32 %v1702_v60, %v1692_v0  ;;  %v1703_v31 = vmul.f32 -0.0016570843, %v6974_v8  ;;  %v1695_v32 = vpop.f32.mrb[44].mxu1 }
 0x688   :  { %v1607_v56 = vadd.f32 %v1606_v34, %v7007_v47  ;;  %v1608_v14 = vpop.f32.mrb[45].mxu0  ;;  %v6493_v35 = vpack.c.bf16 %v1727_v42, %v1723_v41  ;;  %v1696_v28 = vadd.f32 %v1695_v32, %v7016_v30  ;;  %v1697_v7 = vpop.f32.mrb[45].mxu1  ;;  %v1728_v36 = vmax.f32 %v1712_v49, 0.0 }
 0x689   :  { %v1609_v19 = vadd.f32 %v1608_v14, %v7020_v16  ;;  %6486 = vmatprep.subr.bf16.mxu0 %v6485_v15  ;;  %v1698_v61 = vadd.f32 %v1697_v7, %v7024_v37  ;;  %v1730_v62 = vmax.f32 %v1714_v63, 0.0  ;;  %v1729_v33 = vmax.f32 %v1713_v38, 0.0 }
 0x68a   :  { %v1716_v58 = vadd.f32 %v1703_v31, %v1607_v56  ;;  %6494 = vmatprep.subr.bf16.mxu1 %v6493_v35  ;;  %6488 = vmatpush1.bf16.msra.mxu0 %v6487_v25  ;;  %v1718_v59 = vadd.f32 %v1703_v31, %v1696_v28  ;;  %v1731_v42 = vmax.f32 %v1715_v1, 0.0  ;;  %v1880_v28 = vmul.f32 0.50331414, %v7247_v53 }
 0x68b   :  { %v1717_v60 = vadd.f32 %v1703_v31, %v1609_v19  ;;  %6496 = vmatpush1.bf16.msra.mxu1 %v6495_v6  ;;  %v1719_v10 = vadd.f32 %v1703_v31, %v1698_v61  ;;  %v1878_v31 = vmul.f32 0.50331414, %v7243_v21  ;;  %v1879_v7 = vmul.f32 0.50331414, %v7250_v55 }
 0x68c   :  { %v1732_v57 = vmax.f32 %v1716_v58, 0.0  ;;  %v1734_v41 = vmax.f32 %v1718_v59, 0.0  ;;  %v1881_v59 = vmul.f32 0.50331414, %v7253_v52 }
 0x68d   :  { %v1733_v54 = vmax.f32 %v1717_v60, 0.0  ;;  %v1735_v34 = vmax.f32 %v1719_v10, 0.0 }
 0x68e   :  { %v6491_v0 = vpack.c.bf16 %v1732_v57, %v1728_v36  ;;  %v6499_v32 = vpack.c.bf16 %v1734_v41, %v1730_v62 }
 0x68f   :  { %v6489_v15 = vpack.c.bf16 %v1733_v54, %v1729_v33  ;;  %v6497_v56 = vpack.c.bf16 %v1735_v34, %v1731_v42 }
 0x691   :  { %6490 = vmatprep.subr.bf16.mxu0 %v6489_v15  ;;  %6498 = vmatprep.subr.bf16.mxu1 %v6497_v56 }
 0x692   :  { %6492 = vmatpush1.bf16.msra.mxu0 %v6491_v0  ;;  %6500 = vmatpush1.bf16.msra.mxu1 %v6499_v32  ;;  %v1911_v0 = vld [vmem:[#allocation2 + $0x40] sm:$0xff]  ;;  %v1913_v32 = vld [vmem:[#allocation2 + $0x50] sm:$0xff] }
 0x695   :  { %6325 = vmatmul.mubr.msk.f32.vlgmr.msra.gmra.mrb[46].mxu0 %vm551_vm1, %v7037_v23  ;;  %6326 = vmatmul.mubr.msk.f32.vlgmr.msra.gmra.mrb[46].mxu1 %vm551_vm1, %v7037_v23 }
 0x696   :  { %1991 = vmatprep.mubr.f32.mxu0 %v8534_v3  ;;  %2080 = vmatprep.mubr.f32.mxu1 %v8534_v3 }
 0x768   :  { %v1802_v35 = vpop.f32.mrb[46].mxu0  ;;  %v1873_v49 = vpop.f32.mrb[46].mxu1 }
 0x769   :  { %v1803_v25 = vadd.f32 %v1802_v35, %v7045_v24  ;;  %v1804_v6 = vpop.f32.mrb[47].mxu0  ;;  %v1874_v63 = vadd.f32 %v1873_v49, %v7045_v24  ;;  %v1875_v1 = vpop.f32.mrb[47].mxu1  ;;  %v1912_v35 = vld [vmem:[#allocation2 + $0x48] sm:$0xff] }
 0x76a   :  { %v1805_v38 = vadd.f32 %v1804_v6, %v7045_v24  ;;  %v1876_v23 = vadd.f32 %v1875_v1, %v7045_v24  ;;  %v1914_v6 = vld [vmem:[#allocation2 + $0x58] sm:$0xff] }
 0x76b   :  { %v1882_v14 = vmul.f32 0.7047594, %v1803_v25  ;;  %v1884_v19 = vmul.f32 0.7047594, %v1874_v63 }
 0x76c   :  { %v1883_v58 = vmul.f32 0.7047594, %v1805_v38  ;;  %v1885_v60 = vmul.f32 0.7047594, %v1876_v23  ;;  %v1917_v38 = vmul.f32 0.9963738, %v1913_v32 }
 0x76d   :  { %v1886_v61 = vadd.f32 %v1882_v14, %v1878_v31  ;;  %v1888_v36 = vadd.f32 %v1884_v19, %v1880_v28  ;;  %v1916_v31 = vmul.f32 0.9963738, %v1912_v35  ;;  %v1918_v23 = vmul.f32 0.9963738, %v1914_v6 }
 0x76e   :  { %v1887_v57 = vadd.f32 %v1883_v58, %v1879_v7  ;;  %v1889_v62 = vadd.f32 %v1885_v60, %v1881_v59 }
 0x76f   :  { %v1890_v10 = vsub.f32 %v7243_v21, %v1886_v61  ;;  %v1892_v33 = vsub.f32 %v7247_v53, %v1888_v36  ;;  %v1915_v53 = vmul.f32 0.9963738, %v1911_v0 }
 0x770   :  { %v1891_v41 = vsub.f32 %v7250_v55, %v1887_v57  ;;  %v1893_v42 = vsub.f32 %v7253_v52, %v1889_v62  ;;  %v2105_v57 = vmul.f32 0.084986314, %v6953_v44 }
 0x771   :  { %v1894_v54 = vmul.f32 1.0066503, %v1890_v10  ;;  %v1896_v34 = vmul.f32 1.0066503, %v1892_v33 }
 0x772   :  { %v1895_v15 = vmul.f32 1.0066503, %v1891_v41  ;;  %v1897_v25 = vmul.f32 1.0066503, %v1893_v42 }
 0x773   :  { %v1898_v56 = vadd.f32 %v1894_v54, %v7230_v46  ;;  %v1900_v49 = vadd.f32 %v1896_v34, %v7233_v12 }
 0x774   :  { %v1899_v21 = vadd.f32 %v1895_v15, %v7235_v22  ;;  %v1901_v55 = vadd.f32 %v1897_v25, %v7238_v17  ;;  %v2106_v25 = vmul.f32 0.084986314, %v6955_v50 }
 0x775   :  { %v1902_v63 = vmul.f32 -0.7508877, %v1898_v56  ;;  %v1904_v1 = vmul.f32 -0.7508877, %v1900_v49 }
 0x776   :  { %v1903_v52 = vmul.f32 -0.7508877, %v1899_v21  ;;  %v1905_v28 = vmul.f32 -0.7508877, %v1901_v55 }
 0x777   :  { %v1906_v14 = vadd.f32 %v1902_v63, %v7156_v11  ;;  %v1908_v46 = vadd.f32 %v1904_v1, %v7159_v45 }
 0x778   :  { %v1907_v19 = vadd.f32 %v1903_v52, %v7161_v48  ;;  %v1909_v22 = vadd.f32 %v1905_v28, %v7163_v13  ;;  %v7366_v48 = vld [vmem:[%s8499_s3 + $0x10] sm:$0xff]  ;;  %v7377_v13 = vld [vmem:[%s8499_s3 + $0x18] sm:$0xff]  ;;  %v2107_v52 = vmul.f32 0.084986314, %v8535_v29 }
 0x779   :  { %v7338_v12 = vadd.f32 %v1915_v53, %v1906_v14  ;;  %v7341_v7 = vadd.f32 %v1917_v38, %v1908_v46 }
 0x77a   :  { %v7343_v58 = vadd.f32 %v1916_v31, %v1907_v19  ;;  %v7345_v17 = vadd.f32 %v1918_v23, %v1909_v22 }
 0x77b   :  { %v1923_v59 = vmul.f32 0.5799015, %v7338_v12  ;;  %v1925_v45 = vmul.f32 0.5799015, %v7341_v7 }
 0x77c   :  { %v1924_v61 = vmul.f32 0.5799015, %v7343_v58  ;;  %v1926_v11 = vmul.f32 0.5799015, %v7345_v17 }
 0x77e   :  { %1927 = vmatprep.subr.mxu0 %v1924_v61  ;;  %2016 = vmatprep.subr.mxu1 %v1926_v11  ;;  %v8538_v11 = vld [vmem:[#allocation12_spill] sm:$0xff] }
 0x77f   :  { %1928 = vmatpush1.msra.mxu0 %v1923_v59  ;;  %2017 = vmatpush1.msra.mxu1 %v1925_v45 }
 0x780   :  { %6327 = vmatmul.mubr.msk.f32.vlgmr.msra.gmra.mrb[48].mxu0 %vm79_vm0, %v7262_v51  ;;  %6331 = vmatmul.mubr.msk.f32.vlgmr.msra.gmra.mrb[48].mxu1 %vm79_vm0, %v7262_v51 }
 0x781   :  { %1997 = vmatprep.mubr.f32.mxu0 %v8534_v3  ;;  %2086 = vmatprep.mubr.f32.mxu1 %v8534_v3 }
 0x784   :  { %6328 = vmatmul.mubr.msk.f32.gmra.mrb[50].mxu0 %vm79_vm0, %v7273_v43  ;;  %6332 = vmatmul.mubr.msk.f32.gmra.mrb[50].mxu1 %vm79_vm0, %v7273_v43 }
 0x785   :  { %2003 = vmatprep.mubr.f32.mxu0 %v8534_v3  ;;  %2092 = vmatprep.mubr.f32.mxu1 %v8534_v3 }
 0x788   :  { %6329 = vmatmul.mubr.msk.f32.gmra.mrb[52].mxu0 %vm79_vm0, %v7366_v48  ;;  %6333 = vmatmul.mubr.msk.f32.gmra.mrb[52].mxu1 %vm79_vm0, %v7366_v48 }
 0x789   :  { %2009 = vmatprep.mubr.f32.mxu0 %v8534_v3  ;;  %2098 = vmatprep.mubr.f32.mxu1 %v8534_v3 }
 0x78c   :  { %6330 = vmatmul.mubr.msk.f32.gmra.mrb[54].mxu0 %vm79_vm0, %v7377_v13  ;;  %6334 = vmatmul.mubr.msk.f32.gmra.mrb[54].mxu1 %vm79_vm0, %v7377_v13 }
 0x78d   :  { %2205 = vmatprep.mubr.f32.mxu0 %v8534_v3  ;;  %2276 = vmatprep.mubr.f32.mxu1 %v8534_v3 }
 0x853   :  { %v1993_v60 = vpop.f32.mrb[48].mxu0  ;;  %v2082_v10 = vpop.f32.mrb[48].mxu1 }
 0x854   :  { %v1994_v36 = vadd.f32 %v1993_v60, %v6965_v2  ;;  %v1995_v62 = vpop.f32.mrb[49].mxu0  ;;  %v2083_v33 = vadd.f32 %v2082_v10, %v6969_v4  ;;  %v2084_v54 = vpop.f32.mrb[49].mxu1  ;;  %v8539_v10 = vld [vmem:[#allocation13_spill] sm:$0xff] }
 0x855   :  { %v1996_v41 = vadd.f32 %v1995_v62, %v6971_v5  ;;  %v2085_v0 = vadd.f32 %v2084_v54, %v6976_v9 }
 0x856   :  { %v2109_v42 = vadd.f32 %v2105_v57, %v1994_v36  ;;  %v2111_v34 = vadd.f32 %v2105_v57, %v2083_v33 }
 0x857   :  { %v2110_v32 = vadd.f32 %v2105_v57, %v1996_v41  ;;  %v1999_v15 = vpop.f32.mrb[50].mxu0  ;;  %v2112_v56 = vadd.f32 %v2105_v57, %v2085_v0  ;;  %v2088_v49 = vpop.f32.mrb[50].mxu1 }
 0x858   :  { %v2000_v35 = vadd.f32 %v1999_v15, %v6983_v18  ;;  %v2001_v21 = vpop.f32.mrb[51].mxu0  ;;  %v2089_v6 = vadd.f32 %v2088_v49, %v6985_v20  ;;  %v2090_v53 = vpop.f32.mrb[51].mxu1  ;;  %v2125_v38 = vmax.f32 %v2109_v42, 0.0  ;;  %v2127_v31 = vmax.f32 %v2111_v34, 0.0 }
 0x859   :  { %v2002_v63 = vadd.f32 %v2001_v21, %v6991_v26  ;;  %v2091_v1 = vadd.f32 %v2090_v53, %v6993_v27  ;;  %v2126_v14 = vmax.f32 %v2110_v32, 0.0  ;;  %v2128_v19 = vmax.f32 %v2112_v56, 0.0 }
 0x85a   :  { %v2113_v55 = vadd.f32 %v2106_v25, %v2000_v35  ;;  %v2115_v28 = vadd.f32 %v2106_v25, %v2089_v6  ;;  %v2108_v6 = vmul.f32 0.084986314, %v6974_v8 }
 0x85b   :  { %v2114_v23 = vadd.f32 %v2106_v25, %v2002_v63  ;;  %v2005_v46 = vpop.f32.mrb[52].mxu0  ;;  %v2116_v61 = vadd.f32 %v2106_v25, %v2091_v1  ;;  %v2094_v45 = vpop.f32.mrb[52].mxu1 }
 0x85c   :  { %v2129_v22 = vmax.f32 %v2113_v55, 0.0  ;;  %v2006_v59 = vadd.f32 %v2005_v46, %v8538_v11  ;;  %v2007_v60 = vpop.f32.mrb[53].mxu0  ;;  %v2131_v36 = vmax.f32 %v2115_v28, 0.0  ;;  %v2095_v62 = vadd.f32 %v2094_v45, %v8539_v10  ;;  %v2096_v41 = vpop.f32.mrb[53].mxu1 }
 0x85d   :  { %v2130_v57 = vmax.f32 %v2114_v23, 0.0  ;;  %v2008_v33 = vadd.f32 %v2007_v60, %v7000_v39  ;;  %v2132_v42 = vmax.f32 %v2116_v61, 0.0  ;;  %v2097_v34 = vadd.f32 %v2096_v41, %v7002_v40 }
 0x85e   :  { %v6503_v54 = vpack.c.bf16 %v2129_v22, %v2125_v38  ;;  %v2117_v0 = vadd.f32 %v2107_v52, %v2006_v59  ;;  %v6511_v32 = vpack.c.bf16 %v2131_v36, %v2127_v31  ;;  %v2119_v15 = vadd.f32 %v2107_v52, %v2095_v62 }
 0x85f   :  { %v2118_v56 = vadd.f32 %v2107_v52, %v2008_v33  ;;  %v2011_v35 = vpop.f32.mrb[54].mxu0  ;;  %v6501_v25 = vpack.c.bf16 %v2130_v57, %v2126_v14  ;;  %v2120_v49 = vadd.f32 %v2107_v52, %v2097_v34  ;;  %v2100_v63 = vpop.f32.mrb[54].mxu1  ;;  %v6509_v55 = vpack.c.bf16 %v2132_v42, %v2128_v19 }
 0x860   :  { %v2012_v21 = vadd.f32 %v2011_v35, %v7007_v47  ;;  %v2013_v53 = vpop.f32.mrb[55].mxu0  ;;  %v2101_v1 = vadd.f32 %v2100_v63, %v7016_v30  ;;  %v2102_v28 = vpop.f32.mrb[55].mxu1  ;;  %v2133_v46 = vmax.f32 %v2117_v0, 0.0  ;;  %v2135_v59 = vmax.f32 %v2119_v15, 0.0 }
 0x861   :  { %v2014_v38 = vadd.f32 %v2013_v53, %v7020_v16  ;;  %6502 = vmatprep.subr.bf16.mxu0 %v6501_v25  ;;  %v2103_v31 = vadd.f32 %v2102_v28, %v7024_v37  ;;  %6510 = vmatprep.subr.bf16.mxu1 %v6509_v55  ;;  %v2134_v45 = vmax.f32 %v2118_v56, 0.0  ;;  %v2136_v36 = vmax.f32 %v2120_v49, 0.0 }
 0x862   :  { %v2121_v23 = vadd.f32 %v2108_v6, %v2012_v21  ;;  %6504 = vmatpush1.bf16.msra.mxu0 %v6503_v54  ;;  %v2123_v14 = vadd.f32 %v2108_v6, %v2101_v1  ;;  %6512 = vmatpush1.bf16.msra.mxu1 %v6511_v32  ;;  %v7408_v54 = vld [vmem:[%s8503_s7] sm:$0xff]  ;;  %v2283_v49 = vmul.f32 0.33628574, %v7338_v12  ;;  %v2284_v55 = vmul.f32 0.33628574, %v7343_v58 }
 0x863   :  { %v2122_v52 = vadd.f32 %v2108_v6, %v2014_v38  ;;  %v2124_v61 = vadd.f32 %v2108_v6, %v2103_v31  ;;  %v2285_v6 = vmul.f32 0.33628574, %v7341_v7  ;;  %v2286_v28 = vmul.f32 0.33628574, %v7345_v17 }
 0x864   :  { %v2137_v22 = vmax.f32 %v2121_v23, 0.0  ;;  %v2139_v19 = vmax.f32 %v2123_v14, 0.0 }
 0x865   :  { %v2138_v60 = vmax.f32 %v2122_v52, 0.0  ;;  %v2140_v62 = vmax.f32 %v2124_v61, 0.0 }
 0x866   :  { %v6507_v57 = vpack.c.bf16 %v2137_v22, %v2133_v46  ;;  %v6515_v33 = vpack.c.bf16 %v2139_v19, %v2135_v59 }
 0x867   :  { %v6505_v41 = vpack.c.bf16 %v2138_v60, %v2134_v45  ;;  %v6513_v42 = vpack.c.bf16 %v2140_v62, %v2136_v36 }
 0x869   :  { %6506 = vmatprep.subr.bf16.mxu0 %v6505_v41  ;;  %6514 = vmatprep.subr.bf16.mxu1 %v6513_v42 }
 0x86a   :  { %6508 = vmatpush1.bf16.msra.mxu0 %v6507_v57  ;;  %6516 = vmatpush1.bf16.msra.mxu1 %v6515_v33 }
 0x86d   :  { %6335 = vmatmul.mubr.msk.f32.vlgmr.msra.gmra.mrb[56].mxu0 %vm551_vm1, %v7408_v54  ;;  %6336 = vmatmul.mubr.msk.f32.vlgmr.msra.gmra.mrb[56].mxu1 %vm551_vm1, %v7408_v54 }
 0x86e   :  { %2379 = vmatprep.mubr.f32.mxu0 %v8534_v3  ;;  %2468 = vmatprep.mubr.f32.mxu1 %v8534_v3 }
 0x940   :  { %v2207_v0 = vpop.f32.mrb[56].mxu0  ;;  %v2278_v32 = vpop.f32.mrb[56].mxu1 }
 0x941   :  { %v2208_v34 = vadd.f32 %v2207_v0, %v7045_v24  ;;  %v2209_v15 = vpop.f32.mrb[57].mxu0  ;;  %v2279_v56 = vadd.f32 %v2278_v32, %v7045_v24  ;;  %v2280_v25 = vpop.f32.mrb[57].mxu1 }
 0x942   :  { %v2210_v35 = vadd.f32 %v2209_v15, %v7045_v24  ;;  %v2281_v63 = vadd.f32 %v2280_v25, %v7045_v24 }
 0x943   :  { %v2287_v21 = vmul.f32 0.8146866, %v2208_v34  ;;  %v2289_v53 = vmul.f32 0.8146866, %v2279_v56 }
 0x944   :  { %v2288_v1 = vmul.f32 0.8146866, %v2210_v35  ;;  %v2290_v23 = vmul.f32 0.8146866, %v2281_v63 }
 0x945   :  { %v2291_v38 = vadd.f32 %v2287_v21, %v2283_v49  ;;  %v2293_v31 = vadd.f32 %v2289_v53, %v2285_v6  ;;  %v2493_v6 = vmul.f32 -0.15810572, %v6953_v44 }
 0x946   :  { %v2292_v14 = vadd.f32 %v2288_v1, %v2284_v55  ;;  %v2294_v46 = vadd.f32 %v2290_v23, %v2286_v28 }
 0x947   :  { %v2295_v52 = vsub.f32 %v7338_v12, %v2291_v38  ;;  %v2297_v22 = vsub.f32 %v7341_v7, %v2293_v31 }
 0x948   :  { %v2296_v61 = vsub.f32 %v7343_v58, %v2292_v14  ;;  %v2298_v45 = vsub.f32 %v7345_v17, %v2294_v46 }
 0x949   :  { %v7427_v59 = vmul.f32 0.7118093, %v2295_v52  ;;  %v7430_v19 = vmul.f32 0.7118093, %v2297_v22 }
 0x94a   :  { %v7432_v60 = vmul.f32 0.7118093, %v2296_v61  ;;  %v7435_v57 = vmul.f32 0.7118093, %v2298_v45  ;;  %v2494_v61 = vmul.f32 -0.15810572, %v6955_v50 }
 0x94b   :  { %v2303_v36 = vmul.f32 -0.8735677, %v7427_v59  ;;  %v2305_v62 = vmul.f32 -0.8735677, %v7430_v19 }
 0x94c   :  { %v2304_v33 = vmul.f32 -0.8735677, %v7432_v60  ;;  %v2306_v42 = vmul.f32 -0.8735677, %v7435_v57 }
 0x94d   :  { %v7440_v41 = vadd.f32 %v2303_v36, %v7338_v12  ;;  %v7444_v0 = vadd.f32 %v2305_v62, %v7341_v7 }
 0x94e   :  { %v7447_v34 = vadd.f32 %v2304_v33, %v7343_v58  ;;  %v7450_v32 = vadd.f32 %v2306_v42, %v7345_v17 }
 0x94f   :  { %v2311_v35 = vmul.f32 0.88309634, %v7440_v41  ;;  %v2313_v25 = vmul.f32 0.88309634, %v7444_v0 }
 0x950   :  { %v2312_v15 = vmul.f32 0.88309634, %v7447_v34  ;;  %v2314_v56 = vmul.f32 0.88309634, %v7450_v32 }
 0x952   :  { %2315 = vmatprep.subr.mxu0 %v2312_v15  ;;  %2404 = vmatprep.subr.mxu1 %v2314_v56 }
 0x953   :  { %2316 = vmatpush1.msra.mxu0 %v2311_v35  ;;  %2405 = vmatpush1.msra.mxu1 %v2313_v25  ;;  %v2495_v25 = vmul.f32 -0.15810572, %v8535_v29 }
 0x954   :  { %6337 = vmatmul.mubr.msk.f32.vlgmr.msra.gmra.mrb[58].mxu0 %vm79_vm0, %v7262_v51  ;;  %6341 = vmatmul.mubr.msk.f32.vlgmr.msra.gmra.mrb[58].mxu1 %vm79_vm0, %v7262_v51 }
 0x955   :  { %2385 = vmatprep.mubr.f32.mxu0 %v8534_v3  ;;  %2474 = vmatprep.mubr.f32.mxu1 %v8534_v3 }
 0x958   :  { %6338 = vmatmul.mubr.msk.f32.gmra.mrb[60].mxu0 %vm79_vm0, %v7273_v43  ;;  %6342 = vmatmul.mubr.msk.f32.gmra.mrb[60].mxu1 %vm79_vm0, %v7273_v43 }
 0x959   :  { %2391 = vmatprep.mubr.f32.mxu0 %v8534_v3  ;;  %2480 = vmatprep.mubr.f32.mxu1 %v8534_v3 }
 0x95c   :  { %6339 = vmatmul.mubr.msk.f32.gmra.mrb[62].mxu0 %vm79_vm0, %v7366_v48  ;;  %6343 = vmatmul.mubr.msk.f32.gmra.mrb[62].mxu1 %vm79_vm0, %v7366_v48 }
 0x95d   :  { %2397 = vmatprep.mubr.f32.mxu0 %v8534_v3  ;;  %2486 = vmatprep.mubr.f32.mxu1 %v8534_v3 }
 0x960   :  { %6340 = vmatmul.mubr.msk.f32.gmra.mrb[64].mxu0 %vm79_vm0, %v7377_v13  ;;  %6344 = vmatmul.mubr.msk.f32.gmra.mrb[64].mxu1 %vm79_vm0, %v7377_v13 }
 0x961   :  { %2593 = vmatprep.mubr.f32.mxu0 %v8534_v3  ;;  %2664 = vmatprep.mubr.f32.mxu1 %v8534_v3 }
 0xa27   :  { %v2381_v49 = vpop.f32.mrb[58].mxu0  ;;  %v2470_v63 = vpop.f32.mrb[58].mxu1 }
 0xa28   :  { %v2382_v21 = vadd.f32 %v2381_v49, %v6965_v2  ;;  %v2383_v53 = vpop.f32.mrb[59].mxu0  ;;  %v2471_v55 = vadd.f32 %v2470_v63, %v6969_v4  ;;  %v2472_v38 = vpop.f32.mrb[59].mxu1 }
 0xa29   :  { %v2384_v1 = vadd.f32 %v2383_v53, %v6971_v5  ;;  %v2473_v23 = vadd.f32 %v2472_v38, %v6976_v9 }
 0xa2a   :  { %v2497_v28 = vadd.f32 %v2493_v6, %v2382_v21  ;;  %v2499_v31 = vadd.f32 %v2493_v6, %v2471_v55 }
 0xa2b   :  { %v2498_v14 = vadd.f32 %v2493_v6, %v2384_v1  ;;  %v2387_v52 = vpop.f32.mrb[60].mxu0  ;;  %v2500_v46 = vadd.f32 %v2493_v6, %v2473_v23  ;;  %v2476_v45 = vpop.f32.mrb[60].mxu1 }
 0xa2c   :  { %v2388_v22 = vadd.f32 %v2387_v52, %v6983_v18  ;;  %v2389_v36 = vpop.f32.mrb[61].mxu0  ;;  %v2477_v62 = vadd.f32 %v2476_v45, %v6985_v20  ;;  %v2478_v42 = vpop.f32.mrb[61].mxu1  ;;  %v2513_v15 = vmax.f32 %v2497_v28, 0.0  ;;  %v2515_v49 = vmax.f32 %v2499_v31, 0.0 }
 0xa2d   :  { %v2390_v33 = vadd.f32 %v2389_v36, %v6991_v26  ;;  %v2479_v35 = vadd.f32 %v2478_v42, %v6993_v27  ;;  %v2514_v21 = vmax.f32 %v2498_v14, 0.0  ;;  %v2516_v55 = vmax.f32 %v2500_v46, 0.0 }
 0xa2e   :  { %v2501_v56 = vadd.f32 %v2494_v61, %v2388_v22  ;;  %v2503_v6 = vadd.f32 %v2494_v61, %v2477_v62 }
 0xa2f   :  { %v2502_v63 = vadd.f32 %v2494_v61, %v2390_v33  ;;  %v2393_v53 = vpop.f32.mrb[62].mxu0  ;;  %v2504_v38 = vadd.f32 %v2494_v61, %v2479_v35  ;;  %v2482_v52 = vpop.f32.mrb[62].mxu1 }
 0xa30   :  { %v2517_v1 = vmax.f32 %v2501_v56, 0.0  ;;  %v2394_v23 = vadd.f32 %v2393_v53, %v8538_v11  ;;  %v2395_v45 = vpop.f32.mrb[63].mxu0  ;;  %v2519_v36 = vmax.f32 %v2503_v6, 0.0  ;;  %v2483_v28 = vadd.f32 %v2482_v52, %v8539_v10  ;;  %v2484_v42 = vpop.f32.mrb[63].mxu1 }
 0xa31   :  { %v2518_v26 = vmax.f32 %v2502_v63, 0.0  ;;  %v2396_v22 = vadd.f32 %v2395_v45, %v7000_v39  ;;  %v2520_v31 = vmax.f32 %v2504_v38, 0.0  ;;  %v2485_v62 = vadd.f32 %v2484_v42, %v7002_v40 }
 0xa32   :  { %v6519_v29 = vpack.c.bf16 %v2517_v1, %v2513_v15  ;;  %v2505_v14 = vadd.f32 %v2495_v25, %v2394_v23  ;;  %v6527_v33 = vpack.c.bf16 %v2519_v36, %v2515_v49  ;;  %v2507_v46 = vadd.f32 %v2495_v25, %v2483_v28 }
 0xa33   :  { %v2506_v56 = vadd.f32 %v2495_v25, %v2396_v22  ;;  %v2399_v61 = vpop.f32.mrb[64].mxu0  ;;  %v6517_v35 = vpack.c.bf16 %v2518_v26, %v2514_v21  ;;  %v2508_v53 = vadd.f32 %v2495_v25, %v2485_v62  ;;  %v2496_v6 = vmul.f32 -0.15810572, %v6974_v8  ;;  %v2488_v63 = vpop.f32.mrb[64].mxu1 }
 0xa34   :  { %v2400_v11 = vadd.f32 %v2399_v61, %v7007_v47  ;;  %v2401_v52 = vpop.f32.mrb[65].mxu0  ;;  %v6525_v10 = vpack.c.bf16 %v2520_v31, %v2516_v55  ;;  %v2489_v45 = vadd.f32 %v2488_v63, %v7016_v30  ;;  %v2490_v1 = vpop.f32.mrb[65].mxu1  ;;  %v2521_v21 = vmax.f32 %v2505_v14, 0.0 }
 0xa35   :  { %v2402_v15 = vadd.f32 %v2401_v52, %v7020_v16  ;;  %6518 = vmatprep.subr.bf16.mxu0 %v6517_v35  ;;  %v2491_v49 = vadd.f32 %v2490_v1, %v7024_v37  ;;  %v2523_v28 = vmax.f32 %v2507_v46, 0.0  ;;  %v2522_v22 = vmax.f32 %v2506_v56, 0.0 }
 0xa36   :  { %v2509_v38 = vadd.f32 %v2496_v6, %v2400_v11  ;;  %6526 = vmatprep.subr.bf16.mxu1 %v6525_v10  ;;  %6520 = vmatpush1.bf16.msra.mxu0 %v6519_v29  ;;  %v2511_v26 = vadd.f32 %v2496_v6, %v2489_v45  ;;  %v2524_v31 = vmax.f32 %v2508_v53, 0.0  ;;  %v2673_v45 = vmul.f32 0.7798591, %v7444_v0 }
 0xa37   :  { %v2510_v25 = vadd.f32 %v2496_v6, %v2402_v15  ;;  %6528 = vmatpush1.bf16.msra.mxu1 %v6527_v33  ;;  %v2512_v36 = vadd.f32 %v2496_v6, %v2491_v49  ;;  %v2671_v6 = vmul.f32 0.7798591, %v7440_v41 }
 0xa38   :  { %v2525_v23 = vmax.f32 %v2509_v38, 0.0  ;;  %v2527_v55 = vmax.f32 %v2511_v26, 0.0  ;;  %v2672_v38 = vmul.f32 0.7798591, %v7447_v34 }
 0xa39   :  { %v2526_v42 = vmax.f32 %v2510_v25, 0.0  ;;  %v2528_v61 = vmax.f32 %v2512_v36, 0.0  ;;  %v2674_v25 = vmul.f32 0.7798591, %v7450_v32 }
 0xa3a   :  { %v6523_v62 = vpack.c.bf16 %v2525_v23, %v2521_v21  ;;  %v6531_v63 = vpack.c.bf16 %v2527_v55, %v2523_v28 }
 0xa3b   :  { %v6521_v35 = vpack.c.bf16 %v2526_v42, %v2522_v22  ;;  %v6529_v11 = vpack.c.bf16 %v2528_v61, %v2524_v31  ;;  %v2704_v61 = vld [vmem:[#allocation2 + $0x60] sm:$0xff] }
 0xa3d   :  { %6522 = vmatprep.subr.bf16.mxu0 %v6521_v35  ;;  %6530 = vmatprep.subr.bf16.mxu1 %v6529_v11  ;;  %v2706_v35 = vld [vmem:[#allocation2 + $0x70] sm:$0xff] }
 0xa3e   :  { %6524 = vmatpush1.bf16.msra.mxu0 %v6523_v62  ;;  %6532 = vmatpush1.bf16.msra.mxu1 %v6531_v63 }
 0xa41   :  { %6345 = vmatmul.mubr.msk.f32.vlgmr.msra.gmra.mrb[66].mxu0 %vm551_vm1, %v7408_v54  ;;  %6346 = vmatmul.mubr.msk.f32.vlgmr.msra.gmra.mrb[66].mxu1 %vm551_vm1, %v7408_v54 }
 0xa42   :  { %2784 = vmatprep.mubr.f32.mxu0 %v8534_v3  ;;  %2873 = vmatprep.mubr.f32.mxu1 %v8534_v3 }
 0xb14   :  { %v2595_v29 = vpop.f32.mrb[66].mxu0  ;;  %v2666_v14 = vpop.f32.mrb[66].mxu1 }
 0xb15   :  { %v2596_v10 = vadd.f32 %v2595_v29, %v7045_v24  ;;  %v2597_v33 = vpop.f32.mrb[67].mxu0  ;;  %v2667_v46 = vadd.f32 %v2666_v14, %v7045_v24  ;;  %v2668_v53 = vpop.f32.mrb[67].mxu1 }
 0xb16   :  { %v2598_v56 = vadd.f32 %v2597_v33, %v7045_v24  ;;  %v2669_v15 = vadd.f32 %v2668_v53, %v7045_v24  ;;  %v2710_v53 = vmul.f32 0.5328969, %v2706_v35 }
 0xb17   :  { %v2675_v52 = vmul.f32 0.4691917, %v2596_v10  ;;  %v2677_v1 = vmul.f32 0.4691917, %v2667_v46  ;;  %v2705_v10 = vld [vmem:[#allocation2 + $0x68] sm:$0xff]  ;;  %v2707_v46 = vld [vmem:[#allocation2 + $0x78] sm:$0xff] }
 0xb18   :  { %v2676_v49 = vmul.f32 0.4691917, %v2598_v56  ;;  %v2678_v21 = vmul.f32 0.4691917, %v2669_v15 }
 0xb19   :  { %v2679_v26 = vadd.f32 %v2675_v52, %v2671_v6  ;;  %v2681_v23 = vadd.f32 %v2677_v1, %v2673_v45  ;;  %v2709_v52 = vmul.f32 0.5328969, %v2705_v10  ;;  %v2711_v1 = vmul.f32 0.5328969, %v2707_v46 }
 0xb1a   :  { %v2680_v36 = vadd.f32 %v2676_v49, %v2672_v38  ;;  %v2682_v22 = vadd.f32 %v2678_v21, %v2674_v25 }
 0xb1b   :  { %v2683_v28 = vsub.f32 %v7440_v41, %v2679_v26  ;;  %v2685_v55 = vsub.f32 %v7444_v0, %v2681_v23  ;;  %v2708_v0 = vmul.f32 0.5328969, %v2704_v61 }
 0xb1c   :  { %v2684_v42 = vsub.f32 %v7447_v34, %v2680_v36  ;;  %v2686_v62 = vsub.f32 %v7450_v32, %v2682_v22 }
 0xb1d   :  { %v2687_v31 = vmul.f32 1.8821653, %v2683_v28  ;;  %v2689_v63 = vmul.f32 1.8821653, %v2685_v55 }
 0xb1e   :  { %v2688_v11 = vmul.f32 1.8821653, %v2684_v42  ;;  %v2690_v14 = vmul.f32 1.8821653, %v2686_v62 }
 0xb1f   :  { %v2691_v29 = vadd.f32 %v2687_v31, %v7427_v59  ;;  %v2693_v33 = vadd.f32 %v2689_v63, %v7430_v19 }
 0xb20   :  { %v2692_v41 = vadd.f32 %v2688_v11, %v7432_v60  ;;  %v2694_v34 = vadd.f32 %v2690_v14, %v7435_v57  ;;  %v2899_v11 = vmul.f32 -0.07146232, %v6955_v50 }
 0xb21   :  { %v2695_v56 = vmul.f32 -0.43678385, %v2691_v29  ;;  %v2697_v6 = vmul.f32 -0.43678385, %v2693_v33  ;;  %v8540_v33 = vld [vmem:[#allocation11_spill] sm:$0xff] }
 0xb22   :  { %v2696_v32 = vmul.f32 -0.43678385, %v2692_v41  ;;  %v2698_v15 = vmul.f32 -0.43678385, %v2694_v34  ;;  %v8541_v34 = vld [vmem:[#allocation10_spill] sm:$0xff] }
 0xb23   :  { %v2699_v45 = vadd.f32 %v2695_v56, %v7338_v12  ;;  %v2701_v59 = vadd.f32 %v2697_v6, %v7341_v7  ;;  %v2900_v6 = vmul.f32 -0.07146232, %v8541_v34 }
 0xb24   :  { %v2700_v38 = vadd.f32 %v2696_v32, %v7343_v58  ;;  %v2702_v60 = vadd.f32 %v2698_v15, %v7345_v17  ;;  %v2898_v58 = vmul.f32 -0.07146232, %v6953_v44 }
 0xb25   :  { %v7525_v19 = vadd.f32 %v2708_v0, %v2699_v45  ;;  %v7528_v49 = vadd.f32 %v2710_v53, %v2701_v59 }
 0xb26   :  { %v7530_v26 = vadd.f32 %v2709_v52, %v2700_v38  ;;  %v7532_v57 = vadd.f32 %v2711_v1, %v2702_v60 }
 0xb27   :  { %v2716_v21 = vmul.f32 0.79947174, %v7525_v19  ;;  %v2718_v7 = vmul.f32 0.79947174, %v7528_v49 }
 0xb28   :  { %v2717_v25 = vmul.f32 0.79947174, %v7530_v26  ;;  %v2719_v12 = vmul.f32 0.79947174, %v7532_v57 }
 0xb2a   :  { %2720 = vmatprep.subr.mxu0 %v2717_v25  ;;  %2809 = vmatprep.subr.mxu1 %v2719_v12  ;;  %v8542_v25 = vld [vmem:[#allocation12_spill] sm:$0xff] }
 0xb2b   :  { %2721 = vmatpush1.msra.mxu0 %v2716_v21  ;;  %2810 = vmatpush1.msra.mxu1 %v2718_v7 }
 0xb2c   :  { %6347 = vmatmul.mubr.msk.f32.vlgmr.msra.gmra.mrb[68].mxu0 %vm79_vm0, %v7262_v51  ;;  %6351 = vmatmul.mubr.msk.f32.vlgmr.msra.gmra.mrb[68].mxu1 %vm79_vm0, %v7262_v51 }
 0xb2d   :  { %2790 = vmatprep.mubr.f32.mxu0 %v8534_v3  ;;  %2879 = vmatprep.mubr.f32.mxu1 %v8534_v3 }
 0xb30   :  { %6348 = vmatmul.mubr.msk.f32.gmra.mrb[70].mxu0 %vm79_vm0, %v7273_v43  ;;  %6352 = vmatmul.mubr.msk.f32.gmra.mrb[70].mxu1 %vm79_vm0, %v7273_v43 }
 0xb31   :  { %2796 = vmatprep.mubr.f32.mxu0 %v8534_v3  ;;  %2885 = vmatprep.mubr.f32.mxu1 %v8534_v3 }
 0xb34   :  { %6349 = vmatmul.mubr.msk.f32.gmra.mrb[72].mxu0 %vm79_vm0, %v7366_v48  ;;  %6353 = vmatmul.mubr.msk.f32.gmra.mrb[72].mxu1 %vm79_vm0, %v7366_v48 }
 0xb35   :  { %2802 = vmatprep.mubr.f32.mxu0 %v8534_v3  ;;  %2891 = vmatprep.mubr.f32.mxu1 %v8534_v3 }
 0xb38   :  { %6350 = vmatmul.mubr.msk.f32.gmra.mrb[74].mxu0 %vm79_vm0, %v7377_v13  ;;  %6354 = vmatmul.mubr.msk.f32.gmra.mrb[74].mxu1 %vm79_vm0, %v7377_v13 }
 0xb39   :  { %2998 = vmatprep.mubr.f32.mxu0 %v8534_v3  ;;  %3069 = vmatprep.mubr.f32.mxu1 %v8534_v3 }
 0xbff   :  { %v2786_v51 = vpop.f32.mrb[68].mxu0  ;;  %v2875_v17 = vpop.f32.mrb[68].mxu1 }
 0xc00   :  { %v2787_v43 = vadd.f32 %v2786_v51, %v6965_v2  ;;  %v2788_v23 = vpop.f32.mrb[69].mxu0  ;;  %v2876_v36 = vadd.f32 %v2875_v17, %v6969_v4  ;;  %v2877_v22 = vpop.f32.mrb[69].mxu1 }
 0xc01   :  { %v2789_v28 = vadd.f32 %v2788_v23, %v6971_v5  ;;  %v2878_v42 = vadd.f32 %v2877_v22, %v6976_v9 }
 0xc02   :  { %v2902_v55 = vadd.f32 %v2898_v58, %v2787_v43  ;;  %v2904_v31 = vadd.f32 %v2898_v58, %v2876_v36 }
 0xc03   :  { %v2903_v62 = vadd.f32 %v2898_v58, %v2789_v28  ;;  %v2792_v61 = vpop.f32.mrb[70].mxu0  ;;  %v2905_v63 = vadd.f32 %v2898_v58, %v2878_v42  ;;  %v2881_v29 = vpop.f32.mrb[70].mxu1  ;;  %v8543_v58 = vld [vmem:[#allocation13_spill] sm:$0xff] }
 0xc04   :  { %v2793_v35 = vadd.f32 %v2792_v61, %v6983_v18  ;;  %v2794_v10 = vpop.f32.mrb[71].mxu0  ;;  %v2882_v14 = vadd.f32 %v2881_v29, %v6985_v20  ;;  %v2883_v46 = vpop.f32.mrb[71].mxu1  ;;  %v2918_v56 = vmax.f32 %v2902_v55, 0.0  ;;  %v2920_v32 = vmax.f32 %v2904_v31, 0.0 }
 0xc05   :  { %v2795_v41 = vadd.f32 %v2794_v10, %v8540_v33  ;;  %v2884_v53 = vadd.f32 %v2883_v46, %v6993_v27  ;;  %v2919_v52 = vmax.f32 %v2903_v62, 0.0  ;;  %v2921_v59 = vmax.f32 %v2905_v63, 0.0 }
 0xc06   :  { %v2906_v0 = vadd.f32 %v2899_v11, %v2793_v35  ;;  %v2908_v45 = vadd.f32 %v2899_v11, %v2882_v14  ;;  %v2901_v10 = vmul.f32 -0.07146232, %v6974_v8 }
 0xc07   :  { %v2907_v15 = vadd.f32 %v2899_v11, %v2795_v41  ;;  %v2798_v1 = vpop.f32.mrb[72].mxu0  ;;  %v2909_v60 = vadd.f32 %v2899_v11, %v2884_v53  ;;  %v2887_v21 = vpop.f32.mrb[72].mxu1 }
 0xc08   :  { %v2922_v38 = vmax.f32 %v2906_v0, 0.0  ;;  %v2799_v12 = vadd.f32 %v2798_v1, %v8542_v25  ;;  %v2800_v7 = vpop.f32.mrb[73].mxu0  ;;  %v2924_v51 = vmax.f32 %v2908_v45, 0.0  ;;  %v2888_v17 = vadd.f32 %v2887_v21, %v8543_v58  ;;  %v2889_v36 = vpop.f32.mrb[73].mxu1 }
 0xc09   :  { %v2923_v43 = vmax.f32 %v2907_v15, 0.0  ;;  %v2801_v23 = vadd.f32 %v2800_v7, %v7000_v39  ;;  %v2925_v22 = vmax.f32 %v2909_v60, 0.0  ;;  %v2890_v42 = vadd.f32 %v2889_v36, %v7002_v40 }
 0xc0a   :  { %v6535_v28 = vpack.c.bf16 %v2922_v38, %v2918_v56  ;;  %v2910_v55 = vadd.f32 %v2900_v6, %v2799_v12  ;;  %v6543_v31 = vpack.c.bf16 %v2924_v51, %v2920_v32  ;;  %v2912_v62 = vadd.f32 %v2900_v6, %v2888_v17 }
 0xc0b   :  { %v2911_v61 = vadd.f32 %v2900_v6, %v2801_v23  ;;  %v2804_v63 = vpop.f32.mrb[74].mxu0  ;;  %v6533_v35 = vpack.c.bf16 %v2923_v43, %v2919_v52  ;;  %v2913_v11 = vadd.f32 %v2900_v6, %v2890_v42  ;;  %v2893_v14 = vpop.f32.mrb[74].mxu1  ;;  %v6541_v46 = vpack.c.bf16 %v2925_v22, %v2921_v59 }
 0xc0c   :  { %v2805_v29 = vadd.f32 %v2804_v63, %v7007_v47  ;;  %v2806_v41 = vpop.f32.mrb[75].mxu0  ;;  %v2894_v0 = vadd.f32 %v2893_v14, %v7016_v30  ;;  %v2895_v53 = vpop.f32.mrb[75].mxu1  ;;  %v2926_v15 = vmax.f32 %v2910_v55, 0.0  ;;  %v2928_v60 = vmax.f32 %v2912_v62, 0.0 }
 0xc0d   :  { %v2807_v56 = vadd.f32 %v2806_v41, %v7020_v16  ;;  %6534 = vmatprep.subr.bf16.mxu0 %v6533_v35  ;;  %v2896_v32 = vadd.f32 %v2895_v53, %v7024_v37  ;;  %6542 = vmatprep.subr.bf16.mxu1 %v6541_v46  ;;  %v2927_v12 = vmax.f32 %v2911_v61, 0.0  ;;  %v2929_v7 = vmax.f32 %v2913_v11, 0.0 }
 0xc0e   :  { %v2914_v45 = vadd.f32 %v2901_v10, %v2805_v29  ;;  %6536 = vmatpush1.bf16.msra.mxu0 %v6535_v28  ;;  %v2916_v52 = vadd.f32 %v2901_v10, %v2894_v0  ;;  %6544 = vmatpush1.bf16.msra.mxu1 %v6543_v31  ;;  %v3076_v63 = vmul.f32 0.63915503, %v7525_v19  ;;  %v3078_v11 = vmul.f32 0.63915503, %v7528_v49 }
 0xc0f   :  { %v2915_v6 = vadd.f32 %v2901_v10, %v2807_v56  ;;  %v2917_v38 = vadd.f32 %v2901_v10, %v2896_v32  ;;  %v3077_v14 = vmul.f32 0.63915503, %v7530_v26  ;;  %v3079_v0 = vmul.f32 0.63915503, %v7532_v57 }
 0xc10   :  { %v2930_v1 = vmax.f32 %v2914_v45, 0.0  ;;  %v2932_v59 = vmax.f32 %v2916_v52, 0.0 }
 0xc11   :  { %v2931_v21 = vmax.f32 %v2915_v6, 0.0  ;;  %v2933_v43 = vmax.f32 %v2917_v38, 0.0 }
 0xc12   :  { %v6539_v51 = vpack.c.bf16 %v2930_v1, %v2926_v15  ;;  %v6547_v17 = vpack.c.bf16 %v2932_v59, %v2928_v60 }
 0xc13   :  { %v6537_v23 = vpack.c.bf16 %v2931_v21, %v2927_v12  ;;  %v6545_v36 = vpack.c.bf16 %v2933_v43, %v2929_v7 }
 0xc15   :  { %6538 = vmatprep.subr.bf16.mxu0 %v6537_v23  ;;  %6546 = vmatprep.subr.bf16.mxu1 %v6545_v36 }
 0xc16   :  { %6540 = vmatpush1.bf16.msra.mxu0 %v6539_v51  ;;  %6548 = vmatpush1.bf16.msra.mxu1 %v6547_v17 }
 0xc19   :  { %6355 = vmatmul.mubr.msk.f32.vlgmr.msra.gmra.mrb[76].mxu0 %vm551_vm1, %v7408_v54  ;;  %6356 = vmatmul.mubr.msk.f32.vlgmr.msra.gmra.mrb[76].mxu1 %vm551_vm1, %v7408_v54 }
 0xc1a   :  { %3172 = vmatprep.mubr.f32.mxu0 %v8534_v3  ;;  %3261 = vmatprep.mubr.f32.mxu1 %v8534_v3 }
 0xcec   :  { %v3000_v28 = vpop.f32.mrb[76].mxu0  ;;  %v3071_v55 = vpop.f32.mrb[76].mxu1 }
 0xced   :  { %v3001_v22 = vadd.f32 %v3000_v28, %v7045_v24  ;;  %v3002_v42 = vpop.f32.mrb[77].mxu0  ;;  %v3072_v31 = vadd.f32 %v3071_v55, %v7045_v24  ;;  %v3073_v61 = vpop.f32.mrb[77].mxu1 }
 0xcee   :  { %v3003_v62 = vadd.f32 %v3002_v42, %v7045_v24  ;;  %v3074_v29 = vadd.f32 %v3073_v61, %v7045_v24  ;;  %v7642_v61 = vld [vmem:[%s8499_s3 + $0x8] sm:$0xff] }
 0xcef   :  { %v3080_v35 = vmul.f32 0.6007037, %v3001_v22  ;;  %v3082_v10 = vmul.f32 0.6007037, %v3072_v31 }
 0xcf0   :  { %v3081_v41 = vmul.f32 0.6007037, %v3003_v62  ;;  %v3083_v56 = vmul.f32 0.6007037, %v3074_v29  ;;  %v7631_v62 = vld [vmem:[%s8499_s3] sm:$0xff] }
 0xcf1   :  { %v3084_v46 = vadd.f32 %v3080_v35, %v3076_v63  ;;  %v3086_v53 = vadd.f32 %v3082_v10, %v3078_v11 }
 0xcf2   :  { %v3085_v45 = vadd.f32 %v3081_v41, %v3077_v14  ;;  %v3087_v52 = vadd.f32 %v3083_v56, %v3079_v0 }
 0xcf3   :  { %v3088_v32 = vsub.f32 %v7525_v19, %v3084_v46  ;;  %v3090_v6 = vsub.f32 %v7528_v49, %v3086_v53 }
 0xcf4   :  { %v3089_v15 = vsub.f32 %v7530_v26, %v3085_v45  ;;  %v3091_v38 = vsub.f32 %v7532_v57, %v3087_v52 }
 0xcf5   :  { %v7599_v1 = vmul.f32 1.3308918, %v3088_v32  ;;  %v7602_v60 = vmul.f32 1.3308918, %v3090_v6  ;;  %v7674_v32 = vmul.f32 -0.3299262, %v6955_v50 }
 0xcf6   :  { %v7604_v12 = vmul.f32 1.3308918, %v3089_v15  ;;  %v7607_v21 = vmul.f32 1.3308918, %v3091_v38 }
 0xcf7   :  { %v3096_v59 = vmul.f32 -0.4841617, %v7599_v1  ;;  %v3098_v7 = vmul.f32 -0.4841617, %v7602_v60 }
 0xcf8   :  { %v3097_v51 = vmul.f32 -0.4841617, %v7604_v12  ;;  %v3099_v17 = vmul.f32 -0.4841617, %v7607_v21 }
 0xcf9   :  { %v7612_v43 = vadd.f32 %v3096_v59, %v7525_v19  ;;  %v7616_v23 = vadd.f32 %v3098_v7, %v7528_v49 }
 0xcfa   :  { %v7619_v36 = vadd.f32 %v3097_v51, %v7530_v26  ;;  %v7622_v28 = vadd.f32 %v3099_v17, %v7532_v57 }
 0xcfb   :  { %v3104_v42 = vmul.f32 0.96610314, %v7612_v43  ;;  %v3106_v31 = vmul.f32 0.96610314, %v7616_v23 }
 0xcfc   :  { %v3105_v22 = vmul.f32 0.96610314, %v7619_v36  ;;  %v3107_v55 = vmul.f32 0.96610314, %v7622_v28 }
 0xcfe   :  { %3108 = vmatprep.subr.mxu0 %v3105_v22  ;;  %3197 = vmatprep.subr.mxu1 %v3107_v55  ;;  %v7682_v22 = vmul.f32 -0.3299262, %v8541_v34 }
 0xcff   :  { %3109 = vmatpush1.msra.mxu0 %v3104_v42  ;;  %3198 = vmatpush1.msra.mxu1 %v3106_v31 }
 0xd00   :  { %6357 = vmatmul.mubr.msk.f32.vlgmr.msra.gmra.mrb[78].mxu0 %vm79_vm0, %v7631_v62  ;;  %6361 = vmatmul.mubr.msk.f32.vlgmr.msra.gmra.mrb[78].mxu1 %vm79_vm0, %v7631_v62 }
 0xd01   :  { %3178 = vmatprep.mubr.f32.mxu0 %v8534_v3  ;;  %3267 = vmatprep.mubr.f32.mxu1 %v8534_v3 }
 0xd04   :  { %6358 = vmatmul.mubr.msk.f32.gmra.mrb[80].mxu0 %vm79_vm0, %v7642_v61  ;;  %6362 = vmatmul.mubr.msk.f32.gmra.mrb[80].mxu1 %vm79_vm0, %v7642_v61 }
 0xd05   :  { %3184 = vmatprep.mubr.f32.mxu0 %v8534_v3  ;;  %3273 = vmatprep.mubr.f32.mxu1 %v8534_v3 }
 0xd08   :  { %6359 = vmatmul.mubr.msk.f32.gmra.mrb[82].mxu0 %vm79_vm0, %v7366_v48  ;;  %6363 = vmatmul.mubr.msk.f32.gmra.mrb[82].mxu1 %vm79_vm0, %v7366_v48  ;;  %v7664_v48 = vmul.f32 -0.3299262, %v6953_v44 }
 0xd09   :  { %3190 = vmatprep.mubr.f32.mxu0 %v8534_v3  ;;  %3279 = vmatprep.mubr.f32.mxu1 %v8534_v3 }
 0xd0c   :  { %6360 = vmatmul.mubr.msk.f32.gmra.mrb[84].mxu0 %vm79_vm0, %v7377_v13  ;;  %6364 = vmatmul.mubr.msk.f32.gmra.mrb[84].mxu1 %vm79_vm0, %v7377_v13 }
 0xd0d   :  { %3386 = vmatprep.mubr.f32.mxu0 %v8534_v3  ;;  %3457 = vmatprep.mubr.f32.mxu1 %v8534_v3 }
 0xdd3   :  { %v3174_v63 = vpop.f32.mrb[78].mxu0  ;;  %v3263_v11 = vpop.f32.mrb[78].mxu1 }
 0xdd4   :  { %v3175_v35 = vadd.f32 %v3174_v63, %v6965_v2  ;;  %v3176_v29 = vpop.f32.mrb[79].mxu0  ;;  %v3264_v10 = vadd.f32 %v3263_v11, %v6969_v4  ;;  %v3265_v41 = vpop.f32.mrb[79].mxu1 }
 0xdd5   :  { %v3177_v14 = vadd.f32 %v3176_v29, %v6971_v5  ;;  %v3266_v46 = vadd.f32 %v3265_v41, %v6976_v9 }
 0xdd6   :  { %v3290_v13 = vadd.f32 %v7664_v48, %v3175_v35  ;;  %v3292_v0 = vadd.f32 %v7664_v48, %v3264_v10 }
 0xdd7   :  { %v3180_v56 = vpop.f32.mrb[80].mxu0  ;;  %v3291_v53 = vadd.f32 %v7664_v48, %v3177_v14  ;;  %v3269_v52 = vpop.f32.mrb[80].mxu1  ;;  %v3293_v7 = vadd.f32 %v7664_v48, %v3266_v46 }
 0xdd8   :  { %v3181_v45 = vadd.f32 %v3180_v56, %v6983_v18  ;;  %v3182_v6 = vpop.f32.mrb[81].mxu0  ;;  %v3270_v15 = vadd.f32 %v3269_v52, %v6985_v20  ;;  %v3271_v59 = vpop.f32.mrb[81].mxu1  ;;  %v3306_v55 = vmax.f32 %v3290_v13, 0.0  ;;  %v3308_v42 = vmax.f32 %v3292_v0, 0.0 }
 0xdd9   :  { %v3183_v38 = vadd.f32 %v3182_v6, %v8540_v33  ;;  %v3272_v17 = vadd.f32 %v3271_v59, %v6993_v27  ;;  %v3307_v11 = vmax.f32 %v3291_v53, 0.0  ;;  %v3309_v6 = vmax.f32 %v3293_v7, 0.0 }
 0xdda   :  { %v3294_v51 = vadd.f32 %v7674_v32, %v3181_v45  ;;  %v3296_v31 = vadd.f32 %v7674_v32, %v3270_v15 }
 0xddb   :  { %v3295_v63 = vadd.f32 %v7674_v32, %v3183_v38  ;;  %v3186_v35 = vpop.f32.mrb[82].mxu0  ;;  %v3297_v10 = vadd.f32 %v7674_v32, %v3272_v17  ;;  %v3275_v41 = vpop.f32.mrb[82].mxu1  ;;  %v7692_v17 = vmul.f32 -0.3299262, %v6974_v8 }
 0xddc   :  { %v3310_v29 = vmax.f32 %v3294_v51, 0.0  ;;  %v3187_v14 = vadd.f32 %v3186_v35, %v8542_v25  ;;  %v3188_v46 = vpop.f32.mrb[83].mxu0  ;;  %v3312_v56 = vmax.f32 %v3296_v31, 0.0  ;;  %v3276_v52 = vadd.f32 %v3275_v41, %v8543_v58  ;;  %v3277_v0 = vpop.f32.mrb[83].mxu1 }
 0xddd   :  { %v3311_v45 = vmax.f32 %v3295_v63, 0.0  ;;  %v3189_v13 = vadd.f32 %v3188_v46, %v7000_v39  ;;  %v3313_v59 = vmax.f32 %v3297_v10, 0.0  ;;  %v3278_v38 = vadd.f32 %v3277_v0, %v7002_v40 }
 0xdde   :  { %v6551_v15 = vpack.c.bf16 %v3310_v29, %v3306_v55  ;;  %v6559_v53 = vpack.c.bf16 %v3312_v56, %v3308_v42  ;;  %v3298_v35 = vadd.f32 %v7682_v22, %v3187_v14  ;;  %v3300_v46 = vadd.f32 %v7682_v22, %v3276_v52 }
 0xddf   :  { %v3192_v51 = vpop.f32.mrb[84].mxu0  ;;  %v6549_v34 = vpack.c.bf16 %v3311_v45, %v3307_v11  ;;  %v3281_v63 = vpop.f32.mrb[84].mxu1  ;;  %v6557_v50 = vpack.c.bf16 %v3313_v59, %v3309_v6  ;;  %v3299_v7 = vadd.f32 %v7682_v22, %v3189_v13  ;;  %v3301_v11 = vadd.f32 %v7682_v22, %v3278_v38 }
 0xde0   :  { %v3193_v31 = vadd.f32 %v3192_v51, %v7007_v47  ;;  %v3194_v41 = vpop.f32.mrb[85].mxu0  ;;  %v3282_v55 = vadd.f32 %v3281_v63, %v7016_v30  ;;  %v3283_v29 = vpop.f32.mrb[85].mxu1  ;;  %v3314_v52 = vmax.f32 %v3298_v35, 0.0  ;;  %v3316_v6 = vmax.f32 %v3300_v46, 0.0 }
 0xde1   :  { %v3195_v42 = vadd.f32 %v3194_v41, %v7020_v16  ;;  %6550 = vmatprep.subr.bf16.mxu0 %v6549_v34  ;;  %v3284_v14 = vadd.f32 %v3283_v29, %v7024_v37  ;;  %6558 = vmatprep.subr.bf16.mxu1 %v6557_v50  ;;  %v3315_v59 = vmax.f32 %v3299_v7, 0.0  ;;  %v3317_v38 = vmax.f32 %v3301_v11, 0.0 }
 0xde2   :  { %v3302_v10 = vadd.f32 %v7692_v17, %v3193_v31  ;;  %6552 = vmatpush1.bf16.msra.mxu0 %v6551_v15  ;;  %v3304_v56 = vadd.f32 %v7692_v17, %v3282_v55  ;;  %6560 = vmatpush1.bf16.msra.mxu1 %v6559_v53  ;;  %v3464_v11 = vmul.f32 0.9333553, %v7612_v43 }
 0xde3   :  { %v3303_v45 = vadd.f32 %v7692_v17, %v3195_v42  ;;  %v3305_v0 = vadd.f32 %v7692_v17, %v3284_v14  ;;  %v3466_v14 = vmul.f32 0.9333553, %v7616_v23 }
 0xde4   :  { %v3318_v13 = vmax.f32 %v3302_v10, 0.0  ;;  %v3320_v34 = vmax.f32 %v3304_v56, 0.0 }
 0xde5   :  { %v3319_v51 = vmax.f32 %v3303_v45, 0.0  ;;  %v3321_v31 = vmax.f32 %v3305_v0, 0.0  ;;  %v3465_v45 = vmul.f32 0.9333553, %v7619_v36  ;;  %v3467_v0 = vmul.f32 0.9333553, %v7622_v28 }
 0xde6   :  { %v6555_v63 = vpack.c.bf16 %v3318_v13, %v3314_v52  ;;  %v6563_v41 = vpack.c.bf16 %v3320_v34, %v3316_v6 }
 0xde7   :  { %v6553_v29 = vpack.c.bf16 %v3319_v51, %v3315_v59  ;;  %v6561_v50 = vpack.c.bf16 %v3321_v31, %v3317_v38 }
 0xde9   :  { %6554 = vmatprep.subr.bf16.mxu0 %v6553_v29  ;;  %6562 = vmatprep.subr.bf16.mxu1 %v6561_v50  ;;  %v3497_v50 = vld [vmem:[#allocation2 + $0x80] sm:$0xff] }
 0xdea   :  { %6556 = vmatpush1.bf16.msra.mxu0 %v6555_v63  ;;  %6564 = vmatpush1.bf16.msra.mxu1 %v6563_v41 }
 0xded   :  { %6365 = vmatmul.mubr.msk.f32.vlgmr.msra.gmra.mrb[86].mxu0 %vm551_vm1, %v7408_v54  ;;  %6366 = vmatmul.mubr.msk.f32.vlgmr.msra.gmra.mrb[86].mxu1 %vm551_vm1, %v7408_v54 }
 0xdee   :  { %3577 = vmatprep.mubr.f32.mxu0 %v8534_v3  ;;  %3666 = vmatprep.mubr.f32.mxu1 %v8534_v3 }
 0xec0   :  { %v3388_v15 = vpop.f32.mrb[86].mxu0  ;;  %v3459_v35 = vpop.f32.mrb[86].mxu1 }
 0xec1   :  { %v3389_v53 = vadd.f32 %v3388_v15, %v7045_v24  ;;  %v3390_v46 = vpop.f32.mrb[87].mxu0  ;;  %v3460_v7 = vadd.f32 %v3459_v35, %v7045_v24  ;;  %v3461_v42 = vpop.f32.mrb[87].mxu1 }
 0xec2   :  { %v3391_v55 = vadd.f32 %v3390_v46, %v7045_v24  ;;  %v3462_v54 = vadd.f32 %v3461_v42, %v7045_v24  ;;  %v3499_v46 = vld [vmem:[#allocation2 + $0x90] sm:$0xff] }
 0xec3   :  { %v3468_v10 = vmul.f32 0.25815645, %v3389_v53  ;;  %v3470_v56 = vmul.f32 0.25815645, %v3460_v7  ;;  %v3498_v7 = vld [vmem:[#allocation2 + $0x88] sm:$0xff] }
 0xec4   :  { %v3469_v52 = vmul.f32 0.25815645, %v3391_v55  ;;  %v3471_v6 = vmul.f32 0.25815645, %v3462_v54  ;;  %v3503_v54 = vmul.f32 0.0, %v3499_v46 }
 0xec5   :  { %v3472_v13 = vadd.f32 %v3468_v10, %v3464_v11  ;;  %v3474_v59 = vadd.f32 %v3470_v56, %v3466_v14  ;;  %v3500_v11 = vld [vmem:[#allocation2 + $0x98] sm:$0xff]  ;;  %v3502_v56 = vmul.f32 0.0, %v3498_v7 }
 0xec6   :  { %v3473_v34 = vadd.f32 %v3469_v52, %v3465_v45  ;;  %v3475_v38 = vadd.f32 %v3471_v6, %v3467_v0 }
 0xec7   :  { %v3476_v51 = vsub.f32 %v7612_v43, %v3472_v13  ;;  %v3478_v63 = vsub.f32 %v7616_v23, %v3474_v59  ;;  %v3501_v23 = vmul.f32 0.0, %v3497_v50 }
 0xec8   :  { %v3477_v31 = vsub.f32 %v7619_v36, %v3473_v34  ;;  %v3479_v29 = vsub.f32 %v7622_v28, %v3475_v38 }
 0xec9   :  { %v3480_v41 = vmul.f32 3.7423165, %v3476_v51  ;;  %v3482_v15 = vmul.f32 3.7423165, %v3478_v63 }
 0xeca   :  { %v3481_v53 = vmul.f32 3.7423165, %v3477_v31  ;;  %v3483_v55 = vmul.f32 3.7423165, %v3479_v29 }
 0xecb   :  { %v3484_v35 = vadd.f32 %v3480_v41, %v7599_v1  ;;  %v3486_v42 = vadd.f32 %v3482_v15, %v7602_v60  ;;  %v3504_v1 = vmul.f32 0.0, %v3500_v11 }
 0xecc   :  { %v3485_v43 = vadd.f32 %v3481_v53, %v7604_v12  ;;  %v3487_v36 = vadd.f32 %v3483_v55, %v7607_v21 }
 0xecd   :  { %v3488_v10 = vmul.f32 -0.24208085, %v3484_v35  ;;  %v3490_v14 = vmul.f32 -0.24208085, %v3486_v42 }
 0xece   :  { %v3489_v28 = vmul.f32 -0.24208085, %v3485_v43  ;;  %v3491_v52 = vmul.f32 -0.24208085, %v3487_v36 }
 0xecf   :  { %v3492_v45 = vadd.f32 %v3488_v10, %v7525_v19  ;;  %v3494_v13 = vadd.f32 %v3490_v14, %v7528_v49 }
 0xed0   :  { %v3493_v0 = vadd.f32 %v3489_v28, %v7530_v26  ;;  %v3495_v12 = vadd.f32 %v3491_v52, %v7532_v57  ;;  %v7759_v26 = vld [vmem:[%s8499_s3 + $0x10] sm:$0xff]  ;;  %v7770_v57 = vld [vmem:[%s8499_s3 + $0x18] sm:$0xff] }
 0xed1   :  { %v7731_v60 = vadd.f32 %v3501_v23, %v3492_v45  ;;  %v7734_v6 = vadd.f32 %v3503_v54, %v3494_v13 }
 0xed2   :  { %v7736_v59 = vadd.f32 %v3502_v56, %v3493_v0  ;;  %v7738_v21 = vadd.f32 %v3504_v1, %v3495_v12 }
 0xed3   :  { %v3509_v51 = vmul.f32 0.96610314, %v7731_v60  ;;  %v3511_v49 = vmul.f32 0.96610314, %v7734_v6 }
 0xed4   :  { %v3510_v34 = vmul.f32 0.96610314, %v7736_v59  ;;  %v3512_v19 = vmul.f32 0.96610314, %v7738_v21 }
 0xed6   :  { %3513 = vmatprep.subr.mxu0 %v3510_v34  ;;  %3602 = vmatprep.subr.mxu1 %v3512_v19 }
 0xed7   :  { %3514 = vmatpush1.msra.mxu0 %v3509_v51  ;;  %3603 = vmatpush1.msra.mxu1 %v3511_v49 }
 0xed8   :  { %6367 = vmatmul.mubr.msk.f32.vlgmr.msra.gmra.mrb[88].mxu0 %vm79_vm0, %v7631_v62  ;;  %6371 = vmatmul.mubr.msk.f32.vlgmr.msra.gmra.mrb[88].mxu1 %vm79_vm0, %v7631_v62 }
 0xed9   :  { %3583 = vmatprep.mubr.f32.mxu0 %v8534_v3  ;;  %3672 = vmatprep.mubr.f32.mxu1 %v8534_v3 }
 0xedc   :  { %6368 = vmatmul.mubr.msk.f32.gmra.mrb[90].mxu0 %vm79_vm0, %v7642_v61  ;;  %6372 = vmatmul.mubr.msk.f32.gmra.mrb[90].mxu1 %vm79_vm0, %v7642_v61 }
 0xedd   :  { %3589 = vmatprep.mubr.f32.mxu0 %v8534_v3  ;;  %3678 = vmatprep.mubr.f32.mxu1 %v8534_v3 }
 0xee0   :  { %6369 = vmatmul.mubr.msk.f32.gmra.mrb[92].mxu0 %vm79_vm0, %v7759_v26  ;;  %6373 = vmatmul.mubr.msk.f32.gmra.mrb[92].mxu1 %vm79_vm0, %v7759_v26 }
 0xee1   :  { %3595 = vmatprep.mubr.f32.mxu0 %v8534_v3  ;;  %3684 = vmatprep.mubr.f32.mxu1 %v8534_v3 }
 0xee4   :  { %6370 = vmatmul.mubr.msk.f32.gmra.mrb[94].mxu0 %vm79_vm0, %v7770_v57  ;;  %6374 = vmatmul.mubr.msk.f32.gmra.mrb[94].mxu1 %vm79_vm0, %v7770_v57 }
 0xee5   :  { %3787 = vmatprep.mubr.f32.mxu0 %v8534_v3  ;;  %3858 = vmatprep.mubr.f32.mxu1 %v8534_v3 }
 0xfab   :  { %v3579_v38 = vpop.f32.mrb[88].mxu0  ;;  %v3668_v31 = vpop.f32.mrb[88].mxu1 }
 0xfac   :  { %v3580_v63 = vadd.f32 %v3579_v38, %v6965_v2  ;;  %v3581_v41 = vpop.f32.mrb[89].mxu0  ;;  %v3669_v29 = vadd.f32 %v3668_v31, %v6969_v4  ;;  %v3670_v15 = vpop.f32.mrb[89].mxu1 }
 0xfad   :  { %v3582_v50 = vadd.f32 %v3581_v41, %v6971_v5  ;;  %v3671_v53 = vadd.f32 %v3670_v15, %v6976_v9 }
 0xfae   :  { %v3691_v35 = vadd.f32 %v3580_v63, %v7664_v48  ;;  %v3693_v46 = vadd.f32 %v3669_v29, %v7664_v48 }
 0xfaf   :  { %v3585_v7 = vpop.f32.mrb[90].mxu0  ;;  %v3692_v55 = vadd.f32 %v3582_v50, %v7664_v48  ;;  %v3674_v43 = vpop.f32.mrb[90].mxu1  ;;  %v3694_v14 = vadd.f32 %v3671_v53, %v7664_v48 }
 0xfb0   :  { %v3586_v42 = vadd.f32 %v3585_v7, %v6983_v18  ;;  %v3587_v11 = vpop.f32.mrb[91].mxu0  ;;  %v3675_v10 = vadd.f32 %v3674_v43, %v6985_v20  ;;  %v3676_v36 = vpop.f32.mrb[91].mxu1  ;;  %v3707_v56 = vmax.f32 %v3691_v35, 0.0  ;;  %v3709_v45 = vmax.f32 %v3693_v46, 0.0 }
 0xfb1   :  { %v3588_v23 = vadd.f32 %v3587_v11, %v8540_v33  ;;  %v3677_v28 = vadd.f32 %v3676_v36, %v6993_v27  ;;  %v3708_v0 = vmax.f32 %v3692_v55, 0.0  ;;  %v3710_v29 = vmax.f32 %v3694_v14, 0.0 }
 0xfb2   :  { %v3695_v54 = vadd.f32 %v3586_v42, %v7674_v32  ;;  %v3697_v52 = vadd.f32 %v3675_v10, %v7674_v32 }
 0xfb3   :  { %v3696_v1 = vadd.f32 %v3588_v23, %v7674_v32  ;;  %v3591_v13 = vpop.f32.mrb[92].mxu0  ;;  %v3698_v34 = vadd.f32 %v3677_v28, %v7674_v32  ;;  %v3680_v51 = vpop.f32.mrb[92].mxu1 }
 0xfb4   :  { %v3711_v12 = vmax.f32 %v3695_v54, 0.0  ;;  %v3592_v19 = vadd.f32 %v3591_v13, %v8542_v25  ;;  %v3593_v49 = vpop.f32.mrb[93].mxu0  ;;  %v3713_v48 = vmax.f32 %v3697_v52, 0.0  ;;  %v3681_v63 = vadd.f32 %v3680_v51, %v8543_v58  ;;  %v3682_v41 = vpop.f32.mrb[93].mxu1 }
 0xfb5   :  { %v3712_v38 = vmax.f32 %v3696_v1, 0.0  ;;  %v3594_v31 = vadd.f32 %v3593_v49, %v7000_v39  ;;  %v3714_v15 = vmax.f32 %v3698_v34, 0.0  ;;  %v3683_v53 = vadd.f32 %v3682_v41, %v7002_v40 }
 0xfb6   :  { %v6567_v50 = vpack.c.bf16 %v3711_v12, %v3707_v56  ;;  %v6575_v35 = vpack.c.bf16 %v3713_v48, %v3709_v45  ;;  %v3699_v32 = vadd.f32 %v3592_v19, %v7682_v22  ;;  %v3701_v10 = vadd.f32 %v3681_v63, %v7682_v22 }
 0xfb7   :  { %v3597_v46 = vpop.f32.mrb[94].mxu0  ;;  %v6565_v7 = vpack.c.bf16 %v3712_v38, %v3708_v0  ;;  %v3686_v42 = vpop.f32.mrb[94].mxu1  ;;  %v6573_v11 = vpack.c.bf16 %v3714_v15, %v3710_v29  ;;  %v3700_v23 = vadd.f32 %v3594_v31, %v7682_v22  ;;  %v3702_v28 = vadd.f32 %v3683_v53, %v7682_v22  ;;  %v7813_v29 = vld [vmem:[%s8503_s7] sm:$0xff] }
 0xfb8   :  { %v3598_v55 = vadd.f32 %v3597_v46, %v7007_v47  ;;  %v3599_v43 = vpop.f32.mrb[95].mxu0  ;;  %v3687_v36 = vadd.f32 %v3686_v42, %v7016_v30  ;;  %v3688_v54 = vpop.f32.mrb[95].mxu1  ;;  %v3715_v13 = vmax.f32 %v3699_v32, 0.0  ;;  %v3717_v34 = vmax.f32 %v3701_v10, 0.0 }
 0xfb9   :  { %v3600_v14 = vadd.f32 %v3599_v43, %v7020_v16  ;;  %6566 = vmatprep.subr.bf16.mxu0 %v6565_v7  ;;  %v3689_v45 = vadd.f32 %v3688_v54, %v7024_v37  ;;  %6574 = vmatprep.subr.bf16.mxu1 %v6573_v11  ;;  %v3716_v19 = vmax.f32 %v3700_v23, 0.0  ;;  %v3718_v22 = vmax.f32 %v3702_v28, 0.0 }
 0xfba   :  { %v3703_v56 = vadd.f32 %v3598_v55, %v7692_v17  ;;  %6568 = vmatpush1.bf16.msra.mxu0 %v6567_v50  ;;  %v3705_v52 = vadd.f32 %v3687_v36, %v7692_v17  ;;  %6576 = vmatpush1.bf16.msra.mxu1 %v6575_v35  ;;  %v3865_v32 = vmul.f32 0.9333553, %v7731_v60  ;;  %v3867_v42 = vmul.f32 0.9333553, %v7734_v6 }
 0xfbb   :  { %v3704_v1 = vadd.f32 %v3600_v14, %v7692_v17  ;;  %v3706_v12 = vadd.f32 %v3689_v45, %v7692_v17  ;;  %v3866_v10 = vmul.f32 0.9333553, %v7736_v59  ;;  %v3868_v14 = vmul.f32 0.9333553, %v7738_v21 }
 0xfbc   :  { %v3719_v0 = vmax.f32 %v3703_v56, 0.0  ;;  %v3721_v51 = vmax.f32 %v3705_v52, 0.0 }
 0xfbd   :  { %v3720_v49 = vmax.f32 %v3704_v1, 0.0  ;;  %v3722_v38 = vmax.f32 %v3706_v12, 0.0 }
 0xfbe   :  { %v6571_v48 = vpack.c.bf16 %v3719_v0, %v3715_v13  ;;  %v6579_v63 = vpack.c.bf16 %v3721_v51, %v3717_v34 }
 0xfbf   :  { %v6569_v31 = vpack.c.bf16 %v3720_v49, %v3716_v19  ;;  %v6577_v41 = vpack.c.bf16 %v3722_v38, %v3718_v22 }
 0xfc1   :  { %6570 = vmatprep.subr.bf16.mxu0 %v6569_v31  ;;  %6578 = vmatprep.subr.bf16.mxu1 %v6577_v41 }
 0xfc2   :  { %6572 = vmatpush1.bf16.msra.mxu0 %v6571_v48  ;;  %6580 = vmatpush1.bf16.msra.mxu1 %v6579_v63 }
 0xfc5   :  { %6375 = vmatmul.mubr.msk.f32.vlgmr.msra.gmra.mrb[96].mxu0 %vm551_vm1, %v7813_v29  ;;  %6376 = vmatmul.mubr.msk.f32.vlgmr.msra.gmra.mrb[96].mxu1 %vm551_vm1, %v7813_v29 }
 0xfc6   :  { %3961 = vmatprep.mubr.f32.mxu0 %v8534_v3  ;;  %4050 = vmatprep.mubr.f32.mxu1 %v8534_v3 }
0x1098   :  { %v3789_v17 = vpop.f32.mrb[96].mxu0  ;;  %v3860_v15 = vpop.f32.mrb[96].mxu1 }
0x1099   :  { %v3790_v50 = vadd.f32 %v3789_v17, %v7045_v24  ;;  %v3791_v53 = vpop.f32.mrb[97].mxu0  ;;  %v3861_v35 = vadd.f32 %v3860_v15, %v7045_v24  ;;  %v3862_v7 = vpop.f32.mrb[97].mxu1 }
0x109a   :  { %v3792_v46 = vadd.f32 %v3791_v53, %v7045_v24  ;;  %v3863_v43 = vadd.f32 %v3862_v7, %v7045_v24 }
0x109b   :  { %v3869_v55 = vmul.f32 0.25815645, %v3790_v50  ;;  %v3871_v11 = vmul.f32 0.25815645, %v3861_v35 }
0x109c   :  { %v3870_v23 = vmul.f32 0.25815645, %v3792_v46  ;;  %v3872_v54 = vmul.f32 0.25815645, %v3863_v43 }
0x109d   :  { %v3873_v36 = vadd.f32 %v3869_v55, %v3865_v32  ;;  %v3875_v28 = vadd.f32 %v3871_v11, %v3867_v42  ;;  %v7887_v42 = vmul.f32 -0.5204717, %v6953_v44 }
0x109e   :  { %v3874_v56 = vadd.f32 %v3870_v23, %v3866_v10  ;;  %v3876_v52 = vadd.f32 %v3872_v54, %v3868_v14 }
0x109f   :  { %v3877_v45 = vsub.f32 %v7731_v60, %v3873_v36  ;;  %v3879_v1 = vsub.f32 %v7734_v6, %v3875_v28 }
0x10a0   :  { %v3878_v13 = vsub.f32 %v7736_v59, %v3874_v56  ;;  %v3880_v12 = vsub.f32 %v7738_v21, %v3876_v52 }
0x10a1   :  { %v7832_v0 = vmul.f32 3.7423165, %v3877_v45  ;;  %v7835_v34 = vmul.f32 3.7423165, %v3879_v1  ;;  %v8544_v45 = vld [vmem:[#allocation9_spill] sm:$0xff] }
0x10a2   :  { %v7837_v19 = vmul.f32 3.7423165, %v3878_v13  ;;  %v7840_v49 = vmul.f32 3.7423165, %v3880_v12  ;;  %v7897_v52 = vmul.f32 -0.5204717, %v8544_v45 }
0x10a3   :  { %v3885_v51 = vmul.f32 -0.14251946, %v7832_v0  ;;  %v3887_v22 = vmul.f32 -0.14251946, %v7835_v34 }
0x10a4   :  { %v3886_v48 = vmul.f32 -0.14251946, %v7837_v19  ;;  %v3888_v63 = vmul.f32 -0.14251946, %v7840_v49 }
0x10a5   :  { %v7845_v38 = vadd.f32 %v3885_v51, %v7731_v60  ;;  %v7849_v31 = vadd.f32 %v3887_v22, %v7734_v6 }
0x10a6   :  { %v7852_v41 = vadd.f32 %v3886_v48, %v7736_v59  ;;  %v7855_v17 = vadd.f32 %v3888_v63, %v7738_v21 }
0x10a7   :  { %v3893_v53 = vmul.f32 0.9923151, %v7845_v38  ;;  %v3895_v35 = vmul.f32 0.9923151, %v7849_v31 }
0x10a8   :  { %v3894_v50 = vmul.f32 0.9923151, %v7852_v41  ;;  %v3896_v15 = vmul.f32 0.9923151, %v7855_v17 }
0x10aa   :  { %3897 = vmatprep.subr.mxu0 %v3894_v50  ;;  %3986 = vmatprep.subr.mxu1 %v3896_v15  ;;  %v8545_v15 = vld [vmem:[#allocation10_spill] sm:$0xff] }
0x10ab   :  { %3898 = vmatpush1.msra.mxu0 %v3893_v53  ;;  %3987 = vmatpush1.msra.mxu1 %v3895_v35  ;;  %v7905_v53 = vmul.f32 -0.5204717, %v8545_v15 }
0x10ac   :  { %6377 = vmatmul.mubr.msk.f32.vlgmr.msra.gmra.mrb[98].mxu0 %vm79_vm0, %v7631_v62  ;;  %6381 = vmatmul.mubr.msk.f32.vlgmr.msra.gmra.mrb[98].mxu1 %vm79_vm0, %v7631_v62 }
0x10ad   :  { %3967 = vmatprep.mubr.f32.mxu0 %v8534_v3  ;;  %4056 = vmatprep.mubr.f32.mxu1 %v8534_v3 }
0x10b0   :  { %6378 = vmatmul.mubr.msk.f32.gmra.mrb[100].mxu0 %vm79_vm0, %v7642_v61  ;;  %6382 = vmatmul.mubr.msk.f32.gmra.mrb[100].mxu1 %vm79_vm0, %v7642_v61 }
0x10b1   :  { %3973 = vmatprep.mubr.f32.mxu0 %v8534_v3  ;;  %4062 = vmatprep.mubr.f32.mxu1 %v8534_v3 }
0x10b4   :  { %6379 = vmatmul.mubr.msk.f32.gmra.mrb[102].mxu0 %vm79_vm0, %v7759_v26  ;;  %6383 = vmatmul.mubr.msk.f32.gmra.mrb[102].mxu1 %vm79_vm0, %v7759_v26 }
0x10b5   :  { %3979 = vmatprep.mubr.f32.mxu0 %v8534_v3  ;;  %4068 = vmatprep.mubr.f32.mxu1 %v8534_v3 }
0x10b8   :  { %6380 = vmatmul.mubr.msk.f32.gmra.mrb[104].mxu0 %vm79_vm0, %v7770_v57  ;;  %6384 = vmatmul.mubr.msk.f32.gmra.mrb[104].mxu1 %vm79_vm0, %v7770_v57 }
0x10b9   :  { %4175 = vmatprep.mubr.f32.mxu0 %v8534_v3  ;;  %4246 = vmatprep.mubr.f32.mxu1 %v8534_v3 }
0x117f   :  { %v3963_v46 = vpop.f32.mrb[98].mxu0  ;;  %v4052_v32 = vpop.f32.mrb[98].mxu1 }
0x1180   :  { %v3964_v7 = vadd.f32 %v3963_v46, %v6965_v2  ;;  %v3965_v55 = vpop.f32.mrb[99].mxu0  ;;  %v4053_v43 = vadd.f32 %v4052_v32, %v6969_v4  ;;  %v4054_v10 = vpop.f32.mrb[99].mxu1 }
0x1181   :  { %v3966_v11 = vadd.f32 %v3965_v55, %v6971_v5  ;;  %v4055_v23 = vadd.f32 %v4054_v10, %v6976_v9 }
0x1182   :  { %v4079_v36 = vadd.f32 %v7887_v42, %v3964_v7  ;;  %v4081_v14 = vadd.f32 %v7887_v42, %v4053_v43 }
0x1183   :  { %v3969_v54 = vpop.f32.mrb[100].mxu0  ;;  %v4080_v28 = vadd.f32 %v7887_v42, %v3966_v11  ;;  %v4058_v1 = vpop.f32.mrb[100].mxu1  ;;  %v4082_v48 = vadd.f32 %v7887_v42, %v4055_v23 }
0x1184   :  { %v3970_v56 = vadd.f32 %v3969_v54, %v6983_v18  ;;  %v3971_v13 = vpop.f32.mrb[101].mxu0  ;;  %v4059_v12 = vadd.f32 %v4058_v1, %v6985_v20  ;;  %v4060_v22 = vpop.f32.mrb[101].mxu1  ;;  %v4095_v35 = vmax.f32 %v4079_v36, 0.0  ;;  %v4097_v46 = vmax.f32 %v4081_v14, 0.0 }
0x1185   :  { %v3972_v51 = vadd.f32 %v3971_v13, %v8540_v33  ;;  %v4061_v50 = vadd.f32 %v4060_v22, %v6993_v27  ;;  %v4096_v43 = vmax.f32 %v4080_v28, 0.0  ;;  %v4098_v15 = vmax.f32 %v4082_v48, 0.0 }
0x1186   :  { %v4083_v63 = vadd.f32 %v7897_v52, %v3970_v56  ;;  %v4085_v7 = vadd.f32 %v7897_v52, %v4059_v12 }
0x1187   :  { %v4084_v32 = vadd.f32 %v7897_v52, %v3972_v51  ;;  %v3975_v55 = vpop.f32.mrb[102].mxu0  ;;  %v4086_v10 = vadd.f32 %v7897_v52, %v4061_v50  ;;  %v4064_v54 = vpop.f32.mrb[102].mxu1  ;;  %v7915_v50 = vmul.f32 -0.5204717, %v6974_v8 }
0x1188   :  { %v4099_v11 = vmax.f32 %v4083_v63, 0.0  ;;  %v3976_v23 = vadd.f32 %v3975_v55, %v8542_v25  ;;  %v3977_v56 = vpop.f32.mrb[103].mxu0  ;;  %v4101_v1 = vmax.f32 %v4085_v7, 0.0  ;;  %v4065_v22 = vadd.f32 %v4064_v54, %v8543_v58  ;;  %v4066_v14 = vpop.f32.mrb[103].mxu1 }
0x1189   :  { %v4100_v13 = vmax.f32 %v4084_v32, 0.0  ;;  %v3978_v36 = vadd.f32 %v3977_v56, %v7000_v39  ;;  %v4102_v45 = vmax.f32 %v4086_v10, 0.0  ;;  %v4067_v51 = vadd.f32 %v4066_v14, %v7002_v40 }
0x118a   :  { %v6583_v12 = vpack.c.bf16 %v4099_v11, %v4095_v35  ;;  %v6591_v28 = vpack.c.bf16 %v4101_v1, %v4097_v46  ;;  %v4087_v55 = vadd.f32 %v7905_v53, %v3976_v23  ;;  %v4089_v56 = vadd.f32 %v7905_v53, %v4065_v22 }
0x118b   :  { %v3981_v63 = vpop.f32.mrb[104].mxu0  ;;  %v6581_v44 = vpack.c.bf16 %v4100_v13, %v4096_v43  ;;  %v4070_v32 = vpop.f32.mrb[104].mxu1  ;;  %v6589_v58 = vpack.c.bf16 %v4102_v45, %v4098_v15  ;;  %v4088_v48 = vadd.f32 %v7905_v53, %v3978_v36  ;;  %v4090_v43 = vadd.f32 %v7905_v53, %v4067_v51 }
0x118c   :  { %v3982_v7 = vadd.f32 %v3981_v63, %v7007_v47  ;;  %v3983_v54 = vpop.f32.mrb[105].mxu0  ;;  %v4071_v35 = vadd.f32 %v4070_v32, %v7016_v30  ;;  %v4072_v11 = vpop.f32.mrb[105].mxu1  ;;  %v4103_v1 = vmax.f32 %v4087_v55, 0.0  ;;  %v4105_v36 = vmax.f32 %v4089_v56, 0.0 }
0x118d   :  { %v3984_v46 = vadd.f32 %v3983_v54, %v7020_v16  ;;  %6582 = vmatprep.subr.bf16.mxu0 %v6581_v44  ;;  %v4073_v23 = vadd.f32 %v4072_v11, %v7024_v37  ;;  %6590 = vmatprep.subr.bf16.mxu1 %v6589_v58  ;;  %v4104_v14 = vmax.f32 %v4088_v48, 0.0  ;;  %v4106_v51 = vmax.f32 %v4090_v43, 0.0 }
0x118e   :  { %v4091_v10 = vadd.f32 %v7915_v50, %v3982_v7  ;;  %6584 = vmatpush1.bf16.msra.mxu0 %v6583_v12  ;;  %v4093_v45 = vadd.f32 %v7915_v50, %v4071_v35  ;;  %6592 = vmatpush1.bf16.msra.mxu1 %v6591_v28  ;;  %v4253_v43 = vmul.f32 0.9846893, %v7845_v38 }
0x118f   :  { %v4092_v15 = vadd.f32 %v7915_v50, %v3984_v46  ;;  %v4094_v22 = vadd.f32 %v7915_v50, %v4073_v23  ;;  %v4255_v23 = vmul.f32 0.9846893, %v7849_v31 }
0x1190   :  { %v4107_v13 = vmax.f32 %v4091_v10, 0.0  ;;  %v4109_v44 = vmax.f32 %v4093_v45, 0.0 }
0x1191   :  { %v4108_v63 = vmax.f32 %v4092_v15, 0.0  ;;  %v4110_v7 = vmax.f32 %v4094_v22, 0.0 }
0x1192   :  { %v6587_v32 = vpack.c.bf16 %v4107_v13, %v4103_v1  ;;  %v6595_v54 = vpack.c.bf16 %v4109_v44, %v4105_v36  ;;  %v4254_v1 = vmul.f32 0.9846893, %v7852_v41  ;;  %v4256_v36 = vmul.f32 0.9846893, %v7855_v17 }
0x1193   :  { %v6585_v11 = vpack.c.bf16 %v4108_v63, %v4104_v14  ;;  %v6593_v58 = vpack.c.bf16 %v4110_v7, %v4106_v51 }
0x1195   :  { %6586 = vmatprep.subr.bf16.mxu0 %v6585_v11  ;;  %6594 = vmatprep.subr.bf16.mxu1 %v6593_v58 }
0x1196   :  { %6588 = vmatpush1.bf16.msra.mxu0 %v6587_v32  ;;  %6596 = vmatpush1.bf16.msra.mxu1 %v6595_v54 }
0x1199   :  { %6385 = vmatmul.mubr.msk.f32.vlgmr.msra.gmra.mrb[106].mxu0 %vm551_vm1, %v7813_v29  ;;  %6386 = vmatmul.mubr.msk.f32.vlgmr.msra.gmra.mrb[106].mxu1 %vm551_vm1, %v7813_v29 }
0x119a   :  { %4366 = vmatprep.mubr.f32.mxu0 %v8534_v3  ;;  %4455 = vmatprep.mubr.f32.mxu1 %v8534_v3 }
0x126c   :  { %v4177_v12 = vpop.f32.mrb[106].mxu0  ;;  %v4248_v55 = vpop.f32.mrb[106].mxu1 }
0x126d   :  { %v4178_v28 = vadd.f32 %v4177_v12, %v7045_v24  ;;  %v4179_v56 = vpop.f32.mrb[107].mxu0  ;;  %v4249_v48 = vadd.f32 %v4248_v55, %v7045_v24  ;;  %v4250_v46 = vpop.f32.mrb[107].mxu1  ;;  %v4286_v12 = vld [vmem:[#allocation2 + $0xa0] sm:$0xff] }
0x126e   :  { %v4180_v35 = vadd.f32 %v4179_v56, %v7045_v24  ;;  %v4251_v45 = vadd.f32 %v4250_v46, %v7045_v24 }
0x126f   :  { %v4257_v10 = vmul.f32 0.12373644, %v4178_v28  ;;  %v4259_v15 = vmul.f32 0.12373644, %v4249_v48  ;;  %v4288_v48 = vld [vmem:[#allocation2 + $0xb0] sm:$0xff] }
0x1270   :  { %v4258_v13 = vmul.f32 0.12373644, %v4180_v35  ;;  %v4260_v14 = vmul.f32 0.12373644, %v4251_v45  ;;  %v4287_v35 = vld [vmem:[#allocation2 + $0xa8] sm:$0xff] }
0x1271   :  { %v4261_v22 = vadd.f32 %v4257_v10, %v4253_v43  ;;  %v4263_v44 = vadd.f32 %v4259_v15, %v4255_v23  ;;  %v4289_v10 = vld [vmem:[#allocation2 + $0xb8] sm:$0xff]  ;;  %v4292_v15 = vmul.f32 0.0, %v4288_v48 }
0x1272   :  { %v4262_v63 = vadd.f32 %v4258_v13, %v4254_v1  ;;  %v4264_v32 = vadd.f32 %v4260_v14, %v4256_v36  ;;  %v4291_v1 = vmul.f32 0.0, %v4287_v35 }
0x1273   :  { %v4265_v51 = vsub.f32 %v7845_v38, %v4261_v22  ;;  %v4267_v7 = vsub.f32 %v7849_v31, %v4263_v44  ;;  %v4290_v31 = vmul.f32 0.0, %v4286_v12 }
0x1274   :  { %v4266_v54 = vsub.f32 %v7852_v41, %v4262_v63  ;;  %v4268_v58 = vsub.f32 %v7855_v17, %v4264_v32 }
0x1275   :  { %v4269_v11 = vmul.f32 8.019587, %v4265_v51  ;;  %v4271_v28 = vmul.f32 8.019587, %v4267_v7 }
0x1276   :  { %v4270_v55 = vmul.f32 8.019587, %v4266_v54  ;;  %v4272_v46 = vmul.f32 8.019587, %v4268_v58 }
0x1277   :  { %v4273_v56 = vadd.f32 %v4269_v11, %v7832_v0  ;;  %v4275_v43 = vadd.f32 %v4271_v28, %v7835_v34  ;;  %v4293_v0 = vmul.f32 0.0, %v4289_v10 }
0x1278   :  { %v4274_v38 = vadd.f32 %v4270_v55, %v7837_v19  ;;  %v4276_v41 = vadd.f32 %v4272_v46, %v7840_v49 }
0x1279   :  { %v4277_v23 = vmul.f32 -0.07125973, %v4273_v56  ;;  %v4279_v45 = vmul.f32 -0.07125973, %v4275_v43 }
0x127a   :  { %v4278_v17 = vmul.f32 -0.07125973, %v4274_v38  ;;  %v4280_v22 = vmul.f32 -0.07125973, %v4276_v41 }
0x127b   :  { %v4281_v13 = vadd.f32 %v4277_v23, %v7731_v60  ;;  %v4283_v36 = vadd.f32 %v4279_v45, %v7734_v6 }
0x127c   :  { %v4282_v14 = vadd.f32 %v4278_v17, %v7736_v59  ;;  %v4284_v19 = vadd.f32 %v4280_v22, %v7738_v21 }
0x127d   :  { %v7954_v34 = vadd.f32 %v4290_v31, %v4281_v13  ;;  %v7957_v44 = vadd.f32 %v4292_v15, %v4283_v36 }
0x127e   :  { %v7959_v63 = vadd.f32 %v4291_v1, %v4282_v14  ;;  %v7961_v49 = vadd.f32 %v4293_v0, %v4284_v19 }
0x127f   :  { %v4298_v32 = vmul.f32 0.9923151, %v7954_v34  ;;  %v4300_v6 = vmul.f32 0.9923151, %v7957_v44 }
0x1280   :  { %v4299_v51 = vmul.f32 0.9923151, %v7959_v63  ;;  %v4301_v60 = vmul.f32 0.9923151, %v7961_v49 }
0x1282   :  { %4302 = vmatprep.subr.mxu0 %v4299_v51  ;;  %4391 = vmatprep.subr.mxu1 %v4301_v60 }
0x1283   :  { %4303 = vmatpush1.msra.mxu0 %v4298_v32  ;;  %4392 = vmatpush1.msra.mxu1 %v4300_v6  ;;  %v8546_v32 = vld [vmem:[#allocation13_spill] sm:$0xff] }
0x1284   :  { %6387 = vmatmul.mubr.msk.f32.vlgmr.msra.gmra.mrb[108].mxu0 %vm79_vm0, %v7631_v62  ;;  %6391 = vmatmul.mubr.msk.f32.vlgmr.msra.gmra.mrb[108].mxu1 %vm79_vm0, %v7631_v62 }
0x1285   :  { %4372 = vmatprep.mubr.f32.mxu0 %v8534_v3  ;;  %4461 = vmatprep.mubr.f32.mxu1 %v8534_v3 }
0x1288   :  { %6388 = vmatmul.mubr.msk.f32.gmra.mrb[110].mxu0 %vm79_vm0, %v7642_v61  ;;  %6392 = vmatmul.mubr.msk.f32.gmra.mrb[110].mxu1 %vm79_vm0, %v7642_v61 }
0x1289   :  { %4378 = vmatprep.mubr.f32.mxu0 %v8534_v3  ;;  %4467 = vmatprep.mubr.f32.mxu1 %v8534_v3 }
0x128c   :  { %6389 = vmatmul.mubr.msk.f32.gmra.mrb[112].mxu0 %vm79_vm0, %v7759_v26  ;;  %6393 = vmatmul.mubr.msk.f32.gmra.mrb[112].mxu1 %vm79_vm0, %v7759_v26 }
0x128d   :  { %4384 = vmatprep.mubr.f32.mxu0 %v8534_v3  ;;  %4473 = vmatprep.mubr.f32.mxu1 %v8534_v3 }
0x1290   :  { %6390 = vmatmul.mubr.msk.f32.gmra.mrb[114].mxu0 %vm79_vm0, %v7770_v57  ;;  %6394 = vmatmul.mubr.msk.f32.gmra.mrb[114].mxu1 %vm79_vm0, %v7770_v57 }
0x1291   :  { %4576 = vmatprep.mubr.f32.mxu0 %v8534_v3  ;;  %4647 = vmatprep.mubr.f32.mxu1 %v8534_v3 }
0x1357   :  { %v4368_v62 = vpop.f32.mrb[108].mxu0  ;;  %v4457_v59 = vpop.f32.mrb[108].mxu1 }
0x1358   :  { %v4369_v61 = vadd.f32 %v4368_v62, %v6965_v2  ;;  %v4370_v21 = vpop.f32.mrb[109].mxu0  ;;  %v4458_v7 = vadd.f32 %v4457_v59, %v6969_v4  ;;  %v4459_v11 = vpop.f32.mrb[109].mxu1 }
0x1359   :  { %v4371_v54 = vadd.f32 %v4370_v21, %v6971_v5  ;;  %v4460_v58 = vadd.f32 %v4459_v11, %v6976_v9 }
0x135a   :  { %v4480_v12 = vadd.f32 %v4369_v61, %v7887_v42  ;;  %v4482_v28 = vadd.f32 %v4458_v7, %v7887_v42 }
0x135b   :  { %v4374_v55 = vpop.f32.mrb[110].mxu0  ;;  %v4481_v56 = vadd.f32 %v4371_v54, %v7887_v42  ;;  %v4463_v35 = vpop.f32.mrb[110].mxu1  ;;  %v4483_v23 = vadd.f32 %v4460_v58, %v7887_v42 }
0x135c   :  { %v4375_v48 = vadd.f32 %v4374_v55, %v6983_v18  ;;  %v4376_v46 = vpop.f32.mrb[111].mxu0  ;;  %v4464_v43 = vadd.f32 %v4463_v35, %v6985_v20  ;;  %v4465_v10 = vpop.f32.mrb[111].mxu1  ;;  %v4496_v45 = vmax.f32 %v4480_v12, 0.0  ;;  %v4498_v15 = vmax.f32 %v4482_v28, 0.0 }
0x135d   :  { %v4377_v38 = vadd.f32 %v4376_v46, %v8540_v33  ;;  %v4466_v41 = vadd.f32 %v4465_v10, %v6993_v27  ;;  %v4497_v22 = vmax.f32 %v4481_v56, 0.0  ;;  %v4499_v59 = vmax.f32 %v4483_v23, 0.0 }
0x135e   :  { %v4484_v31 = vadd.f32 %v4375_v48, %v7897_v52  ;;  %v4486_v17 = vadd.f32 %v4464_v43, %v7897_v52 }
0x135f   :  { %v4485_v1 = vadd.f32 %v4377_v38, %v7897_v52  ;;  %v4380_v13 = vpop.f32.mrb[112].mxu0  ;;  %v4487_v36 = vadd.f32 %v4466_v41, %v7897_v52  ;;  %v4469_v19 = vpop.f32.mrb[112].mxu1 }
0x1360   :  { %v4500_v0 = vmax.f32 %v4484_v31, 0.0  ;;  %v4381_v14 = vadd.f32 %v4380_v13, %v8542_v25  ;;  %v4382_v51 = vpop.f32.mrb[113].mxu0  ;;  %v4502_v42 = vmax.f32 %v4486_v17, 0.0  ;;  %v4470_v6 = vadd.f32 %v4469_v19, %v8546_v32  ;;  %v4471_v61 = vpop.f32.mrb[113].mxu1 }
0x1361   :  { %v4501_v60 = vmax.f32 %v4485_v1, 0.0  ;;  %v4383_v62 = vadd.f32 %v4382_v51, %v7000_v39  ;;  %v4503_v7 = vmax.f32 %v4487_v36, 0.0  ;;  %v4472_v54 = vadd.f32 %v4471_v61, %v7002_v40 }
0x1362   :  { %v6599_v21 = vpack.c.bf16 %v4500_v0, %v4496_v45  ;;  %v6607_v11 = vpack.c.bf16 %v4502_v42, %v4498_v15  ;;  %v4488_v52 = vadd.f32 %v4381_v14, %v7905_v53  ;;  %v4490_v35 = vadd.f32 %v4470_v6, %v7905_v53 }
0x1363   :  { %v4386_v58 = vpop.f32.mrb[114].mxu0  ;;  %v6597_v12 = vpack.c.bf16 %v4501_v60, %v4497_v22  ;;  %v4475_v55 = vpop.f32.mrb[114].mxu1  ;;  %v6605_v48 = vpack.c.bf16 %v4503_v7, %v4499_v59  ;;  %v4489_v46 = vadd.f32 %v4383_v62, %v7905_v53  ;;  %v4491_v23 = vadd.f32 %v4472_v54, %v7905_v53 }
0x1364   :  { %v4387_v28 = vadd.f32 %v4386_v58, %v7007_v47  ;;  %v4388_v56 = vpop.f32.mrb[115].mxu0  ;;  %v4476_v43 = vadd.f32 %v4475_v55, %v7016_v30  ;;  %v4477_v10 = vpop.f32.mrb[115].mxu1  ;;  %v4504_v17 = vmax.f32 %v4488_v52, 0.0  ;;  %v4506_v22 = vmax.f32 %v4490_v35, 0.0 }
0x1365   :  { %v4389_v38 = vadd.f32 %v4388_v56, %v7020_v16  ;;  %6598 = vmatprep.subr.bf16.mxu0 %v6597_v12  ;;  %v4478_v41 = vadd.f32 %v4477_v10, %v7024_v37  ;;  %6606 = vmatprep.subr.bf16.mxu1 %v6605_v48  ;;  %v4505_v0 = vmax.f32 %v4489_v46, 0.0  ;;  %v4507_v53 = vmax.f32 %v4491_v23, 0.0 }
0x1366   :  { %v4492_v31 = vadd.f32 %v4387_v28, %v7915_v50  ;;  %6600 = vmatpush1.bf16.msra.mxu0 %v6599_v21  ;;  %v4494_v45 = vadd.f32 %v4476_v43, %v7915_v50  ;;  %6608 = vmatpush1.bf16.msra.mxu1 %v6607_v11  ;;  %v4654_v11 = vmul.f32 0.9846893, %v7954_v34  ;;  %v4656_v12 = vmul.f32 0.9846893, %v7957_v44 }
0x1367   :  { %v4493_v15 = vadd.f32 %v4389_v38, %v7915_v50  ;;  %v4495_v13 = vadd.f32 %v4478_v41, %v7915_v50  ;;  %v4655_v55 = vmul.f32 0.9846893, %v7959_v63  ;;  %v4657_v35 = vmul.f32 0.9846893, %v7961_v49 }
0x1368   :  { %v4508_v1 = vmax.f32 %v4492_v31, 0.0  ;;  %v4510_v36 = vmax.f32 %v4494_v45, 0.0 }
0x1369   :  { %v4509_v14 = vmax.f32 %v4493_v15, 0.0  ;;  %v4511_v51 = vmax.f32 %v4495_v13, 0.0 }
0x136a   :  { %v6603_v19 = vpack.c.bf16 %v4508_v1, %v4504_v17  ;;  %v6611_v42 = vpack.c.bf16 %v4510_v36, %v4506_v22 }
0x136b   :  { %v6601_v60 = vpack.c.bf16 %v4509_v14, %v4505_v0  ;;  %v6609_v6 = vpack.c.bf16 %v4511_v51, %v4507_v53 }
0x136d   :  { %6602 = vmatprep.subr.bf16.mxu0 %v6601_v60  ;;  %6610 = vmatprep.subr.bf16.mxu1 %v6609_v6 }
0x136e   :  { %6604 = vmatpush1.bf16.msra.mxu0 %v6603_v19  ;;  %6612 = vmatpush1.bf16.msra.mxu1 %v6611_v42 }
0x1371   :  { %6395 = vmatmul.mubr.msk.f32.vlgmr.msra.gmra.mrb[116].mxu0 %vm551_vm1, %v7813_v29  ;;  %6396 = vmatmul.mubr.msk.f32.vlgmr.msra.gmra.mrb[116].mxu1 %vm551_vm1, %v7813_v29 }
0x1372   :  { %4750 = vmatprep.mubr.f32.mxu0 %v8534_v3  ;;  %4839 = vmatprep.mubr.f32.mxu1 %v8534_v3 }
0x1444   :  { %v4578_v50 = vpop.f32.mrb[116].mxu0  ;;  %v4649_v61 = vpop.f32.mrb[116].mxu1 }
0x1445   :  { %v4579_v62 = vadd.f32 %v4578_v50, %v7045_v24  ;;  %v4580_v59 = vpop.f32.mrb[117].mxu0  ;;  %v4650_v21 = vadd.f32 %v4649_v61, %v7045_v24  ;;  %v4651_v54 = vpop.f32.mrb[117].mxu1  ;;  %v8072_v61 = vld [vmem:[%s8499_s3] sm:$0xff] }
0x1446   :  { %v4581_v7 = vadd.f32 %v4580_v59, %v7045_v24  ;;  %v4652_v52 = vadd.f32 %v4651_v54, %v7045_v24  ;;  %v8083_v59 = vld [vmem:[%s8499_s3 + $0x8] sm:$0xff] }
0x1447   :  { %v4658_v58 = vmul.f32 0.12373644, %v4579_v62  ;;  %v4660_v28 = vmul.f32 0.12373644, %v4650_v21 }
0x1448   :  { %v4659_v56 = vmul.f32 0.12373644, %v4581_v7  ;;  %v4661_v46 = vmul.f32 0.12373644, %v4652_v52 }
0x1449   :  { %v4662_v48 = vadd.f32 %v4658_v58, %v4654_v11  ;;  %v4664_v43 = vadd.f32 %v4660_v28, %v4656_v12 }
0x144a   :  { %v4663_v38 = vadd.f32 %v4659_v56, %v4655_v55  ;;  %v4665_v23 = vadd.f32 %v4661_v46, %v4657_v35 }
0x144b   :  { %v4666_v10 = vsub.f32 %v7954_v34, %v4662_v48  ;;  %v4668_v31 = vsub.f32 %v7957_v44, %v4664_v43  ;;  %v8548_v43 = vld [vmem:[#allocation9_spill] sm:$0xff] }
0x144c   :  { %v4667_v41 = vsub.f32 %v7959_v63, %v4663_v38  ;;  %v4669_v15 = vsub.f32 %v7961_v49, %v4665_v23  ;;  %v8115_v38 = vmul.f32 -0.73432845, %v8548_v43 }
0x144d   :  { %v8040_v45 = vmul.f32 8.019587, %v4666_v10  ;;  %v8043_v17 = vmul.f32 8.019587, %v4668_v31 }
0x144e   :  { %v8045_v1 = vmul.f32 8.019587, %v4667_v41  ;;  %v8048_v22 = vmul.f32 8.019587, %v4669_v15 }
0x144f   :  { %v4674_v13 = vmul.f32 -0.07168678, %v8040_v45  ;;  %v4676_v0 = vmul.f32 -0.07168678, %v8043_v17 }
0x1450   :  { %v4675_v36 = vmul.f32 -0.07168678, %v8045_v1  ;;  %v4677_v53 = vmul.f32 -0.07168678, %v8048_v22 }
0x1451   :  { %v8053_v14 = vadd.f32 %v4674_v13, %v7954_v34  ;;  %v8057_v19 = vadd.f32 %v4676_v0, %v7957_v44 }
0x1452   :  { %v8060_v51 = vadd.f32 %v4675_v36, %v7959_v63  ;;  %v8063_v42 = vadd.f32 %v4677_v53, %v7961_v49  ;;  %v8549_v53 = vld [vmem:[#allocation10_spill] sm:$0xff] }
0x1453   :  { %v4682_v50 = vmul.f32 0.99859804, %v8053_v14  ;;  %v4684_v62 = vmul.f32 0.99859804, %v8057_v19 }
0x1454   :  { %v4683_v60 = vmul.f32 0.99859804, %v8060_v51  ;;  %v4685_v6 = vmul.f32 0.99859804, %v8063_v42 }
0x1456   :  { %4686 = vmatprep.subr.mxu0 %v4683_v60  ;;  %4775 = vmatprep.subr.mxu1 %v4685_v6  ;;  %v8123_v60 = vmul.f32 -0.73432845, %v8549_v53 }
0x1457   :  { %4687 = vmatpush1.msra.mxu0 %v4682_v50  ;;  %4776 = vmatpush1.msra.mxu1 %v4684_v62 }
0x1458   :  { %6397 = vmatmul.mubr.msk.f32.vlgmr.msra.gmra.mrb[118].mxu0 %vm79_vm0, %v8072_v61  ;;  %6401 = vmatmul.mubr.msk.f32.vlgmr.msra.gmra.mrb[118].mxu1 %vm79_vm0, %v8072_v61 }
0x1459   :  { %4756 = vmatprep.mubr.f32.mxu0 %v8534_v3  ;;  %4845 = vmatprep.mubr.f32.mxu1 %v8534_v3 }
0x145c   :  { %6398 = vmatmul.mubr.msk.f32.gmra.mrb[120].mxu0 %vm79_vm0, %v8083_v59  ;;  %6402 = vmatmul.mubr.msk.f32.gmra.mrb[120].mxu1 %vm79_vm0, %v8083_v59 }
0x145d   :  { %4762 = vmatprep.mubr.f32.mxu0 %v8534_v3  ;;  %4851 = vmatprep.mubr.f32.mxu1 %v8534_v3 }
0x1460   :  { %6399 = vmatmul.mubr.msk.f32.gmra.mrb[122].mxu0 %vm79_vm0, %v7759_v26  ;;  %6403 = vmatmul.mubr.msk.f32.gmra.mrb[122].mxu1 %vm79_vm0, %v7759_v26  ;;  %v8547_v26 = vld [vmem:[#allocation8_spill] sm:$0xff] }
0x1461   :  { %4768 = vmatprep.mubr.f32.mxu0 %v8534_v3  ;;  %4857 = vmatprep.mubr.f32.mxu1 %v8534_v3  ;;  %v8105_v58 = vmul.f32 -0.73432845, %v8547_v26 }
0x1464   :  { %6400 = vmatmul.mubr.msk.f32.gmra.mrb[124].mxu0 %vm79_vm0, %v7770_v57  ;;  %6404 = vmatmul.mubr.msk.f32.gmra.mrb[124].mxu1 %vm79_vm0, %v7770_v57 }
0x1465   :  { %4964 = vmatprep.mubr.f32.mxu0 %v8534_v3  ;;  %5035 = vmatprep.mubr.f32.mxu1 %v8534_v3 }
0x152b   :  { %v4752_v21 = vpop.f32.mrb[118].mxu0  ;;  %v4841_v54 = vpop.f32.mrb[118].mxu1 }
0x152c   :  { %v4753_v7 = vadd.f32 %v4752_v21, %v6965_v2  ;;  %v4754_v11 = vpop.f32.mrb[119].mxu0  ;;  %v4842_v12 = vadd.f32 %v4841_v54, %v6969_v4  ;;  %v4843_v28 = vpop.f32.mrb[119].mxu1 }
0x152d   :  { %v4755_v52 = vadd.f32 %v4754_v11, %v6971_v5  ;;  %v4844_v55 = vadd.f32 %v4843_v28, %v6976_v9 }
0x152e   :  { %v4868_v57 = vadd.f32 %v8105_v58, %v4753_v7  ;;  %v4870_v56 = vadd.f32 %v8105_v58, %v4842_v12 }
0x152f   :  { %v4758_v48 = vpop.f32.mrb[120].mxu0  ;;  %v4869_v35 = vadd.f32 %v8105_v58, %v4755_v52  ;;  %v4847_v10 = vpop.f32.mrb[120].mxu1  ;;  %v4871_v13 = vadd.f32 %v8105_v58, %v4844_v55 }
0x1530   :  { %v4759_v46 = vadd.f32 %v4758_v48, %v6983_v18  ;;  %v4760_v23 = vpop.f32.mrb[121].mxu0  ;;  %v4848_v31 = vadd.f32 %v4847_v10, %v6985_v20  ;;  %v4849_v15 = vpop.f32.mrb[121].mxu1  ;;  %v4884_v6 = vmax.f32 %v4868_v57, 0.0  ;;  %v4886_v50 = vmax.f32 %v4870_v56, 0.0 }
0x1531   :  { %v4761_v41 = vadd.f32 %v4760_v23, %v8540_v33  ;;  %v4850_v36 = vadd.f32 %v4849_v15, %v6993_v27  ;;  %v4885_v54 = vmax.f32 %v4869_v35, 0.0  ;;  %v4887_v23 = vmax.f32 %v4871_v13, 0.0 }
0x1532   :  { %v4872_v0 = vadd.f32 %v8115_v38, %v4759_v46  ;;  %v4874_v62 = vadd.f32 %v8115_v38, %v4848_v31 }
0x1533   :  { %v4873_v21 = vadd.f32 %v8115_v38, %v4761_v41  ;;  %v4764_v7 = vpop.f32.mrb[122].mxu0  ;;  %v4875_v12 = vadd.f32 %v8115_v38, %v4850_v36  ;;  %v4853_v28 = vpop.f32.mrb[122].mxu1  ;;  %v8133_v36 = vmul.f32 -0.73432845, %v6974_v8 }
0x1534   :  { %v4888_v11 = vmax.f32 %v4872_v0, 0.0  ;;  %v4765_v52 = vadd.f32 %v4764_v7, %v8542_v25  ;;  %v4766_v55 = vpop.f32.mrb[123].mxu0  ;;  %v4890_v48 = vmax.f32 %v4874_v62, 0.0  ;;  %v4854_v10 = vadd.f32 %v4853_v28, %v8546_v32  ;;  %v4855_v56 = vpop.f32.mrb[123].mxu1 }
0x1535   :  { %v4889_v46 = vmax.f32 %v4873_v21, 0.0  ;;  %v4767_v57 = vadd.f32 %v4766_v55, %v7000_v39  ;;  %v4891_v15 = vmax.f32 %v4875_v12, 0.0  ;;  %v4856_v41 = vadd.f32 %v4855_v56, %v7002_v40 }
0x1536   :  { %v6615_v31 = vpack.c.bf16 %v4888_v11, %v4884_v6  ;;  %v6623_v35 = vpack.c.bf16 %v4890_v48, %v4886_v50  ;;  %v4876_v7 = vadd.f32 %v8123_v60, %v4765_v52  ;;  %v4878_v55 = vadd.f32 %v8123_v60, %v4854_v10 }
0x1537   :  { %v4770_v0 = vpop.f32.mrb[124].mxu0  ;;  %v6613_v53 = vpack.c.bf16 %v4889_v46, %v4885_v54  ;;  %v4859_v21 = vpop.f32.mrb[124].mxu1  ;;  %v6621_v43 = vpack.c.bf16 %v4891_v15, %v4887_v23  ;;  %v4877_v13 = vadd.f32 %v8123_v60, %v4767_v57  ;;  %v4879_v54 = vadd.f32 %v8123_v60, %v4856_v41 }
0x1538   :  { %v4771_v62 = vadd.f32 %v4770_v0, %v7007_v47  ;;  %v4772_v28 = vpop.f32.mrb[125].mxu0  ;;  %v4860_v6 = vadd.f32 %v4859_v21, %v7016_v30  ;;  %v4861_v11 = vpop.f32.mrb[125].mxu1  ;;  %v4892_v10 = vmax.f32 %v4876_v7, 0.0  ;;  %v4894_v23 = vmax.f32 %v4878_v55, 0.0 }
0x1539   :  { %v4773_v50 = vadd.f32 %v4772_v28, %v7020_v16  ;;  %6614 = vmatprep.subr.bf16.mxu0 %v6613_v53  ;;  %v4862_v52 = vadd.f32 %v4861_v11, %v7024_v37  ;;  %6622 = vmatprep.subr.bf16.mxu1 %v6621_v43  ;;  %v4893_v15 = vmax.f32 %v4877_v13, 0.0  ;;  %v4895_v41 = vmax.f32 %v4879_v54, 0.0 }
0x153a   :  { %v4880_v12 = vadd.f32 %v8133_v36, %v4771_v62  ;;  %6616 = vmatpush1.bf16.msra.mxu0 %v6615_v31  ;;  %v4882_v48 = vadd.f32 %v8133_v36, %v4860_v6  ;;  %6624 = vmatpush1.bf16.msra.mxu1 %v6623_v35  ;;  %v5042_v54 = vmul.f32 0.99719805, %v8053_v14 }
0x153b   :  { %v4881_v46 = vadd.f32 %v8133_v36, %v4773_v50  ;;  %v4883_v56 = vadd.f32 %v8133_v36, %v4862_v52  ;;  %v5044_v52 = vmul.f32 0.99719805, %v8057_v19 }
0x153c   :  { %v4896_v57 = vmax.f32 %v4880_v12, 0.0  ;;  %v4898_v53 = vmax.f32 %v4882_v48, 0.0 }
0x153d   :  { %v4897_v0 = vmax.f32 %v4881_v46, 0.0  ;;  %v4899_v62 = vmax.f32 %v4883_v56, 0.0  ;;  %v5043_v46 = vmul.f32 0.99719805, %v8060_v51  ;;  %v5045_v56 = vmul.f32 0.99719805, %v8063_v42 }
0x153e   :  { %v6619_v21 = vpack.c.bf16 %v4896_v57, %v4892_v10  ;;  %v6627_v28 = vpack.c.bf16 %v4898_v53, %v4894_v23 }
0x153f   :  { %v6617_v11 = vpack.c.bf16 %v4897_v0, %v4893_v15  ;;  %v6625_v43 = vpack.c.bf16 %v4899_v62, %v4895_v41 }
0x1541   :  { %6618 = vmatprep.subr.bf16.mxu0 %v6617_v11  ;;  %6626 = vmatprep.subr.bf16.mxu1 %v6625_v43  ;;  %v5075_v43 = vld [vmem:[#allocation2 + $0xc0] sm:$0xff] }
0x1542   :  { %6620 = vmatpush1.bf16.msra.mxu0 %v6619_v21  ;;  %6628 = vmatpush1.bf16.msra.mxu1 %v6627_v28 }
0x1545   :  { %6405 = vmatmul.mubr.msk.f32.vlgmr.msra.gmra.mrb[126].mxu0 %vm551_vm1, %v7813_v29  ;;  %6406 = vmatmul.mubr.msk.f32.vlgmr.msra.gmra.mrb[126].mxu1 %vm551_vm1, %v7813_v29 }
0x1546   :  { %5155 = vmatprep.mubr.f32.mxu0 %v8534_v3  ;;  %5244 = vmatprep.mubr.f32.mxu1 %v8534_v3 }
0x1618   :  { %v4966_v31 = vpop.f32.mrb[126].mxu0  ;;  %v5037_v7 = vpop.f32.mrb[126].mxu1 }
0x1619   :  { %v4967_v35 = vadd.f32 %v4966_v31, %v7045_v24  ;;  %v4968_v55 = vpop.f32.mrb[127].mxu0  ;;  %v5038_v13 = vadd.f32 %v5037_v7, %v7045_v24  ;;  %v5039_v50 = vpop.f32.mrb[127].mxu1 }
0x161a   :  { %v4969_v6 = vadd.f32 %v4968_v55, %v7045_v24  ;;  %v5040_v29 = vadd.f32 %v5039_v50, %v7045_v24  ;;  %v5077_v55 = vld [vmem:[#allocation2 + $0xd0] sm:$0xff] }
0x161b   :  { %v5046_v12 = vmul.f32 0.05293361, %v4967_v35  ;;  %v5048_v48 = vmul.f32 0.05293361, %v5038_v13  ;;  %v5076_v13 = vld [vmem:[#allocation2 + $0xc8] sm:$0xff] }
0x161c   :  { %v5047_v10 = vmul.f32 0.05293361, %v4969_v6  ;;  %v5049_v23 = vmul.f32 0.05293361, %v5040_v29  ;;  %v5081_v29 = vmul.f32 0.0, %v5077_v55 }
0x161d   :  { %v5050_v57 = vadd.f32 %v5046_v12, %v5042_v54  ;;  %v5052_v15 = vadd.f32 %v5048_v48, %v5044_v52  ;;  %v5078_v54 = vld [vmem:[#allocation2 + $0xd8] sm:$0xff]  ;;  %v5080_v48 = vmul.f32 0.0, %v5076_v13 }
0x161e   :  { %v5051_v53 = vadd.f32 %v5047_v10, %v5043_v46  ;;  %v5053_v41 = vadd.f32 %v5049_v23, %v5045_v56 }
0x161f   :  { %v5054_v0 = vsub.f32 %v8053_v14, %v5050_v57  ;;  %v5056_v21 = vsub.f32 %v8057_v19, %v5052_v15  ;;  %v5079_v19 = vmul.f32 0.0, %v5075_v43 }
0x1620   :  { %v5055_v62 = vsub.f32 %v8060_v51, %v5051_v53  ;;  %v5057_v11 = vsub.f32 %v8063_v42, %v5053_v41 }
0x1621   :  { %v5058_v28 = vmul.f32 18.865103, %v5054_v0  ;;  %v5060_v31 = vmul.f32 18.865103, %v5056_v21 }
0x1622   :  { %v5059_v35 = vmul.f32 18.865103, %v5055_v62  ;;  %v5061_v6 = vmul.f32 18.865103, %v5057_v11 }
0x1623   :  { %v5062_v7 = vadd.f32 %v5058_v28, %v8040_v45  ;;  %v5064_v50 = vadd.f32 %v5060_v31, %v8043_v17  ;;  %v5082_v45 = vmul.f32 0.0, %v5078_v54 }
0x1624   :  { %v5063_v14 = vadd.f32 %v5059_v35, %v8045_v1  ;;  %v5065_v51 = vadd.f32 %v5061_v6, %v8048_v22 }
0x1625   :  { %v5066_v12 = vmul.f32 -0.03584339, %v5062_v7  ;;  %v5068_v52 = vmul.f32 -0.03584339, %v5064_v50 }
0x1626   :  { %v5067_v42 = vmul.f32 -0.03584339, %v5063_v14  ;;  %v5069_v10 = vmul.f32 -0.03584339, %v5065_v51 }
0x1627   :  { %v5070_v46 = vadd.f32 %v5066_v12, %v7954_v34  ;;  %v5072_v57 = vadd.f32 %v5068_v52, %v7957_v44 }
0x1628   :  { %v5071_v56 = vadd.f32 %v5067_v42, %v7959_v63  ;;  %v5073_v1 = vadd.f32 %v5069_v10, %v7961_v49  ;;  %v8200_v63 = vld [vmem:[%s8499_s3 + $0x10] sm:$0xff]  ;;  %v8211_v49 = vld [vmem:[%s8499_s3 + $0x18] sm:$0xff] }
0x1629   :  { %v8172_v17 = vadd.f32 %v5079_v19, %v5070_v46  ;;  %v8175_v23 = vadd.f32 %v5081_v29, %v5072_v57 }
0x162a   :  { %v8177_v15 = vadd.f32 %v5080_v48, %v5071_v56  ;;  %v8179_v22 = vadd.f32 %v5082_v45, %v5073_v1 }
0x162b   :  { %v5087_v0 = vmul.f32 0.99859804, %v8172_v17  ;;  %v5089_v44 = vmul.f32 0.99859804, %v8175_v23 }
0x162c   :  { %v5088_v53 = vmul.f32 0.99859804, %v8177_v15  ;;  %v5090_v34 = vmul.f32 0.99859804, %v8179_v22 }
0x162e   :  { %5091 = vmatprep.subr.mxu0 %v5088_v53  ;;  %5180 = vmatprep.subr.mxu1 %v5090_v34 }
0x162f   :  { %5092 = vmatpush1.msra.mxu0 %v5087_v0  ;;  %5181 = vmatpush1.msra.mxu1 %v5089_v44 }
0x1630   :  { %6407 = vmatmul.mubr.msk.f32.vlgmr.msra.gmra.mrb[128].mxu0 %vm79_vm0, %v8072_v61  ;;  %6411 = vmatmul.mubr.msk.f32.vlgmr.msra.gmra.mrb[128].mxu1 %vm79_vm0, %v8072_v61 }
0x1631   :  { %5161 = vmatprep.mubr.f32.mxu0 %v8534_v3  ;;  %5250 = vmatprep.mubr.f32.mxu1 %v8534_v3 }
0x1634   :  { %6408 = vmatmul.mubr.msk.f32.gmra.mrb[130].mxu0 %vm79_vm0, %v8083_v59  ;;  %6412 = vmatmul.mubr.msk.f32.gmra.mrb[130].mxu1 %vm79_vm0, %v8083_v59 }
0x1635   :  { %5167 = vmatprep.mubr.f32.mxu0 %v8534_v3  ;;  %5256 = vmatprep.mubr.f32.mxu1 %v8534_v3 }
0x1638   :  { %6409 = vmatmul.mubr.msk.f32.gmra.mrb[132].mxu0 %vm79_vm0, %v8200_v63  ;;  %6413 = vmatmul.mubr.msk.f32.gmra.mrb[132].mxu1 %vm79_vm0, %v8200_v63 }
0x1639   :  { %5173 = vmatprep.mubr.f32.mxu0 %v8534_v3  ;;  %5262 = vmatprep.mubr.f32.mxu1 %v8534_v3 }
0x163c   :  { %6410 = vmatmul.mubr.msk.f32.gmra.mrb[134].mxu0 %vm79_vm0, %v8211_v49  ;;  %6414 = vmatmul.mubr.msk.f32.gmra.mrb[134].mxu1 %vm79_vm0, %v8211_v49 }
0x163d   :  { %5365 = vmatprep.mubr.f32.mxu0 %v8534_v3  ;;  %5436 = vmatprep.mubr.f32.mxu1 %v8534_v3 }
0x1703   :  { %v5157_v41 = vpop.f32.mrb[128].mxu0  ;;  %v5246_v62 = vpop.f32.mrb[128].mxu1 }
0x1704   :  { %v5158_v21 = vadd.f32 %v5157_v41, %v6965_v2  ;;  %v5159_v28 = vpop.f32.mrb[129].mxu0  ;;  %v5247_v11 = vadd.f32 %v5246_v62, %v6969_v4  ;;  %v5248_v31 = vpop.f32.mrb[129].mxu1 }
0x1705   :  { %v5160_v43 = vadd.f32 %v5159_v28, %v6971_v5  ;;  %v5249_v35 = vadd.f32 %v5248_v31, %v6976_v9 }
0x1706   :  { %v5269_v7 = vadd.f32 %v5158_v21, %v8105_v58  ;;  %v5271_v55 = vadd.f32 %v5247_v11, %v8105_v58 }
0x1707   :  { %v5163_v13 = vpop.f32.mrb[130].mxu0  ;;  %v5270_v6 = vadd.f32 %v5160_v43, %v8105_v58  ;;  %v5252_v14 = vpop.f32.mrb[130].mxu1  ;;  %v5272_v52 = vadd.f32 %v5249_v35, %v8105_v58 }
0x1708   :  { %v5164_v50 = vadd.f32 %v5163_v13, %v6983_v18  ;;  %v5165_v54 = vpop.f32.mrb[131].mxu0  ;;  %v5253_v12 = vadd.f32 %v5252_v14, %v6985_v20  ;;  %v5254_v51 = vpop.f32.mrb[131].mxu1  ;;  %v5285_v48 = vmax.f32 %v5269_v7, 0.0  ;;  %v5287_v46 = vmax.f32 %v5271_v55, 0.0 }
0x1709   :  { %v5166_v19 = vadd.f32 %v5165_v54, %v8540_v33  ;;  %v5255_v42 = vadd.f32 %v5254_v51, %v6993_v27  ;;  %v5286_v56 = vmax.f32 %v5270_v6, 0.0  ;;  %v5288_v11 = vmax.f32 %v5272_v52, 0.0 }
0x170a   :  { %v5273_v29 = vadd.f32 %v5164_v50, %v8115_v38  ;;  %v5275_v10 = vadd.f32 %v5253_v12, %v8115_v38 }
0x170b   :  { %v5274_v45 = vadd.f32 %v5166_v19, %v8115_v38  ;;  %v5169_v57 = vpop.f32.mrb[132].mxu0  ;;  %v5276_v53 = vadd.f32 %v5255_v42, %v8115_v38  ;;  %v5258_v0 = vpop.f32.mrb[132].mxu1 }
0x170c   :  { %v5289_v1 = vmax.f32 %v5273_v29, 0.0  ;;  %v5170_v34 = vadd.f32 %v5169_v57, %v8542_v25  ;;  %v5171_v44 = vpop.f32.mrb[133].mxu0  ;;  %v5291_v58 = vmax.f32 %v5275_v10, 0.0  ;;  %v5259_v21 = vadd.f32 %v5258_v0, %v8546_v32  ;;  %v5260_v28 = vpop.f32.mrb[133].mxu1 }
0x170d   :  { %v5290_v41 = vmax.f32 %v5274_v45, 0.0  ;;  %v5172_v62 = vadd.f32 %v5171_v44, %v7000_v39  ;;  %v5292_v31 = vmax.f32 %v5276_v53, 0.0  ;;  %v5261_v35 = vadd.f32 %v5260_v28, %v7002_v40 }
0x170e   :  { %v6631_v43 = vpack.c.bf16 %v5289_v1, %v5285_v48  ;;  %v6639_v7 = vpack.c.bf16 %v5291_v58, %v5287_v46  ;;  %v5277_v38 = vadd.f32 %v5170_v34, %v8123_v60  ;;  %v5279_v12 = vadd.f32 %v5259_v21, %v8123_v60 }
0x170f   :  { %v5175_v55 = vpop.f32.mrb[134].mxu0  ;;  %v6629_v13 = vpack.c.bf16 %v5290_v41, %v5286_v56  ;;  %v5264_v50 = vpop.f32.mrb[134].mxu1  ;;  %v6637_v54 = vpack.c.bf16 %v5292_v31, %v5288_v11  ;;  %v5278_v19 = vadd.f32 %v5172_v62, %v8123_v60  ;;  %v5280_v42 = vadd.f32 %v5261_v35, %v8123_v60  ;;  %v8254_v11 = vld [vmem:[%s8503_s7] sm:$0xff]  ;;  %s6753_s7 = smov [#allocation5]  }
0x1710   :  { %v5176_v6 = vadd.f32 %v5175_v55, %v7007_v47  ;;  %v5177_v14 = vpop.f32.mrb[135].mxu0  ;;  %v5265_v51 = vadd.f32 %v5264_v50, %v7016_v30  ;;  %v5266_v29 = vpop.f32.mrb[135].mxu1  ;;  %v5293_v57 = vmax.f32 %v5277_v38, 0.0  ;;  %v5295_v53 = vmax.f32 %v5279_v12, 0.0  ;;  %s6270_s24 = sshll.u32 %s6753_s7, 4  ;;  %s6271_s24 = int_to_ptr.vmem [resolvable:$true] %s6270_s24 }
0x1711   :  { %v5178_v52 = vadd.f32 %v5177_v14, %v7020_v16  ;;  %6630 = vmatprep.subr.bf16.mxu0 %v6629_v13  ;;  %v5267_v46 = vadd.f32 %v5266_v29, %v7024_v37  ;;  %6638 = vmatprep.subr.bf16.mxu1 %v6637_v54  ;;  %v5294_v34 = vmax.f32 %v5278_v19, 0.0  ;;  %v5296_v60 = vmax.f32 %v5280_v42, 0.0  ;;  %s6722_s25 = scalar_lea.vmem %s6271_s24, 512  ;;  %p6727_p9 = scmp.lt.s32.totalorder %s6271_s24, %s6271_s24 }
0x1712   :  { %v5281_v48 = vadd.f32 %v5176_v6, %v8133_v36  ;;  %6632 = vmatpush1.bf16.msra.mxu0 %v6631_v43  ;;  %v5283_v10 = vadd.f32 %v5265_v51, %v8133_v36  ;;  %6640 = vmatpush1.bf16.msra.mxu1 %v6639_v7  ;;  %v5443_v38 = vmul.f32 0.99719805, %v8172_v17  ;;  %v5445_v50 = vmul.f32 0.99719805, %v8175_v23  ;;  %p6723_p8 = scmp.ne.s32.totalorder %s6271_s24, %s6722_s25  ;;  %p6728_p10 = scmp.lt.s32.totalorder %s6722_s25, %s6722_s25 }
0x1713   :  { %v5282_v45 = vadd.f32 %v5178_v52, %v8133_v36  ;;  %v5284_v1 = vadd.f32 %v5267_v46, %v8133_v36  ;;  %v5444_v12 = vmul.f32 0.99719805, %v8177_v15  ;;  %v5446_v52 = vmul.f32 0.99719805, %v8179_v22 }
0x1714   :  { %v5297_v56 = vmax.f32 %v5281_v48, 0.0  ;;  %v5299_v0 = vmax.f32 %v5283_v10, 0.0  ;;  %p6729_p11 = por %p6728_p10, %p6727_p9 }
0x1715   :  { %v5298_v44 = vmax.f32 %v5282_v45, 0.0  ;;  %v5300_v41 = vmax.f32 %v5284_v1, 0.0 }
0x1716   :  { %v6635_v58 = vpack.c.bf16 %v5297_v56, %v5293_v57  ;;  %v6643_v21 = vpack.c.bf16 %v5299_v0, %v5295_v53  ;;  %p6730_p12 = pnand %p6729_p11, %p6723_p8 }
0x1717   :  { %v6633_v62 = vpack.c.bf16 %v5298_v44, %v5294_v34  ;;  %v6641_v28 = vpack.c.bf16 %v5300_v41, %v5296_v60 }
0x1719   :  { %6634 = vmatprep.subr.bf16.mxu0 %v6633_v62  ;;  %6642 = vmatprep.subr.bf16.mxu1 %v6641_v28 }
0x171a   :  { %6636 = vmatpush1.bf16.msra.mxu0 %v6635_v58  ;;  %6644 = vmatpush1.bf16.msra.mxu1 %v6643_v21 }
0x171d   :  { %6415 = vmatmul.mubr.msk.f32.vlgmr.msra.gmra.mrb[136].mxu0 %vm551_vm1, %v8254_v11  ;;  %6416 = vmatmul.mubr.msk.f32.vlgmr.msra.gmra.mrb[136].mxu1 %vm551_vm1, %v8254_v11 }
0x171e   :  { %5539 = vmatprep.mubr.f32.mxu0 %v8534_v3  ;;  %5628 = vmatprep.mubr.f32.mxu1 %v8534_v3 }
0x17f0   :  { %v5367_v36 = vpop.f32.mrb[136].mxu0  ;;  %v5438_v31 = vpop.f32.mrb[136].mxu1 }
0x17f1   :  { %v5368_v43 = vadd.f32 %v5367_v36, %v7045_v24  ;;  %v5369_v35 = vpop.f32.mrb[137].mxu0  ;;  %v5439_v7 = vadd.f32 %v5438_v31, %v7045_v24  ;;  %v5440_v13 = vpop.f32.mrb[137].mxu1 }
0x17f2   :  { %v5370_v55 = vadd.f32 %v5369_v35, %v7045_v24  ;;  %v5441_v14 = vadd.f32 %v5440_v13, %v7045_v24 }
0x17f3   :  { %v5447_v6 = vmul.f32 0.05293361, %v5368_v43  ;;  %v5449_v54 = vmul.f32 0.05293361, %v5439_v7 }
0x17f4   :  { %v5448_v19 = vmul.f32 0.05293361, %v5370_v55  ;;  %v5450_v29 = vmul.f32 0.05293361, %v5441_v14 }
0x17f5   :  { %v5451_v51 = vadd.f32 %v5447_v6, %v5443_v38  ;;  %v5453_v42 = vadd.f32 %v5449_v54, %v5445_v50  ;;  %v8328_v50 = vmul.f32 -0.97800577, %v8547_v26 }
0x17f6   :  { %v5452_v48 = vadd.f32 %v5448_v19, %v5444_v12  ;;  %v5454_v10 = vadd.f32 %v5450_v29, %v5446_v52 }
0x17f7   :  { %v5455_v46 = vsub.f32 %v8172_v17, %v5451_v51  ;;  %v5457_v45 = vsub.f32 %v8175_v23, %v5453_v42 }
0x17f8   :  { %v5456_v57 = vsub.f32 %v8177_v15, %v5452_v48  ;;  %v5458_v1 = vsub.f32 %v8179_v22, %v5454_v10 }
0x17f9   :  { %v8273_v56 = vmul.f32 18.865103, %v5455_v46  ;;  %v8276_v53 = vmul.f32 18.865103, %v5457_v45  ;;  %v8550_v46 = vld [vmem:[#allocation9_spill] sm:$0xff] }
0x17fa   :  { %v8278_v34 = vmul.f32 18.865103, %v5456_v57  ;;  %v8281_v44 = vmul.f32 18.865103, %v5458_v1  ;;  %v8338_v10 = vmul.f32 -0.97800577, %v8550_v46 }
0x17fb   :  { %v5463_v0 = vmul.f32 -0.033007927, %v8273_v56  ;;  %v5465_v60 = vmul.f32 -0.033007927, %v8276_v53 }
0x17fc   :  { %v5464_v58 = vmul.f32 -0.033007927, %v8278_v34  ;;  %v5466_v21 = vmul.f32 -0.033007927, %v8281_v44 }
0x17fd   :  { %v8286_v41 = vadd.f32 %v5463_v0, %v8172_v17  ;;  %v8290_v62 = vadd.f32 %v5465_v60, %v8175_v23 }
0x17fe   :  { %v8293_v28 = vadd.f32 %v5464_v58, %v8177_v15  ;;  %v8296_v36 = vadd.f32 %v5466_v21, %v8179_v22 }
0x17ff   :  { %v5471_v35 = vmul.f32 0.9998001, %v8286_v41  ;;  %v5473_v7 = vmul.f32 0.9998001, %v8290_v62 }
0x1800   :  { %v5472_v43 = vmul.f32 0.9998001, %v8293_v28  ;;  %v5474_v31 = vmul.f32 0.9998001, %v8296_v36 }
0x1802   :  { %5475 = vmatprep.subr.mxu0 %v5472_v43  ;;  %5564 = vmatprep.subr.mxu1 %v5474_v31  ;;  %v8551_v43 = vld [vmem:[#allocation10_spill] sm:$0xff] }
0x1803   :  { %5476 = vmatpush1.msra.mxu0 %v5471_v35  ;;  %5565 = vmatpush1.msra.mxu1 %v5473_v7  ;;  %v8346_v31 = vmul.f32 -0.97800577, %v8551_v43 }
0x1804   :  { %6417 = vmatmul.mubr.msk.f32.vlgmr.msra.gmra.mrb[138].mxu0 %vm79_vm0, %v8072_v61  ;;  %6421 = vmatmul.mubr.msk.f32.vlgmr.msra.gmra.mrb[138].mxu1 %vm79_vm0, %v8072_v61 }
0x1805   :  { %5545 = vmatprep.mubr.f32.mxu0 %v8534_v3  ;;  %5634 = vmatprep.mubr.f32.mxu1 %v8534_v3 }
0x1808   :  { %6418 = vmatmul.mubr.msk.f32.gmra.mrb[140].mxu0 %vm79_vm0, %v8083_v59  ;;  %6422 = vmatmul.mubr.msk.f32.gmra.mrb[140].mxu1 %vm79_vm0, %v8083_v59 }
0x1809   :  { %5551 = vmatprep.mubr.f32.mxu0 %v8534_v3  ;;  %5640 = vmatprep.mubr.f32.mxu1 %v8534_v3 }
0x180c   :  { %6419 = vmatmul.mubr.msk.f32.gmra.mrb[142].mxu0 %vm79_vm0, %v8200_v63  ;;  %6423 = vmatmul.mubr.msk.f32.gmra.mrb[142].mxu1 %vm79_vm0, %v8200_v63 }
0x180d   :  { %5557 = vmatprep.mubr.f32.mxu0 %v8534_v3  ;;  %5646 = vmatprep.mubr.f32.mxu1 %v8534_v3 }
0x1810   :  { %6420 = vmatmul.mubr.msk.f32.gmra.mrb[144].mxu0 %vm79_vm0, %v8211_v49  ;;  %6424 = vmatmul.mubr.msk.f32.gmra.mrb[144].mxu1 %vm79_vm0, %v8211_v49 }
0x1811   :  { %5753 = vmatprep.mubr.f32.mxu0 %v8534_v3  ;;  %5824 = vmatprep.mubr.f32.mxu1 %v8534_v3 }
0x18d7   :  { %v5541_v55 = vpop.f32.mrb[138].mxu0  ;;  %v5630_v38 = vpop.f32.mrb[138].mxu1 }
0x18d8   :  { %v5542_v13 = vadd.f32 %v5541_v55, %v6965_v2  ;;  %v5543_v6 = vpop.f32.mrb[139].mxu0  ;;  %v5631_v14 = vadd.f32 %v5630_v38, %v6969_v4  ;;  %v5632_v12 = vpop.f32.mrb[139].mxu1 }
0x18d9   :  { %v5544_v54 = vadd.f32 %v5543_v6, %v6971_v5  ;;  %v5633_v19 = vadd.f32 %v5632_v12, %v6976_v9 }
0x18da   :  { %v5657_v51 = vadd.f32 %v8328_v50, %v5542_v13  ;;  %v5659_v52 = vadd.f32 %v8328_v50, %v5631_v14 }
0x18db   :  { %v5547_v29 = vpop.f32.mrb[140].mxu0  ;;  %v5658_v42 = vadd.f32 %v8328_v50, %v5544_v54  ;;  %v5636_v26 = vpop.f32.mrb[140].mxu1  ;;  %v5660_v60 = vadd.f32 %v8328_v50, %v5633_v19 }
0x18dc   :  { %v5548_v48 = vadd.f32 %v5547_v29, %v6983_v18  ;;  %v5549_v45 = vpop.f32.mrb[141].mxu0  ;;  %v5637_v57 = vadd.f32 %v5636_v26, %v6985_v20  ;;  %v5638_v0 = vpop.f32.mrb[141].mxu1  ;;  %v5673_v35 = vmax.f32 %v5657_v51, 0.0  ;;  %v5675_v7 = vmax.f32 %v5659_v52, 0.0 }
0x18dd   :  { %v5550_v1 = vadd.f32 %v5549_v45, %v8540_v33  ;;  %v5639_v21 = vadd.f32 %v5638_v0, %v6993_v27  ;;  %v5674_v6 = vmax.f32 %v5658_v42, 0.0  ;;  %v5676_v45 = vmax.f32 %v5660_v60, 0.0 }
0x18de   :  { %v5661_v58 = vadd.f32 %v8338_v10, %v5548_v48  ;;  %v5663_v55 = vadd.f32 %v8338_v10, %v5637_v57 }
0x18df   :  { %v5662_v13 = vadd.f32 %v8338_v10, %v5550_v1  ;;  %v5553_v38 = vpop.f32.mrb[142].mxu0  ;;  %v5664_v54 = vadd.f32 %v8338_v10, %v5639_v21  ;;  %v5642_v19 = vpop.f32.mrb[142].mxu1  ;;  %v8356_v21 = vmul.f32 -0.97800577, %v6974_v8 }
0x18e0   :  { %v5677_v14 = vmax.f32 %v5661_v58, 0.0  ;;  %v5554_v12 = vadd.f32 %v5553_v38, %v8542_v25  ;;  %v5555_v29 = vpop.f32.mrb[143].mxu0  ;;  %v5679_v48 = vmax.f32 %v5663_v55, 0.0  ;;  %v5643_v26 = vadd.f32 %v5642_v19, %v8546_v32  ;;  %v5644_v52 = vpop.f32.mrb[143].mxu1 }
0x18e1   :  { %v5678_v46 = vmax.f32 %v5662_v13, 0.0  ;;  %v5556_v51 = vadd.f32 %v5555_v29, %v7000_v39  ;;  %v5680_v0 = vmax.f32 %v5664_v54, 0.0  ;;  %v5645_v1 = vadd.f32 %v5644_v52, %v7002_v40 }
0x18e2   :  { %v6647_v57 = vpack.c.bf16 %v5677_v14, %v5673_v35  ;;  %v6655_v42 = vpack.c.bf16 %v5679_v48, %v5675_v7  ;;  %v5665_v38 = vadd.f32 %v8346_v31, %v5554_v12  ;;  %v5667_v29 = vadd.f32 %v8346_v31, %v5643_v26 }
0x18e3   :  { %v5559_v58 = vpop.f32.mrb[144].mxu0  ;;  %v6645_v43 = vpack.c.bf16 %v5678_v46, %v5674_v6  ;;  %v5648_v13 = vpop.f32.mrb[144].mxu1  ;;  %v6653_v32 = vpack.c.bf16 %v5680_v0, %v5676_v45  ;;  %v5666_v60 = vadd.f32 %v8346_v31, %v5556_v51  ;;  %v5668_v8 = vadd.f32 %v8346_v31, %v5645_v1 }
0x18e4   :  { %v5560_v55 = vadd.f32 %v5559_v58, %v7007_v47  ;;  %v5561_v19 = vpop.f32.mrb[145].mxu0  ;;  %v5649_v35 = vadd.f32 %v5648_v13, %v7016_v30  ;;  %v5650_v14 = vpop.f32.mrb[145].mxu1  ;;  %v5681_v46 = vmax.f32 %v5665_v38, 0.0  ;;  %v5683_v52 = vmax.f32 %v5667_v29, 0.0 }
0x18e5   :  { %v5562_v7 = vadd.f32 %v5561_v19, %v7020_v16  ;;  %6646 = vmatprep.subr.bf16.mxu0 %v6645_v43  ;;  %v5651_v54 = vadd.f32 %v5650_v14, %v7024_v37  ;;  %6654 = vmatprep.subr.bf16.mxu1 %v6653_v32  ;;  %v5682_v45 = vmax.f32 %v5666_v60, 0.0  ;;  %v5684_v1 = vmax.f32 %v5668_v8, 0.0 }
0x18e6   :  { %v5669_v6 = vadd.f32 %v8356_v21, %v5560_v55  ;;  %6648 = vmatpush1.bf16.msra.mxu0 %v6647_v57  ;;  %v5671_v12 = vadd.f32 %v8356_v21, %v5649_v35  ;;  %6656 = vmatpush1.bf16.msra.mxu1 %v6655_v42  ;;  %v5831_v14 = vmul.f32 0.9996002, %v8286_v41 }
0x18e7   :  { %v5670_v48 = vadd.f32 %v8356_v21, %v5562_v7  ;;  %v5672_v51 = vadd.f32 %v8356_v21, %v5651_v54 }
0x18e8   :  { %v5685_v26 = vmax.f32 %v5669_v6, 0.0  ;;  %v5687_v0 = vmax.f32 %v5671_v12, 0.0  ;;  %v5833_v6 = vmul.f32 0.9996002, %v8290_v62 }
0x18e9   :  { %v5686_v58 = vmax.f32 %v5670_v48, 0.0  ;;  %v5688_v55 = vmax.f32 %v5672_v51, 0.0  ;;  %v5832_v48 = vmul.f32 0.9996002, %v8293_v28  ;;  %v5834_v51 = vmul.f32 0.9996002, %v8296_v36 }
0x18ea   :  { %v6651_v43 = vpack.c.bf16 %v5685_v26, %v5681_v46  ;;  %v6659_v13 = vpack.c.bf16 %v5687_v0, %v5683_v52 }
0x18eb   :  { %v6649_v19 = vpack.c.bf16 %v5686_v58, %v5682_v45  ;;  %v6657_v32 = vpack.c.bf16 %v5688_v55, %v5684_v1 }
0x18ed   :  { %6650 = vmatprep.subr.bf16.mxu0 %v6649_v19  ;;  %6658 = vmatprep.subr.bf16.mxu1 %v6657_v32  ;;  %v5864_v32 = vld [vmem:[#allocation2 + $0xe0] sm:$0xff] }
0x18ee   :  { %6652 = vmatpush1.bf16.msra.mxu0 %v6651_v43  ;;  %6660 = vmatpush1.bf16.msra.mxu1 %v6659_v13 }
0x18f1   :  { %6425 = vmatmul.mubr.msk.f32.vlgmr.msra.gmra.mrb[146].mxu0 %vm551_vm1, %v8254_v11  ;;  %6426 = vmatmul.mubr.msk.f32.vlgmr.msra.gmra.mrb[146].mxu1 %vm551_vm1, %v8254_v11 }
0x18f2   :  { %5944 = vmatprep.mubr.f32.mxu0 %v8534_v3  ;;  %6033 = vmatprep.mubr.f32.mxu1 %v8534_v3 }
0x19c4   :  { %v5755_v57 = vpop.f32.mrb[146].mxu0  ;;  %v5826_v38 = vpop.f32.mrb[146].mxu1 }
0x19c5   :  { %v5756_v42 = vadd.f32 %v5755_v57, %v7045_v24  ;;  %v5757_v29 = vpop.f32.mrb[147].mxu0  ;;  %v5827_v60 = vadd.f32 %v5826_v38, %v7045_v24  ;;  %v5828_v7 = vpop.f32.mrb[147].mxu1 }
0x19c6   :  { %v5758_v35 = vadd.f32 %v5757_v29, %v7045_v24  ;;  %v5829_v54 = vadd.f32 %v5828_v7, %v7045_v24  ;;  %v5866_v29 = vld [vmem:[#allocation2 + $0xf0] sm:$0xff] }
0x19c7   :  { %v5835_v8 = vmul.f32 0.019996, %v5756_v42  ;;  %v5837_v12 = vmul.f32 0.019996, %v5827_v60 }
0x19c8   :  { %v5836_v46 = vmul.f32 0.019996, %v5758_v35  ;;  %v5838_v52 = vmul.f32 0.019996, %v5829_v54  ;;  %v5865_v35 = vld [vmem:[#allocation2 + $0xe8] sm:$0xff]  ;;  %v5870_v54 = vmul.f32 0.0, %v5866_v29 }
0x19c9   :  { %v5839_v26 = vadd.f32 %v5835_v8, %v5831_v14  ;;  %v5841_v45 = vadd.f32 %v5837_v12, %v5833_v6  ;;  %v5867_v14 = vld [vmem:[#allocation2 + $0xf8] sm:$0xff]  ;;  %v5869_v12 = vmul.f32 0.0, %v5865_v35 }
0x19ca   :  { %v5840_v0 = vadd.f32 %v5836_v46, %v5832_v48  ;;  %v5842_v1 = vadd.f32 %v5838_v52, %v5834_v51 }
0x19cb   :  { %v5843_v58 = vsub.f32 %v8286_v41, %v5839_v26  ;;  %v5845_v43 = vsub.f32 %v8290_v62, %v5841_v45  ;;  %v5868_v62 = vmul.f32 0.0, %v5864_v32 }
0x19cc   :  { %v5844_v55 = vsub.f32 %v8293_v28, %v5840_v0  ;;  %v5846_v19 = vsub.f32 %v8296_v36, %v5842_v1 }
0x19cd   :  { %v5847_v13 = vmul.f32 50.0, %v5843_v58  ;;  %v5849_v57 = vmul.f32 50.0, %v5845_v43 }
0x19ce   :  { %v5848_v42 = vmul.f32 50.0, %v5844_v55  ;;  %v5850_v60 = vmul.f32 50.0, %v5846_v19 }
0x19cf   :  { %v5851_v38 = vadd.f32 %v5847_v13, %v8273_v56  ;;  %v5853_v7 = vadd.f32 %v5849_v57, %v8276_v53  ;;  %v5871_v56 = vmul.f32 0.0, %v5867_v14 }
0x19d0   :  { %v5852_v41 = vadd.f32 %v5848_v42, %v8278_v34  ;;  %v5854_v28 = vadd.f32 %v5850_v60, %v8281_v44 }
0x19d1   :  { %v5855_v8 = vmul.f32 -0.016503964, %v5851_v38  ;;  %v5857_v6 = vmul.f32 -0.016503964, %v5853_v7 }
0x19d2   :  { %v5856_v36 = vmul.f32 -0.016503964, %v5852_v41  ;;  %v5858_v46 = vmul.f32 -0.016503964, %v5854_v28 }
0x19d3   :  { %v5859_v48 = vadd.f32 %v5855_v8, %v8172_v17  ;;  %v5861_v26 = vadd.f32 %v5857_v6, %v8175_v23 }
0x19d4   :  { %v5860_v51 = vadd.f32 %v5856_v36, %v8177_v15  ;;  %v5862_v34 = vadd.f32 %v5858_v46, %v8179_v22 }
0x19d5   :  { %v8395_v53 = vadd.f32 %v5868_v62, %v5859_v48  ;;  %v8398_v52 = vadd.f32 %v5870_v54, %v5861_v26  ;;  %v8552_v54 = vld [vmem:[#allocation13_spill] sm:$0xff] }
0x19d6   :  { %v8400_v45 = vadd.f32 %v5869_v12, %v5860_v51  ;;  %v8402_v44 = vadd.f32 %v5871_v56, %v5862_v34 }
0x19d7   :  { %v5876_v58 = vmul.f32 0.9998001, %v8395_v53  ;;  %v5878_v23 = vmul.f32 0.9998001, %v8398_v52 }
0x19d8   :  { %v5877_v0 = vmul.f32 0.9998001, %v8400_v45  ;;  %v5879_v17 = vmul.f32 0.9998001, %v8402_v44 }
0x19da   :  { %5880 = vmatprep.subr.mxu0 %v5877_v0  ;;  %5969 = vmatprep.subr.mxu1 %v5879_v17 }
0x19db   :  { %5881 = vmatpush1.msra.mxu0 %v5876_v58  ;;  %5970 = vmatpush1.msra.mxu1 %v5878_v23 }
0x19dc   :  { %6427 = vmatmul.mubr.msk.f32.vlgmr.msra.gmra.mrb[148].mxu0 %vm79_vm0, %v8072_v61  ;;  %6431 = vmatmul.mubr.msk.f32.vlgmr.msra.gmra.mrb[148].mxu1 %vm79_vm0, %v8072_v61 }
0x19dd   :  { %5950 = vmatprep.mubr.f32.mxu0 %v8534_v3  ;;  %6039 = vmatprep.mubr.f32.mxu1 %v8534_v3 }
0x19e0   :  { %6428 = vmatmul.mubr.msk.f32.gmra.mrb[150].mxu0 %vm79_vm0, %v8083_v59  ;;  %6432 = vmatmul.mubr.msk.f32.gmra.mrb[150].mxu1 %vm79_vm0, %v8083_v59 }
0x19e1   :  { %5956 = vmatprep.mubr.f32.mxu0 %v8534_v3  ;;  %6045 = vmatprep.mubr.f32.mxu1 %v8534_v3 }
0x19e4   :  { %6429 = vmatmul.mubr.msk.f32.gmra.mrb[152].mxu0 %vm79_vm0, %v8200_v63  ;;  %6433 = vmatmul.mubr.msk.f32.gmra.mrb[152].mxu1 %vm79_vm0, %v8200_v63 }
0x19e5   :  { %5962 = vmatprep.mubr.f32.mxu0 %v8534_v3  ;;  %6051 = vmatprep.mubr.f32.mxu1 %v8534_v3 }
0x19e8   :  { %6430 = vmatmul.mubr.msk.f32.gmra.mrb[154].mxu0 %vm79_vm0, %v8211_v49  ;;  %6434 = vmatmul.mubr.msk.f32.gmra.mrb[154].mxu1 %vm79_vm0, %v8211_v49 }
0x19e9   :  { %6154 = vmatprep.mubr.f32.mxu0 %v8534_v3  ;;  %6225 = vmatprep.mubr.f32.mxu1 %v8534_v3 }
0x1aaf   :  { %v5946_v61 = vpop.f32.mrb[148].mxu0  ;;  %v6035_v15 = vpop.f32.mrb[148].mxu1 }
0x1ab0   :  { %v5947_v59 = vadd.f32 %v5946_v61, %v6965_v2  ;;  %v5948_v22 = vpop.f32.mrb[149].mxu0  ;;  %v6036_v63 = vadd.f32 %v6035_v15, %v6969_v4  ;;  %v6037_v43 = vpop.f32.mrb[149].mxu1 }
0x1ab1   :  { %v5949_v1 = vadd.f32 %v5948_v22, %v6971_v5  ;;  %v6038_v55 = vadd.f32 %v6037_v43, %v6976_v9 }
0x1ab2   :  { %v6058_v13 = vadd.f32 %v5947_v59, %v8328_v50  ;;  %v6060_v49 = vadd.f32 %v6036_v63, %v8328_v50 }
0x1ab3   :  { %v5952_v19 = vpop.f32.mrb[150].mxu0  ;;  %v6059_v32 = vadd.f32 %v5949_v1, %v8328_v50  ;;  %v6041_v57 = vpop.f32.mrb[150].mxu1  ;;  %v6061_v5 = vadd.f32 %v6038_v55, %v8328_v50 }
0x1ab4   :  { %v5953_v3 = vadd.f32 %v5952_v19, %v6983_v18  ;;  %v5954_v2 = vpop.f32.mrb[151].mxu0  ;;  %v6042_v42 = vadd.f32 %v6041_v57, %v6985_v20  ;;  %v6043_v38 = vpop.f32.mrb[151].mxu1  ;;  %v6074_v60 = vmax.f32 %v6058_v13, 0.0  ;;  %v6076_v35 = vmax.f32 %v6060_v49, 0.0 }
0x1ab5   :  { %v5955_v4 = vadd.f32 %v5954_v2, %v8540_v33  ;;  %v6044_v29 = vadd.f32 %v6043_v38, %v6993_v27  ;;  %v6075_v14 = vmax.f32 %v6059_v32, 0.0  ;;  %v6077_v48 = vmax.f32 %v6061_v5, 0.0 }
0x1ab6   :  { %v6062_v9 = vadd.f32 %v5953_v3, %v8338_v10  ;;  %v6064_v7 = vadd.f32 %v6042_v42, %v8338_v10 }
0x1ab7   :  { %v6063_v41 = vadd.f32 %v5955_v4, %v8338_v10  ;;  %v5958_v18 = vpop.f32.mrb[152].mxu0  ;;  %v6065_v20 = vadd.f32 %v6044_v29, %v8338_v10  ;;  %v6047_v62 = vpop.f32.mrb[152].mxu1 }
0x1ab8   :  { %v6078_v8 = vmax.f32 %v6062_v9, 0.0  ;;  %v5959_v33 = vadd.f32 %v5958_v18, %v8542_v25  ;;  %v5960_v28 = vpop.f32.mrb[153].mxu0  ;;  %v6080_v50 = vmax.f32 %v6064_v7, 0.0  ;;  %v6048_v36 = vadd.f32 %v6047_v62, %v8552_v54  ;;  %v6049_v12 = vpop.f32.mrb[153].mxu1 }
0x1ab9   :  { %v6079_v6 = vmax.f32 %v6063_v41, 0.0  ;;  %v5961_v27 = vadd.f32 %v5960_v28, %v7000_v39  ;;  %v6081_v56 = vmax.f32 %v6065_v20, 0.0  ;;  %v6050_v26 = vadd.f32 %v6049_v12, %v7002_v40 }
0x1aba   :  { %v6663_v46 = vpack.c.bf16 %v6078_v8, %v6074_v60  ;;  %v6671_v51 = vpack.c.bf16 %v6080_v50, %v6076_v35  ;;  %v6066_v10 = vadd.f32 %v5959_v33, %v8346_v31  ;;  %v6068_v61 = vadd.f32 %v6048_v36, %v8346_v31 }
0x1abb   :  { %v5964_v34 = vpop.f32.mrb[154].mxu0  ;;  %v6661_v0 = vpack.c.bf16 %v6079_v6, %v6075_v14  ;;  %v6053_v17 = vpop.f32.mrb[154].mxu1  ;;  %v6669_v23 = vpack.c.bf16 %v6081_v56, %v6077_v48  ;;  %v6067_v39 = vadd.f32 %v5961_v27, %v8346_v31  ;;  %v6069_v40 = vadd.f32 %v6050_v26, %v8346_v31 }
0x1abc   :  { %v5965_v25 = vadd.f32 %v5964_v34, %v7007_v47  ;;  %v5966_v58 = vpop.f32.mrb[155].mxu0  ;;  %v6054_v59 = vadd.f32 %v6053_v17, %v7016_v30  ;;  %v6055_v22 = vpop.f32.mrb[155].mxu1  ;;  %v6082_v55 = vmax.f32 %v6066_v10, 0.0  ;;  %v6232_v35 = vmul.f32 0.9996002, %v8395_v53 }
0x1abd   :  { %v5967_v15 = vadd.f32 %v5966_v58, %v7020_v16  ;;  %6662 = vmatprep.subr.bf16.mxu0 %v6661_v0  ;;  %v6056_v1 = vadd.f32 %v6055_v22, %v7024_v37  ;;  %6670 = vmatprep.subr.bf16.mxu1 %v6669_v23  ;;  %v6084_v16 = vmax.f32 %v6068_v61, 0.0  ;;  %v6083_v49 = vmax.f32 %v6067_v39, 0.0 }
0x1abe   :  { %v6070_v63 = vadd.f32 %v5965_v25, %v8356_v21  ;;  %6664 = vmatpush1.bf16.msra.mxu0 %v6663_v46  ;;  %v6072_v47 = vadd.f32 %v6054_v59, %v8356_v21  ;;  %6672 = vmatpush1.bf16.msra.mxu1 %v6671_v51  ;;  %v6085_v31 = vmax.f32 %v6069_v40, 0.0  ;;  %v6234_v41 = vmul.f32 0.9996002, %v8398_v52 }
0x1abf   :  { %v6071_v43 = vadd.f32 %v5967_v15, %v8356_v21  ;;  %v6073_v30 = vadd.f32 %v6056_v1, %v8356_v21  ;;  %v6235_v33 = vmul.f32 0.9996002, %v8402_v44 }
0x1ac0   :  { %v6086_v13 = vmax.f32 %v6070_v63, 0.0  ;;  %v6088_v19 = vmax.f32 %v6072_v47, 0.0 }
0x1ac1   :  { %v6087_v32 = vmax.f32 %v6071_v43, 0.0  ;;  %v6089_v57 = vmax.f32 %v6073_v30, 0.0 }
0x1ac2   :  { %v6667_v3 = vpack.c.bf16 %v6086_v13, %v6082_v55  ;;  %v6675_v2 = vpack.c.bf16 %v6088_v19, %v6084_v16 }
0x1ac3   :  { %v6665_v37 = vpack.c.bf16 %v6087_v32, %v6083_v49  ;;  %v6673_v42 = vpack.c.bf16 %v6089_v57, %v6085_v31 }
0x1ac5   :  { %6666 = vmatprep.subr.bf16.mxu0 %v6665_v37  ;;  %6674 = vmatprep.subr.bf16.mxu1 %v6673_v42 }
0x1ac6   :  { %6668 = vmatpush1.bf16.msra.mxu0 %v6667_v3  ;;  %6676 = vmatpush1.bf16.msra.mxu1 %v6675_v2 }
0x1ac9   :  { %6435 = vmatmul.mubr.msk.f32.vlgmr.msra.gmra.mrb[156].mxu0 %vm551_vm1, %v8254_v11  ;;  %6436 = vmatmul.mubr.msk.f32.vlgmr.msra.gmra.mrb[156].mxu1 %vm551_vm1, %v8254_v11  ;;  %v6233_v11 = vmul.f32 0.9996002, %v8400_v45 }
0x1b9c   :  { %v6156_v21 = vpop.f32.mrb[156].mxu0  ;;  %v6227_v38 = vpop.f32.mrb[156].mxu1 }
0x1b9d   :  { %v6157_v4 = vadd.f32 %v6156_v21, %v7045_v24  ;;  %v6158_v5 = vpop.f32.mrb[157].mxu0  ;;  %v6228_v9 = vadd.f32 %v6227_v38, %v7045_v24  ;;  %v6229_v60 = vpop.f32.mrb[157].mxu1 }
0x1b9e   :  { %v6159_v29 = vadd.f32 %v6158_v5, %v7045_v24  ;;  %v6230_v18 = vadd.f32 %v6229_v60, %v7045_v24 }
0x1b9f   :  { %v6236_v7 = vmul.f32 0.019996, %v6157_v4  ;;  %v6238_v14 = vmul.f32 0.019996, %v6228_v9 }
0x1ba0   :  { %v6237_v8 = vmul.f32 0.019996, %v6159_v29  ;;  %v6239_v62 = vmul.f32 0.019996, %v6230_v18 }
0x1ba1   :  { %v6240_v20 = vadd.f32 %v6236_v7, %v6232_v35  ;;  %v6242_v28 = vadd.f32 %v6238_v14, %v6234_v41 }
0x1ba2   :  { %v6241_v50 = vadd.f32 %v6237_v8, %v6233_v11  ;;  %v6243_v54 = vadd.f32 %v6239_v62, %v6235_v33 }
0x1ba3   :  { %v6244_v6 = vsub.f32 %v8395_v53, %v6240_v20  ;;  %v6246_v36 = vsub.f32 %v8398_v52, %v6242_v28 }
0x1ba4   :  { %v6245_v27 = vsub.f32 %v8400_v45, %v6241_v50  ;;  %v6247_v24 = vsub.f32 %v8402_v44, %v6243_v54 }
0x1ba5   :  { %v6248_v12 = vmul.f32 50.0, %v6244_v6  ;;  %v6250_v48 = vmul.f32 50.0, %v6246_v36 }
0x1ba6   :  { %v6249_v46 = vmul.f32 50.0, %v6245_v27  ;;  %v6251_v26 = vmul.f32 50.0, %v6247_v24 }
0x1ba7   :  { %v6252_v56 = vmul.f32 -0.02, %v6248_v12  ;;  %v6254_v51 = vmul.f32 -0.02, %v6250_v48 }
0x1ba8   :  { %v6253_v34 = vmul.f32 -0.02, %v6249_v46  ;;  %v6255_v10 = vmul.f32 -0.02, %v6251_v26 }
0x1ba9   :  { %v6256_v0 = vadd.f32 %v6252_v56, %v8395_v53  ;;  %v6258_v25 = vadd.f32 %v6254_v51, %v8398_v52 }
0x1baa   :  { %v6257_v17 = vadd.f32 %v6253_v34, %v8400_v45  ;;  %v6259_v58 = vadd.f32 %v6255_v10, %v8402_v44 }
0x1bab   :  { %6260 = vst [vmem:[#allocation5] sm:$0xff] %v6256_v0  ;;  %6262 = vst [vmem:[#allocation5 + $0x10] sm:$0xff] %v6258_v25 }
0x1bac   :  { %6261 = vst [vmem:[#allocation5 + $0x8] sm:$0xff] %v6257_v17  ;;  %6263 = vst [vmem:[#allocation5 + $0x18] sm:$0xff] %v6259_v58 }
0x1bad   :  { %6733 = shalt.err (!%p6730_p12)
}
0x1bae   :  { %s6734_s2 = scalar_lea.hbm %s8505_s9, 512 }
0x1baf   :  { %p6735_p13 = scmp.ne.s32.totalorder %s8505_s9, %s6734_s2  ;;  %p6738_p0 = scmp.lt.u32.totalorder %s6734_s2, %s8505_s9 }
0x1bb1   :  { %p6740_p1 = pnand %p6738_p0, %p6735_p13 }
0x1bb3   :  { %6743 = shalt.err (!%p6740_p1)
}
0x1bb4   :  { %6273 = dma.vmem_to_hbm [thread:$0]  %s6271_s24, 512, %s8505_s9, [#allocation4]  }
0x1bb5   :  { %6746 = dma.done.wait [#allocation4], 512  }
0x1bb6   :  { %6747 = vsyncadd [#allocation4], 4294966784 }
0x1bb7   :  { %6277 = vsyncpa [#allocation3], 1 }
0x1bb8   :  { %6278 = vsyncpa [#allocation4], 1 }

</bundles_post_ra>
